<compile_context>
chip_gen: v7x
topology: tpu7x:2x2x1
jax: 0.10.0
libtpu: 0.0.40
codegen_flags: <defaults>
</compile_context>

<pallas_src>
import functools

import numpy as np
import jax
import jax.numpy as jnp
from jax.experimental import pallas as pl
from jax.experimental.pallas import tpu as pltpu


_ALIGN = 16  # bf16 sublane tile: keep every K-group 16-row aligned.


def _pad_to(c):
    return -(-c // _ALIGN) * _ALIGN


# ----------------------------------------------------------------------------
# Tap tables: (phase_index, row_shift, col_shift) per 3x3 tap, kh-major.
#   stride 1: single phase (the input itself), shifts in {-1, 0, +1}.
#   stride 2: polyphase decomposition X_{pr,pc}[i, j] = X[2i+pr, 2j+pc];
#             tap (kh, kw) reads phase (pr, pc) shifted by (dh, dw) in {-1, 0}.
# ----------------------------------------------------------------------------
_TAPS_S1 = tuple((0, kh - 1, kw - 1) for kh in range(3) for kw in range(3))


def _make_taps_s2():
    taps = []
    for kh in range(3):
        if kh == 1:
            pr, dh = 0, 0
        else:
            pr, dh = 1, (-1 if kh == 0 else 0)
        for kw in range(3):
            if kw == 1:
                pc, dw = 0, 0
            else:
                pc, dw = 1, (-1 if kw == 0 else 0)
            taps.append((pr * 2 + pc, dh, dw))
    return tuple(taps)


_TAPS_S2 = _make_taps_s2()


# ----------------------------------------------------------------------------
# In-kernel helpers
# ----------------------------------------------------------------------------
def _make_col_masks(W, M):
    """Column-boundary masks, built once per kernel invocation and reused by
    every tap / conv.  Row boundaries are handled exactly by the zero fill in
    _lane_shift (corner-tap bleed elements are covered by these masks)."""
    col = jax.lax.broadcasted_iota(jnp.int32, (1, M), 1) % W
    return {
        -1: (col >= 1).astype(jnp.bfloat16),
        0: None,
        1: (col < (W - 1)).astype(jnp.bfloat16),
    }


def _lane_shift(x, s):
    """y[:, m] = x[:, m + s] for 0 <= m + s < M, else 0.  s is static."""
    if s == 0:
        return x
    C, M = x.shape
    zeros = jnp.zeros((C, abs(s)), x.dtype)
    if s > 0:
        return jnp.concatenate([x[:, s:], zeros], axis=1)
    return jnp.concatenate([zeros, x[:, :M + s]], axis=1)


def _pad_rows(x, rows):
    """Zero-pad the channel (sublane) axis of x up to `rows`."""
    C, M = x.shape
    if C == rows:
        return x
    return jnp.concatenate([x, jnp.zeros((rows - C, M), x.dtype)], axis=0)


def _conv3x3_bn(x, w_ref, scale, bias, taps, cin_pad, W, col_masks):
    """x: (P*cin_pad, M) bf16 (per-phase channel-padded);
    w_ref: (3, Cout, 3*cin_pad) bf16 ref, kh-major groups, kw-major columns;
    scale/bias: (Cout, 1) f32.  Returns BN(conv3x3(x)) as f32 (Cout, M).

    K is processed as 3 kh-groups (3 accumulated MXU matmuls) to bound the
    peak im2col temporary to ~3 activation tiles."""
    single_phase = (x.shape[0] == cin_pad)
    y = None
    for g in range(3):
        cols = []
        for t in range(3):
            ph, dh, dw = taps[3 * g + t]
            xi = x if single_phase else x[ph * cin_pad:(ph + 1) * cin_pad, :]
            c = _lane_shift(xi, dh * W + dw)
            m = col_masks[dw]
            if m is not None:
                c = c * m
            cols.append(c)
        xcol = jnp.concatenate(cols, axis=0)               # (3*cin_pad, M) bf16
        part = jnp.dot(w_ref[g], xcol,
                       preferred_element_type=jnp.float32)  # (Cout, M) f32
        y = part if y is None else y + part
    return y * scale + bias


def _sblock_tail(x, w1_ref, s1, b1, w2_ref, s2, b2, o_ref, W, col_masks, c_pad):
    """x = residual (f32); conv1+BN+ReLU; conv2+BN; +residual; ReLU; store."""
    y = _conv3x3_bn(_pad_rows(x.astype(jnp.bfloat16), c_pad),
                    w1_ref, s1, b1, _TAPS_S1, c_pad, W, col_masks)
    y = jnp.maximum(y, 0.0)                                 # conv1 act
    y = _conv3x3_bn(_pad_rows(y.astype(jnp.bfloat16), c_pad),
                    w2_ref, s2, b2, _TAPS_S1, c_pad, W, col_masks)  # 'none'
    o_ref[0] = jnp.maximum(y + x, 0.0).astype(o_ref.dtype)


# ----------------------------------------------------------------------------
# Kernels
# ----------------------------------------------------------------------------
def _sblock_kernel(x_ref, w1_ref, s1_ref, b1_ref, w2_ref, s2_ref, b2_ref,
                   o_ref, *, H, W, c_pad):
    masks = _make_col_masks(W, H * W)
    _sblock_tail(x_ref[0], w1_ref, s1_ref[...], b1_ref[...],
                 w2_ref, s2_ref[...], b2_ref[...], o_ref, W, masks, c_pad)


def _down_sblock_kernel(xp_ref, xl_ref, wd_ref, sd_ref, bd_ref,
                        w1_ref, s1_ref, b1_ref, w2_ref, s2_ref, b2_ref,
                        o_ref, *, H, W, cp_pad, c_pad):
    # Fused: x_v = ReLU(BN(conv3x3 stride-2(prev))); x = x_l + x_v; SBlock(x).
    masks = _make_col_masks(W, H * W)
    xv = _conv3x3_bn(xp_ref[0], wd_ref, sd_ref[...], bd_ref[...],
                     _TAPS_S2, cp_pad, W, masks)
    x = xl_ref[0] + jnp.maximum(xv, 0.0)
    _sblock_tail(x, w1_ref, s1_ref[...], b1_ref[...],
                 w2_ref, s2_ref[...], b2_ref[...], o_ref, W, masks, c_pad)


def _down_conv_kernel(xp_ref, w_ref, s_ref, b_ref, o_ref, *, H, W, cp_pad):
    masks = _make_col_masks(W, H * W)
    y = _conv3x3_bn(xp_ref[0], w_ref, s_ref[...], b_ref[...],
                    _TAPS_S2, cp_pad, W, masks)
    o_ref[0] = jnp.maximum(y, 0.0).astype(o_ref.dtype)


# ----------------------------------------------------------------------------
# Wrappers (flattened NCHW: activations are (N, C, H*W))
# ----------------------------------------------------------------------------
_PARALLEL = pltpu.CompilerParams(dimension_semantics=("parallel",))


def _prep_conv(p):
    """(w HWIO, scale, bias) -> (w (3, Cout, 3*Cin_pad) bf16, (Cout,1), (Cout,1)).

    Weight columns for the zero-padded channel rows are zero, so padded rows
    contribute exactly nothing."""
    w, scale, bias = p
    _, _, cin, cout = w.shape
    cin_pad = _pad_to(cin)
    wp = jnp.zeros((3, 3, cin_pad, cout), w.dtype).at[:, :, :cin, :].set(w)
    wg = jnp.transpose(wp, (0, 3, 1, 2)).reshape(3, cout, 3 * cin_pad)
    return (wg.astype(jnp.bfloat16),
            scale.astype(jnp.float32).reshape(cout, 1),
            bias.astype(jnp.float32).reshape(cout, 1))


def _phase_split_bf16(x, H, W, cp_pad):
    """(N, C, H*W) f32 -> (N, 4*cp_pad, (H//2)*(W//2)) bf16; phases (pr, pc)
    stacked on the channel axis, each phase zero-padded to cp_pad rows."""
    N, C, _ = x.shape
    H2, W2 = H // 2, W // 2
    x = x.reshape(N, C, H2, 2, W2, 2).astype(jnp.bfloat16)
    x = jnp.transpose(x, (0, 3, 5, 1, 2, 4))          # (N, pr, pc, C, H2, W2)
    x = x.reshape(N, 4, C, H2 * W2)
    if cp_pad != C:
        x = jnp.pad(x, ((0, 0), (0, 0), (0, cp_pad - C), (0, 0)))
    return x.reshape(N, 4 * cp_pad, H2 * W2)


def _const_specs(*arrs):
    return [pl.BlockSpec(a.shape, lambda n, _r=a.ndim: (0,) * _r) for a in arrs]


def sblock_call(x, p_block, H, W):
    N, C, M = x.shape
    c_pad = _pad_to(C)
    w1, s1, b1 = _prep_conv(p_block["conv1"])
    w2, s2, b2 = _prep_conv(p_block["conv2"])
    act_spec = pl.BlockSpec((1, C, M), lambda n: (n, 0, 0))
    return pl.pallas_call(
        functools.partial(_sblock_kernel, H=H, W=W, c_pad=c_pad),
        out_shape=jax.ShapeDtypeStruct((N, C, M), jnp.float32),
        grid=(N,),
        in_specs=[act_spec] + _const_specs(w1, s1, b1, w2, s2, b2),
        out_specs=act_spec,
        compiler_params=_PARALLEL,
    )(x, w1, s1, b1, w2, s2, b2)


def down_sblock_call(x_prev, H_prev, W_prev, x_l, p_down, p_block, H, W):
    N, C, M = x_l.shape
    Cp = x_prev.shape[1]
    cp_pad = _pad_to(Cp)
    c_pad = _pad_to(C)
    assert H_prev // 2 == H and W_prev // 2 == W
    xp = _phase_split_bf16(x_prev, H_prev, W_prev, cp_pad)   # (N, 4*cp_pad, M)
    assert xp.shape[-1] == M, (xp.shape, M)
    wd, sd, bd = _prep_conv(p_down)
    w1, s1, b1 = _prep_conv(p_block["conv1"])
    w2, s2, b2 = _prep_conv(p_block["conv2"])
    act_spec = pl.BlockSpec((1, C, M), lambda n: (n, 0, 0))
    xp_spec = pl.BlockSpec((1, 4 * cp_pad, M), lambda n: (n, 0, 0))
    return pl.pallas_call(
        functools.partial(_down_sblock_kernel, H=H, W=W,
                          cp_pad=cp_pad, c_pad=c_pad),
        out_shape=jax.ShapeDtypeStruct((N, C, M), jnp.float32),
        grid=(N,),
        in_specs=([xp_spec, act_spec]
                  + _const_specs(wd, sd, bd, w1, s1, b1, w2, s2, b2)),
        out_specs=act_spec,
        compiler_params=_PARALLEL,
    )(xp, x_l, wd, sd, bd, w1, s1, b1, w2, s2, b2)


def down_conv_call(x_prev, H_prev, W_prev, p_down):
    N, Cp, _ = x_prev.shape
    cp_pad = _pad_to(Cp)
    H, W = H_prev // 2, W_prev // 2
    M = H * W
    xp = _phase_split_bf16(x_prev, H_prev, W_prev, cp_pad)
    wd, sd, bd = _prep_conv(p_down)
    Cout = wd.shape[1]
    return pl.pallas_call(
        functools.partial(_down_conv_kernel, H=H, W=W, cp_pad=cp_pad),
        out_shape=jax.ShapeDtypeStruct((N, Cout, M), jnp.float32),
        grid=(N,),
        in_specs=([pl.BlockSpec((1, 4 * cp_pad, M), lambda n: (n, 0, 0))]
                  + _const_specs(wd, sd, bd)),
        out_specs=pl.BlockSpec((1, Cout, M), lambda n: (n, 0, 0)),
        compiler_params=_PARALLEL,
    )(xp, wd, sd, bd)


def encoder_block_nchw(x_a, x_b, x_c, P):
    """NCHW in / NCHW out — matches the PyTorch EncoderBlock.forward."""
    N, C0, H0, W0 = x_a.shape
    _, C1, H1, W1 = x_b.shape
    _, C2, H2, W2 = x_c.shape
    assert H0 % 2 == 0 and W0 % 2 == 0
    assert H1 % 2 == 0 and W1 % 2 == 0
    assert H2 % 2 == 0 and W2 % 2 == 0

    xa = x_a.reshape(N, C0, H0 * W0)
    xb = x_b.reshape(N, C1, H1 * W1)
    xc = x_c.reshape(N, C2, H2 * W2)

    xa = sblock_call(xa, P["block_A"], H0, W0)
    xb = down_sblock_call(xa, H0, W0, xb, P["down_A"], P["block_B"], H1, W1)
    xc = down_sblock_call(xb, H1, W1, xc, P["down_B"], P["block_C"], H2, W2)
    xd = down_conv_call(xc, H2, W2, P["down_C"])

    C3 = P["down_C"][0].shape[-1]
    return (xa.reshape(N, C0, H0, W0),
            xb.reshape(N, C1, H1, W1),
            xc.reshape(N, C2, H2, W2),
            xd.reshape(N, C3, H2 // 2, W2 // 2))


# ----------------------------------------------------------------------------
# Pure-JAX reference (NHWC) for correctness check.  Conv operands are cast to
# bf16 with f32 accumulation, matching the kernel's MXU precision policy, so
# the comparison isolates structural correctness (taps/masks/phases/fusion).
# ----------------------------------------------------------------------------
def ref_conv_bn_act(x, w, scale, bias, *, stride=1, relu=True):
    y = jax.lax.conv_general_dilated(
        x.astype(jnp.bfloat16), w.astype(jnp.bfloat16),
        window_strides=(stride, stride), padding=((1, 1), (1, 1)),
        dimension_numbers=("NHWC", "HWIO", "NHWC"),
        preferred_element_type=jnp.float32)
    y = y * scale + bias
    return jnp.maximum(y, 0.0) if relu else y


def ref_sblock(x_l, p, x_v=None):
    x = x_l if x_v is None else x_l + x_v
    residual = x
    x = ref_conv_bn_act(x, *p["conv1"], stride=1, relu=True)
    x = ref_conv_bn_act(x, *p["conv2"], stride=1, relu=False)
    return jnp.maximum(x + residual, 0.0)


def ref_encoder_nhwc(x_a, x_b, x_c, P):
    x_a = ref_sblock(x_a, P["block_A"])
    x = ref_conv_bn_act(x_a, *P["down_A"], stride=2, relu=True)
    x_b = ref_sblock(x_b, P["block_B"], x_v=x)
    x = ref_conv_bn_act(x_b, *P["down_B"], stride=2, relu=True)
    x_c = ref_sblock(x_c, P["block_C"], x_v=x)
    x_d = ref_conv_bn_act(x_c, *P["down_C"], stride=2, relu=True)
    return x_a, x_b, x_c, x_d


# ----------------------------------------------------------------------------
# Deterministic parameter init (ConvBNAct: conv bias=False, BN folded)
# ----------------------------------------------------------------------------
def init_conv_bn(key, cin, cout):
    k1, k2, k3, k4, k5 = jax.random.split(key, 5)
    w = jax.random.normal(k1, (3, 3, cin, cout), jnp.float32) / jnp.sqrt(9.0 * cin)
    gamma = 1.0 + 0.1 * jax.random.normal(k2, (cout,), jnp.float32)
    beta = 0.1 * jax.random.normal(k3, (cout,), jnp.float32)
    running_mean = 0.1 * jax.random.normal(k4, (cout,), jnp.float32)
    running_var = jnp.abs(1.0 + 0.1 * jax.random.normal(k5, (cout,), jnp.float32))
    eps = 1e-5
    scale = gamma / jnp.sqrt(running_var + eps)
    bias = beta - running_mean * scale
    return (w, scale, bias)


def init_encoder_params(key, channels):
    keys = jax.random.split(key, 9)
    return {
        "block_A": {"conv1": init_conv_bn(keys[0], channels[0], channels[0]),
                    "conv2": init_conv_bn(keys[1], channels[0], channels[0])},
        "down_A": init_conv_bn(keys[2], channels[0], channels[1]),
        "block_B": {"conv1": init_conv_bn(keys[3], channels[1], channels[1]),
                    "conv2": init_conv_bn(keys[4], channels[1], channels[1])},
        "down_B": init_conv_bn(keys[5], channels[1], channels[2]),
        "block_C": {"conv1": init_conv_bn(keys[6], channels[2], channels[2]),
                    "conv2": init_conv_bn(keys[7], channels[2], channels[2])},
        "down_C": init_conv_bn(keys[8], channels[2], channels[3]),
    }


# ----------------------------------------------------------------------------
if __name__ == "__main__":
    key = jax.random.PRNGKey(0)
    channels = [4, 8, 16, 32]          # channels[0..3], act_type = 'relu'
    N, H = 2, 16

    pkey, dkey = jax.random.split(key)
    params = init_encoder_params(pkey, channels)

    ka, kb, kc = jax.random.split(dkey, 3)
    # NCHW inputs, matching the PyTorch module's convention.
    x_a = jax.random.normal(ka, (N, channels[0], H, H), jnp.float32)
    x_b = jax.random.normal(kb, (N, channels[1], H // 2, H // 2), jnp.float32)
    x_c = jax.random.normal(kc, (N, channels[2], H // 4, H // 4), jnp.float32)

    encoder = jax.jit(encoder_block_nchw)
    outs = jax.block_until_ready(encoder(x_a, x_b, x_c, params))

    # Reference check (pure-JAX convs, NHWC, bf16-matched) vs Pallas outputs.
    to_nhwc = lambda t: jnp.transpose(t, (0, 2, 3, 1))
    refs = ref_encoder_nhwc(to_nhwc(x_a), to_nhwc(x_b), to_nhwc(x_c), params)
    refs = tuple(jnp.transpose(r, (0, 3, 1, 2)) for r in refs)
    for got, want in zip(outs, refs):
        assert got.shape == want.shape, (got.shape, want.shape)
        np.testing.assert_allclose(np.asarray(got), np.asarray(want),
                                   rtol=1e-2, atol=1e-2)

    print("KERNEL_OK")
</pallas_src>

<mosaic_0001>
module attributes {stable_mosaic.version = 11 : i64} {
  func.func @_sblock_kernel(%arg0: i32, %arg1: memref<1x4x256xf32, #tpu.memory_space<vmem>>, %arg2: memref<3x4x48xbf16, #tpu.memory_space<vmem>>, %arg3: memref<4x1xf32, #tpu.memory_space<vmem>>, %arg4: memref<4x1xf32, #tpu.memory_space<vmem>>, %arg5: memref<3x4x48xbf16, #tpu.memory_space<vmem>>, %arg6: memref<4x1xf32, #tpu.memory_space<vmem>>, %arg7: memref<4x1xf32, #tpu.memory_space<vmem>>, %arg8: memref<1x4x256xf32, #tpu.memory_space<vmem>>) attributes {dimension_semantics = [#tpu.dimension_semantics<parallel>], iteration_bounds = array<i64: 2>, scalar_prefetch = 0 : i64, scratch_operands = 0 : i64, tpu.core_type = #tpu.core_type<tc>, window_params = [{transform_indices = @transform_0, window_bounds = array<i64: 1, 4, 256>}, {pipeline_mode = #tpu.pipeline_mode<synchronous>, transform_indices = @transform_1, window_bounds = array<i64: 3, 4, 48>}, {pipeline_mode = #tpu.pipeline_mode<synchronous>, transform_indices = @transform_2, window_bounds = array<i64: 4, 1>}, {pipeline_mode = #tpu.pipeline_mode<synchronous>, transform_indices = @transform_3, window_bounds = array<i64: 4, 1>}, {pipeline_mode = #tpu.pipeline_mode<synchronous>, transform_indices = @transform_4, window_bounds = array<i64: 3, 4, 48>}, {pipeline_mode = #tpu.pipeline_mode<synchronous>, transform_indices = @transform_5, window_bounds = array<i64: 4, 1>}, {pipeline_mode = #tpu.pipeline_mode<synchronous>, transform_indices = @transform_6, window_bounds = array<i64: 4, 1>}, {transform_indices = @transform_7, window_bounds = array<i64: 1, 4, 256>}]} {
    %0 = tpu.iota {dimensions = array<i32: 1>} : vector<1x256xi32>
    %c16_i32 = arith.constant 16 : i32
    %c0_i32 = arith.constant 0 : i32
    %1 = arith.cmpi eq, %c16_i32, %c0_i32 : i32
    %c1_i32 = arith.constant 1 : i32
    %2 = arith.select %1, %c1_i32, %c16_i32 : i32
    %3 = vector.broadcast %2 : i32 to vector<1x256xi32>
    %4 = arith.remsi %0, %3 : vector<1x256xi32>
    %c0_i32_0 = arith.constant 0 : i32
    %5 = vector.broadcast %c0_i32_0 : i32 to vector<1x256xi32>
    %6 = arith.cmpi ne, %4, %5 : vector<1x256xi32>
    %c0_i32_1 = arith.constant 0 : i32
    %7 = vector.broadcast %c0_i32_1 : i32 to vector<1x256xi32>
    %8 = arith.cmpi slt, %4, %7 : vector<1x256xi32>
    %c0_i32_2 = arith.constant 0 : i32
    %9 = arith.cmpi slt, %2, %c0_i32_2 : i32
    %10 = vector.broadcast %9 : i1 to vector<1x256xi1>
    %11 = vector.broadcast %10 : vector<1x256xi1> to vector<1x256xi1>
    %12 = arith.xori %8, %11 : vector<1x256xi1>
    %13 = arith.andi %12, %6 : vector<1x256xi1>
    %14 = vector.broadcast %2 : i32 to vector<1x256xi32>
    %15 = arith.addi %4, %14 : vector<1x256xi32>
    %16 = arith.select %13, %15, %4 : vector<1x256xi1>, vector<1x256xi32>
    %c1_i32_3 = arith.constant 1 : i32
    %17 = vector.broadcast %c1_i32_3 : i32 to vector<1x256xi32>
    %18 = arith.cmpi sge, %16, %17 : vector<1x256xi32>
    %19 = arith.extui %18 : vector<1x256xi1> to vector<1x256xi32>
    %20 = arith.sitofp %19 : vector<1x256xi32> to vector<1x256xf32>
    %21 = arith.truncf %20 : vector<1x256xf32> to vector<1x256xbf16>
    %c15_i32 = arith.constant 15 : i32
    %22 = vector.broadcast %c15_i32 : i32 to vector<1x256xi32>
    %23 = arith.cmpi slt, %16, %22 : vector<1x256xi32>
    %24 = arith.extui %23 : vector<1x256xi1> to vector<1x256xi32>
    %25 = arith.sitofp %24 : vector<1x256xi32> to vector<1x256xf32>
    %26 = arith.truncf %25 : vector<1x256xf32> to vector<1x256xbf16>
    %c0 = arith.constant 0 : index
    %c0_4 = arith.constant 0 : index
    %c0_5 = arith.constant 0 : index
    %27 = vector.load %arg1[%c0, %c0_4, %c0_5] : memref<1x4x256xf32, #tpu.memory_space<vmem>>, vector<1x4x256xf32>
    %28 = vector.shape_cast %27 : vector<1x4x256xf32> to vector<4x256xf32>
    %c0_6 = arith.constant 0 : index
    %c0_7 = arith.constant 0 : index
    %29 = vector.load %arg3[%c0_6, %c0_7] : memref<4x1xf32, #tpu.memory_space<vmem>>, vector<4x1xf32>
    %c0_8 = arith.constant 0 : index
    %c0_9 = arith.constant 0 : index
    %30 = vector.load %arg4[%c0_8, %c0_9] : memref<4x1xf32, #tpu.memory_space<vmem>>, vector<4x1xf32>
    %c0_10 = arith.constant 0 : index
    %c0_11 = arith.constant 0 : index
    %31 = vector.load %arg6[%c0_10, %c0_11] : memref<4x1xf32, #tpu.memory_space<vmem>>, vector<4x1xf32>
    %c0_12 = arith.constant 0 : index
    %c0_13 = arith.constant 0 : index
    %32 = vector.load %arg7[%c0_12, %c0_13] : memref<4x1xf32, #tpu.memory_space<vmem>>, vector<4x1xf32>
    %33 = arith.truncf %28 : vector<4x256xf32> to vector<4x256xbf16>
    %cst = arith.constant 0.000000e+00 : bf16
    %34 = vector.broadcast %cst : bf16 to vector<12x256xbf16>
    %35 = tpu.concatenate %33, %34 in 0 : vector<4x256xbf16>, vector<12x256xbf16> -> vector<16x256xbf16>
    %cst_14 = arith.constant 0.000000e+00 : bf16
    %36 = vector.broadcast %cst_14 : bf16 to vector<16x17xbf16>
    %37 = vector.extract_strided_slice %35 {offsets = [0, 0], sizes = [16, 239], strides = [1, 1]} : vector<16x256xbf16> to vector<16x239xbf16>
    %38 = tpu.concatenate %36, %37 in 1 : vector<16x17xbf16>, vector<16x239xbf16> -> vector<16x256xbf16>
    %39 = vector.broadcast %21 : vector<1x256xbf16> to vector<16x256xbf16>
    %40 = arith.mulf %38, %39 : vector<16x256xbf16>
    %cst_15 = arith.constant 0.000000e+00 : bf16
    %41 = vector.broadcast %cst_15 : bf16 to vector<16x16xbf16>
    %42 = vector.extract_strided_slice %35 {offsets = [0, 0], sizes = [16, 240], strides = [1, 1]} : vector<16x256xbf16> to vector<16x240xbf16>
    %43 = tpu.concatenate %41, %42 in 1 : vector<16x16xbf16>, vector<16x240xbf16> -> vector<16x256xbf16>
    %cst_16 = arith.constant 0.000000e+00 : bf16
    %44 = vector.broadcast %cst_16 : bf16 to vector<16x15xbf16>
    %45 = vector.extract_strided_slice %35 {offsets = [0, 0], sizes = [16, 241], strides = [1, 1]} : vector<16x256xbf16> to vector<16x241xbf16>
    %46 = tpu.concatenate %44, %45 in 1 : vector<16x15xbf16>, vector<16x241xbf16> -> vector<16x256xbf16>
    %47 = vector.broadcast %26 : vector<1x256xbf16> to vector<16x256xbf16>
    %48 = arith.mulf %46, %47 : vector<16x256xbf16>
    %49 = tpu.concatenate %40, %43, %48 in 0 : vector<16x256xbf16>, vector<16x256xbf16>, vector<16x256xbf16> -> vector<48x256xbf16>
    %c0_17 = arith.constant 0 : index
    %c0_18 = arith.constant 0 : index
    %c0_19 = arith.constant 0 : index
    %50 = vector.load %arg2[%c0_17, %c0_18, %c0_19] : memref<3x4x48xbf16, #tpu.memory_space<vmem>>, vector<1x4x48xbf16>
    %51 = vector.shape_cast %50 : vector<1x4x48xbf16> to vector<4x48xbf16>
    %cst_20 = arith.constant dense<0.000000e+00> : vector<4x256xf32>
    %52 = tpu.matmul %51, %49, %cst_20 {dimension_numbers = #tpu.dot_dimension_numbers<[1], [0], [0], [1], [0, 0, 1, 1], [], []>} : vector<4x48xbf16>, vector<48x256xbf16>, vector<4x256xf32> -> vector<4x256xf32>
    %cst_21 = arith.constant 0.000000e+00 : bf16
    %53 = vector.broadcast %cst_21 : bf16 to vector<16x1xbf16>
    %54 = vector.extract_strided_slice %35 {offsets = [0, 0], sizes = [16, 255], strides = [1, 1]} : vector<16x256xbf16> to vector<16x255xbf16>
    %55 = tpu.concatenate %53, %54 in 1 : vector<16x1xbf16>, vector<16x255xbf16> -> vector<16x256xbf16>
    %56 = vector.broadcast %21 : vector<1x256xbf16> to vector<16x256xbf16>
    %57 = arith.mulf %55, %56 : vector<16x256xbf16>
    %cst_22 = arith.constant 0.000000e+00 : bf16
    %58 = vector.broadcast %cst_22 : bf16 to vector<16x1xbf16>
    %59 = vector.extract_strided_slice %35 {offsets = [0, 1], sizes = [16, 255], strides = [1, 1]} : vector<16x256xbf16> to vector<16x255xbf16>
    %60 = tpu.concatenate %59, %58 in 1 : vector<16x255xbf16>, vector<16x1xbf16> -> vector<16x256xbf16>
    %61 = vector.broadcast %26 : vector<1x256xbf16> to vector<16x256xbf16>
    %62 = arith.mulf %60, %61 : vector<16x256xbf16>
    %63 = tpu.concatenate %57, %35, %62 in 0 : vector<16x256xbf16>, vector<16x256xbf16>, vector<16x256xbf16> -> vector<48x256xbf16>
    %c1 = arith.constant 1 : index
    %c0_23 = arith.constant 0 : index
    %c0_24 = arith.constant 0 : index
    %64 = vector.load %arg2[%c1, %c0_23, %c0_24] : memref<3x4x48xbf16, #tpu.memory_space<vmem>>, vector<1x4x48xbf16>
    %65 = vector.shape_cast %64 : vector<1x4x48xbf16> to vector<4x48xbf16>
    %cst_25 = arith.constant dense<0.000000e+00> : vector<4x256xf32>
    %66 = tpu.matmul %65, %63, %cst_25 {dimension_numbers = #tpu.dot_dimension_numbers<[1], [0], [0], [1], [0, 0, 1, 1], [], []>} : vector<4x48xbf16>, vector<48x256xbf16>, vector<4x256xf32> -> vector<4x256xf32>
    %67 = arith.addf %52, %66 : vector<4x256xf32>
    %cst_26 = arith.constant 0.000000e+00 : bf16
    %68 = vector.broadcast %cst_26 : bf16 to vector<16x15xbf16>
    %69 = vector.extract_strided_slice %35 {offsets = [0, 15], sizes = [16, 241], strides = [1, 1]} : vector<16x256xbf16> to vector<16x241xbf16>
    %70 = tpu.concatenate %69, %68 in 1 : vector<16x241xbf16>, vector<16x15xbf16> -> vector<16x256xbf16>
    %71 = vector.broadcast %21 : vector<1x256xbf16> to vector<16x256xbf16>
    %72 = arith.mulf %70, %71 : vector<16x256xbf16>
    %cst_27 = arith.constant 0.000000e+00 : bf16
    %73 = vector.broadcast %cst_27 : bf16 to vector<16x16xbf16>
    %74 = vector.extract_strided_slice %35 {offsets = [0, 16], sizes = [16, 240], strides = [1, 1]} : vector<16x256xbf16> to vector<16x240xbf16>
    %75 = tpu.concatenate %74, %73 in 1 : vector<16x240xbf16>, vector<16x16xbf16> -> vector<16x256xbf16>
    %cst_28 = arith.constant 0.000000e+00 : bf16
    %76 = vector.broadcast %cst_28 : bf16 to vector<16x17xbf16>
    %77 = vector.extract_strided_slice %35 {offsets = [0, 17], sizes = [16, 239], strides = [1, 1]} : vector<16x256xbf16> to vector<16x239xbf16>
    %78 = tpu.concatenate %77, %76 in 1 : vector<16x239xbf16>, vector<16x17xbf16> -> vector<16x256xbf16>
    %79 = vector.broadcast %26 : vector<1x256xbf16> to vector<16x256xbf16>
    %80 = arith.mulf %78, %79 : vector<16x256xbf16>
    %81 = tpu.concatenate %72, %75, %80 in 0 : vector<16x256xbf16>, vector<16x256xbf16>, vector<16x256xbf16> -> vector<48x256xbf16>
    %c2 = arith.constant 2 : index
    %c0_29 = arith.constant 0 : index
    %c0_30 = arith.constant 0 : index
    %82 = vector.load %arg2[%c2, %c0_29, %c0_30] : memref<3x4x48xbf16, #tpu.memory_space<vmem>>, vector<1x4x48xbf16>
    %83 = vector.shape_cast %82 : vector<1x4x48xbf16> to vector<4x48xbf16>
    %cst_31 = arith.constant dense<0.000000e+00> : vector<4x256xf32>
    %84 = tpu.matmul %83, %81, %cst_31 {dimension_numbers = #tpu.dot_dimension_numbers<[1], [0], [0], [1], [0, 0, 1, 1], [], []>} : vector<4x48xbf16>, vector<48x256xbf16>, vector<4x256xf32> -> vector<4x256xf32>
    %85 = arith.addf %67, %84 : vector<4x256xf32>
    %86 = vector.broadcast %29 : vector<4x1xf32> to vector<4x256xf32>
    %87 = arith.mulf %85, %86 : vector<4x256xf32>
    %88 = vector.broadcast %30 : vector<4x1xf32> to vector<4x256xf32>
    %89 = arith.addf %87, %88 : vector<4x256xf32>
    %cst_32 = arith.constant 0.000000e+00 : f32
    %90 = vector.broadcast %cst_32 : f32 to vector<4x256xf32>
    %91 = arith.maximumf %89, %90 : vector<4x256xf32>
    %92 = arith.truncf %91 : vector<4x256xf32> to vector<4x256xbf16>
    %cst_33 = arith.constant 0.000000e+00 : bf16
    %93 = vector.broadcast %cst_33 : bf16 to vector<12x256xbf16>
    %94 = tpu.concatenate %92, %93 in 0 : vector<4x256xbf16>, vector<12x256xbf16> -> vector<16x256xbf16>
    %cst_34 = arith.constant 0.000000e+00 : bf16
    %95 = vector.broadcast %cst_34 : bf16 to vector<16x17xbf16>
    %96 = vector.extract_strided_slice %94 {offsets = [0, 0], sizes = [16, 239], strides = [1, 1]} : vector<16x256xbf16> to vector<16x239xbf16>
    %97 = tpu.concatenate %95, %96 in 1 : vector<16x17xbf16>, vector<16x239xbf16> -> vector<16x256xbf16>
    %98 = vector.broadcast %21 : vector<1x256xbf16> to vector<16x256xbf16>
    %99 = arith.mulf %97, %98 : vector<16x256xbf16>
    %cst_35 = arith.constant 0.000000e+00 : bf16
    %100 = vector.broadcast %cst_35 : bf16 to vector<16x16xbf16>
    %101 = vector.extract_strided_slice %94 {offsets = [0, 0], sizes = [16, 240], strides = [1, 1]} : vector<16x256xbf16> to vector<16x240xbf16>
    %102 = tpu.concatenate %100, %101 in 1 : vector<16x16xbf16>, vector<16x240xbf16> -> vector<16x256xbf16>
    %cst_36 = arith.constant 0.000000e+00 : bf16
    %103 = vector.broadcast %cst_36 : bf16 to vector<16x15xbf16>
    %104 = vector.extract_strided_slice %94 {offsets = [0, 0], sizes = [16, 241], strides = [1, 1]} : vector<16x256xbf16> to vector<16x241xbf16>
    %105 = tpu.concatenate %103, %104 in 1 : vector<16x15xbf16>, vector<16x241xbf16> -> vector<16x256xbf16>
    %106 = vector.broadcast %26 : vector<1x256xbf16> to vector<16x256xbf16>
    %107 = arith.mulf %105, %106 : vector<16x256xbf16>
    %108 = tpu.concatenate %99, %102, %107 in 0 : vector<16x256xbf16>, vector<16x256xbf16>, vector<16x256xbf16> -> vector<48x256xbf16>
    %c0_37 = arith.constant 0 : index
    %c0_38 = arith.constant 0 : index
    %c0_39 = arith.constant 0 : index
    %109 = vector.load %arg5[%c0_37, %c0_38, %c0_39] : memref<3x4x48xbf16, #tpu.memory_space<vmem>>, vector<1x4x48xbf16>
    %110 = vector.shape_cast %109 : vector<1x4x48xbf16> to vector<4x48xbf16>
    %cst_40 = arith.constant dense<0.000000e+00> : vector<4x256xf32>
    %111 = tpu.matmul %110, %108, %cst_40 {dimension_numbers = #tpu.dot_dimension_numbers<[1], [0], [0], [1], [0, 0, 1, 1], [], []>} : vector<4x48xbf16>, vector<48x256xbf16>, vector<4x256xf32> -> vector<4x256xf32>
    %cst_41 = arith.constant 0.000000e+00 : bf16
    %112 = vector.broadcast %cst_41 : bf16 to vector<16x1xbf16>
    %113 = vector.extract_strided_slice %94 {offsets = [0, 0], sizes = [16, 255], strides = [1, 1]} : vector<16x256xbf16> to vector<16x255xbf16>
    %114 = tpu.concatenate %112, %113 in 1 : vector<16x1xbf16>, vector<16x255xbf16> -> vector<16x256xbf16>
    %115 = vector.broadcast %21 : vector<1x256xbf16> to vector<16x256xbf16>
    %116 = arith.mulf %114, %115 : vector<16x256xbf16>
    %cst_42 = arith.constant 0.000000e+00 : bf16
    %117 = vector.broadcast %cst_42 : bf16 to vector<16x1xbf16>
    %118 = vector.extract_strided_slice %94 {offsets = [0, 1], sizes = [16, 255], strides = [1, 1]} : vector<16x256xbf16> to vector<16x255xbf16>
    %119 = tpu.concatenate %118, %117 in 1 : vector<16x255xbf16>, vector<16x1xbf16> -> vector<16x256xbf16>
    %120 = vector.broadcast %26 : vector<1x256xbf16> to vector<16x256xbf16>
    %121 = arith.mulf %119, %120 : vector<16x256xbf16>
    %122 = tpu.concatenate %116, %94, %121 in 0 : vector<16x256xbf16>, vector<16x256xbf16>, vector<16x256xbf16> -> vector<48x256xbf16>
    %c1_43 = arith.constant 1 : index
    %c0_44 = arith.constant 0 : index
    %c0_45 = arith.constant 0 : index
    %123 = vector.load %arg5[%c1_43, %c0_44, %c0_45] : memref<3x4x48xbf16, #tpu.memory_space<vmem>>, vector<1x4x48xbf16>
    %124 = vector.shape_cast %123 : vector<1x4x48xbf16> to vector<4x48xbf16>
    %cst_46 = arith.constant dense<0.000000e+00> : vector<4x256xf32>
    %125 = tpu.matmul %124, %122, %cst_46 {dimension_numbers = #tpu.dot_dimension_numbers<[1], [0], [0], [1], [0, 0, 1, 1], [], []>} : vector<4x48xbf16>, vector<48x256xbf16>, vector<4x256xf32> -> vector<4x256xf32>
    %126 = arith.addf %111, %125 : vector<4x256xf32>
    %cst_47 = arith.constant 0.000000e+00 : bf16
    %127 = vector.broadcast %cst_47 : bf16 to vector<16x15xbf16>
    %128 = vector.extract_strided_slice %94 {offsets = [0, 15], sizes = [16, 241], strides = [1, 1]} : vector<16x256xbf16> to vector<16x241xbf16>
    %129 = tpu.concatenate %128, %127 in 1 : vector<16x241xbf16>, vector<16x15xbf16> -> vector<16x256xbf16>
    %130 = vector.broadcast %21 : vector<1x256xbf16> to vector<16x256xbf16>
    %131 = arith.mulf %129, %130 : vector<16x256xbf16>
    %cst_48 = arith.constant 0.000000e+00 : bf16
    %132 = vector.broadcast %cst_48 : bf16 to vector<16x16xbf16>
    %133 = vector.extract_strided_slice %94 {offsets = [0, 16], sizes = [16, 240], strides = [1, 1]} : vector<16x256xbf16> to vector<16x240xbf16>
    %134 = tpu.concatenate %133, %132 in 1 : vector<16x240xbf16>, vector<16x16xbf16> -> vector<16x256xbf16>
    %cst_49 = arith.constant 0.000000e+00 : bf16
    %135 = vector.broadcast %cst_49 : bf16 to vector<16x17xbf16>
    %136 = vector.extract_strided_slice %94 {offsets = [0, 17], sizes = [16, 239], strides = [1, 1]} : vector<16x256xbf16> to vector<16x239xbf16>
    %137 = tpu.concatenate %136, %135 in 1 : vector<16x239xbf16>, vector<16x17xbf16> -> vector<16x256xbf16>
    %138 = vector.broadcast %26 : vector<1x256xbf16> to vector<16x256xbf16>
    %139 = arith.mulf %137, %138 : vector<16x256xbf16>
    %140 = tpu.concatenate %131, %134, %139 in 0 : vector<16x256xbf16>, vector<16x256xbf16>, vector<16x256xbf16> -> vector<48x256xbf16>
    %c2_50 = arith.constant 2 : index
    %c0_51 = arith.constant 0 : index
    %c0_52 = arith.constant 0 : index
    %141 = vector.load %arg5[%c2_50, %c0_51, %c0_52] : memref<3x4x48xbf16, #tpu.memory_space<vmem>>, vector<1x4x48xbf16>
    %142 = vector.shape_cast %141 : vector<1x4x48xbf16> to vector<4x48xbf16>
    %cst_53 = arith.constant dense<0.000000e+00> : vector<4x256xf32>
    %143 = tpu.matmul %142, %140, %cst_53 {dimension_numbers = #tpu.dot_dimension_numbers<[1], [0], [0], [1], [0, 0, 1, 1], [], []>} : vector<4x48xbf16>, vector<48x256xbf16>, vector<4x256xf32> -> vector<4x256xf32>
    %144 = arith.addf %126, %143 : vector<4x256xf32>
    %145 = vector.broadcast %31 : vector<4x1xf32> to vector<4x256xf32>
    %146 = arith.mulf %144, %145 : vector<4x256xf32>
    %147 = vector.broadcast %32 : vector<4x1xf32> to vector<4x256xf32>
    %148 = arith.addf %146, %147 : vector<4x256xf32>
    %149 = arith.addf %148, %28 : vector<4x256xf32>
    %cst_54 = arith.constant 0.000000e+00 : f32
    %150 = vector.broadcast %cst_54 : f32 to vector<4x256xf32>
    %151 = arith.maximumf %149, %150 : vector<4x256xf32>
    %c0_55 = arith.constant 0 : index
    %c0_56 = arith.constant 0 : index
    %c0_57 = arith.constant 0 : index
    %152 = vector.load %arg8[%c0_55, %c0_56, %c0_57] : memref<1x4x256xf32, #tpu.memory_space<vmem>>, vector<1x4x256xf32>
    %153 = vector.shape_cast %152 : vector<1x4x256xf32> to vector<4x256xf32>
    %154 = vector.shape_cast %151 : vector<4x256xf32> to vector<1x4x256xf32>
    tpu.vector_store %arg8[%c0_55, %c0_56, %c0_57], %154 {strides = array<i32>} : memref<1x4x256xf32, #tpu.memory_space<vmem>>, vector<1x4x256xf32>,
    return
  }
  func.func @transform_0(%arg0: i32) -> (i32, i32, i32) {
    %c0_i32 = arith.constant 0 : i32
    %c0_i32_0 = arith.constant 0 : i32
    %c0_i32_1 = arith.constant 0 : i32
    return %arg0, %c0_i32, %c0_i32_0 : i32, i32, i32
  }
  func.func @transform_1(%arg0: i32) -> (i32, i32, i32) {
    %c0_i32 = arith.constant 0 : i32
    %c0_i32_0 = arith.constant 0 : i32
    %c0_i32_1 = arith.constant 0 : i32
    %c0_i32_2 = arith.constant 0 : i32
    return %c0_i32, %c0_i32_0, %c0_i32_1 : i32, i32, i32
  }
  func.func @transform_2(%arg0: i32) -> (i32, i32) {
    %c0_i32 = arith.constant 0 : i32
    %c0_i32_0 = arith.constant 0 : i32
    %c0_i32_1 = arith.constant 0 : i32
    return %c0_i32, %c0_i32_0 : i32, i32
  }
  func.func @transform_3(%arg0: i32) -> (i32, i32) {
    %c0_i32 = arith.constant 0 : i32
    %c0_i32_0 = arith.constant 0 : i32
    %c0_i32_1 = arith.constant 0 : i32
    return %c0_i32, %c0_i32_0 : i32, i32
  }
  func.func @transform_4(%arg0: i32) -> (i32, i32, i32) {
    %c0_i32 = arith.constant 0 : i32
    %c0_i32_0 = arith.constant 0 : i32
    %c0_i32_1 = arith.constant 0 : i32
    %c0_i32_2 = arith.constant 0 : i32
    return %c0_i32, %c0_i32_0, %c0_i32_1 : i32, i32, i32
  }
  func.func @transform_5(%arg0: i32) -> (i32, i32) {
    %c0_i32 = arith.constant 0 : i32
    %c0_i32_0 = arith.constant 0 : i32
    %c0_i32_1 = arith.constant 0 : i32
    return %c0_i32, %c0_i32_0 : i32, i32
  }
  func.func @transform_6(%arg0: i32) -> (i32, i32) {
    %c0_i32 = arith.constant 0 : i32
    %c0_i32_0 = arith.constant 0 : i32
    %c0_i32_1 = arith.constant 0 : i32
    return %c0_i32, %c0_i32_0 : i32, i32
  }
  func.func @transform_7(%arg0: i32) -> (i32, i32, i32) {
    %c0_i32 = arith.constant 0 : i32
    %c0_i32_0 = arith.constant 0 : i32
    %c0_i32_1 = arith.constant 0 : i32
    return %arg0, %c0_i32, %c0_i32_0 : i32, i32, i32
  }
}

module attributes {stable_mosaic.version = 11 : i64} {
  func.func @_down_sblock_kernel(%arg0: i32, %arg1: memref<1x64x64xbf16, #tpu.memory_space<vmem>>, %arg2: memref<1x8x64xf32, #tpu.memory_space<vmem>>, %arg3: memref<3x8x48xbf16, #tpu.memory_space<vmem>>, %arg4: memref<8x1xf32, #tpu.memory_space<vmem>>, %arg5: memref<8x1xf32, #tpu.memory_space<vmem>>, %arg6: memref<3x8x48xbf16, #tpu.memory_space<vmem>>, %arg7: memref<8x1xf32, #tpu.memory_space<vmem>>, %arg8: memref<8x1xf32, #tpu.memory_space<vmem>>, %arg9: memref<3x8x48xbf16, #tpu.memory_space<vmem>>, %arg10: memref<8x1xf32, #tpu.memory_space<vmem>>, %arg11: memref<8x1xf32, #tpu.memory_space<vmem>>, %arg12: memref<1x8x64xf32, #tpu.memory_space<vmem>>) attributes {dimension_semantics = [#tpu.dimension_semantics<parallel>], iteration_bounds = array<i64: 2>, scalar_prefetch = 0 : i64, scratch_operands = 0 : i64, tpu.core_type = #tpu.core_type<tc>, window_params = [{transform_indices = @transform_0, window_bounds = array<i64: 1, 64, 64>}, {transform_indices = @transform_1, window_bounds = array<i64: 1, 8, 64>}, {pipeline_mode = #tpu.pipeline_mode<synchronous>, transform_indices = @transform_2, window_bounds = array<i64: 3, 8, 48>}, {pipeline_mode = #tpu.pipeline_mode<synchronous>, transform_indices = @transform_3, window_bounds = array<i64: 8, 1>}, {pipeline_mode = #tpu.pipeline_mode<synchronous>, transform_indices = @transform_4, window_bounds = array<i64: 8, 1>}, {pipeline_mode = #tpu.pipeline_mode<synchronous>, transform_indices = @transform_5, window_bounds = array<i64: 3, 8, 48>}, {pipeline_mode = #tpu.pipeline_mode<synchronous>, transform_indices = @transform_6, window_bounds = array<i64: 8, 1>}, {pipeline_mode = #tpu.pipeline_mode<synchronous>, transform_indices = @transform_7, window_bounds = array<i64: 8, 1>}, {pipeline_mode = #tpu.pipeline_mode<synchronous>, transform_indices = @transform_8, window_bounds = array<i64: 3, 8, 48>}, {pipeline_mode = #tpu.pipeline_mode<synchronous>, transform_indices = @transform_9, window_bounds = array<i64: 8, 1>}, {pipeline_mode = #tpu.pipeline_mode<synchronous>, transform_indices = @transform_10, window_bounds = array<i64: 8, 1>}, {transform_indices = @transform_11, window_bounds = array<i64: 1, 8, 64>}]} {
    %0 = tpu.iota {dimensions = array<i32: 1>} : vector<1x64xi32>
    %c8_i32 = arith.constant 8 : i32
    %c0_i32 = arith.constant 0 : i32
    %1 = arith.cmpi eq, %c8_i32, %c0_i32 : i32
    %c1_i32 = arith.constant 1 : i32
    %2 = arith.select %1, %c1_i32, %c8_i32 : i32
    %3 = vector.broadcast %2 : i32 to vector<1x64xi32>
    %4 = arith.remsi %0, %3 : vector<1x64xi32>
    %c0_i32_0 = arith.constant 0 : i32
    %5 = vector.broadcast %c0_i32_0 : i32 to vector<1x64xi32>
    %6 = arith.cmpi ne, %4, %5 : vector<1x64xi32>
    %c0_i32_1 = arith.constant 0 : i32
    %7 = vector.broadcast %c0_i32_1 : i32 to vector<1x64xi32>
    %8 = arith.cmpi slt, %4, %7 : vector<1x64xi32>
    %c0_i32_2 = arith.constant 0 : i32
    %9 = arith.cmpi slt, %2, %c0_i32_2 : i32
    %10 = vector.broadcast %9 : i1 to vector<1x64xi1>
    %11 = vector.broadcast %10 : vector<1x64xi1> to vector<1x64xi1>
    %12 = arith.xori %8, %11 : vector<1x64xi1>
    %13 = arith.andi %12, %6 : vector<1x64xi1>
    %14 = vector.broadcast %2 : i32 to vector<1x64xi32>
    %15 = arith.addi %4, %14 : vector<1x64xi32>
    %16 = arith.select %13, %15, %4 : vector<1x64xi1>, vector<1x64xi32>
    %c1_i32_3 = arith.constant 1 : i32
    %17 = vector.broadcast %c1_i32_3 : i32 to vector<1x64xi32>
    %18 = arith.cmpi sge, %16, %17 : vector<1x64xi32>
    %19 = arith.extui %18 : vector<1x64xi1> to vector<1x64xi32>
    %20 = arith.sitofp %19 : vector<1x64xi32> to vector<1x64xf32>
    %21 = arith.truncf %20 : vector<1x64xf32> to vector<1x64xbf16>
    %c7_i32 = arith.constant 7 : i32
    %22 = vector.broadcast %c7_i32 : i32 to vector<1x64xi32>
    %23 = arith.cmpi slt, %16, %22 : vector<1x64xi32>
    %24 = arith.extui %23 : vector<1x64xi1> to vector<1x64xi32>
    %25 = arith.sitofp %24 : vector<1x64xi32> to vector<1x64xf32>
    %26 = arith.truncf %25 : vector<1x64xf32> to vector<1x64xbf16>
    %c0 = arith.constant 0 : index
    %c0_4 = arith.constant 0 : index
    %c0_5 = arith.constant 0 : index
    %27 = vector.load %arg1[%c0, %c0_4, %c0_5] : memref<1x64x64xbf16, #tpu.memory_space<vmem>>, vector<1x64x64xbf16>
    %28 = vector.shape_cast %27 : vector<1x64x64xbf16> to vector<64x64xbf16>
    %c0_6 = arith.constant 0 : index
    %c0_7 = arith.constant 0 : index
    %29 = vector.load %arg4[%c0_6, %c0_7] : memref<8x1xf32, #tpu.memory_space<vmem>>, vector<8x1xf32>
    %c0_8 = arith.constant 0 : index
    %c0_9 = arith.constant 0 : index
    %30 = vector.load %arg5[%c0_8, %c0_9] : memref<8x1xf32, #tpu.memory_space<vmem>>, vector<8x1xf32>
    %31 = vector.extract_strided_slice %28 {offsets = [48, 0], sizes = [16, 64], strides = [1, 1]} : vector<64x64xbf16> to vector<16x64xbf16>
    %cst = arith.constant 0.000000e+00 : bf16
    %32 = vector.broadcast %cst : bf16 to vector<16x9xbf16>
    %33 = vector.extract_strided_slice %31 {offsets = [0, 0], sizes = [16, 55], strides = [1, 1]} : vector<16x64xbf16> to vector<16x55xbf16>
    %34 = tpu.concatenate %32, %33 in 1 : vector<16x9xbf16>, vector<16x55xbf16> -> vector<16x64xbf16>
    %35 = vector.broadcast %21 : vector<1x64xbf16> to vector<16x64xbf16>
    %36 = arith.mulf %34, %35 : vector<16x64xbf16>
    %37 = vector.extract_strided_slice %28 {offsets = [32, 0], sizes = [16, 64], strides = [1, 1]} : vector<64x64xbf16> to vector<16x64xbf16>
    %cst_10 = arith.constant 0.000000e+00 : bf16
    %38 = vector.broadcast %cst_10 : bf16 to vector<16x8xbf16>
    %39 = vector.extract_strided_slice %37 {offsets = [0, 0], sizes = [16, 56], strides = [1, 1]} : vector<16x64xbf16> to vector<16x56xbf16>
    %40 = tpu.concatenate %38, %39 in 1 : vector<16x8xbf16>, vector<16x56xbf16> -> vector<16x64xbf16>
    %41 = vector.extract_strided_slice %28 {offsets = [48, 0], sizes = [16, 64], strides = [1, 1]} : vector<64x64xbf16> to vector<16x64xbf16>
    %cst_11 = arith.constant 0.000000e+00 : bf16
    %42 = vector.broadcast %cst_11 : bf16 to vector<16x8xbf16>
    %43 = vector.extract_strided_slice %41 {offsets = [0, 0], sizes = [16, 56], strides = [1, 1]} : vector<16x64xbf16> to vector<16x56xbf16>
    %44 = tpu.concatenate %42, %43 in 1 : vector<16x8xbf16>, vector<16x56xbf16> -> vector<16x64xbf16>
    %45 = tpu.concatenate %36, %40, %44 in 0 : vector<16x64xbf16>, vector<16x64xbf16>, vector<16x64xbf16> -> vector<48x64xbf16>
    %c0_12 = arith.constant 0 : index
    %c0_13 = arith.constant 0 : index
    %c0_14 = arith.constant 0 : index
    %46 = vector.load %arg3[%c0_12, %c0_13, %c0_14] : memref<3x8x48xbf16, #tpu.memory_space<vmem>>, vector<1x8x48xbf16>
    %47 = vector.shape_cast %46 : vector<1x8x48xbf16> to vector<8x48xbf16>
    %cst_15 = arith.constant dense<0.000000e+00> : vector<8x64xf32>
    %48 = tpu.matmul %47, %45, %cst_15 {dimension_numbers = #tpu.dot_dimension_numbers<[1], [0], [0], [1], [0, 0, 1, 1], [], []>} : vector<8x48xbf16>, vector<48x64xbf16>, vector<8x64xf32> -> vector<8x64xf32>
    %49 = vector.extract_strided_slice %28 {offsets = [16, 0], sizes = [16, 64], strides = [1, 1]} : vector<64x64xbf16> to vector<16x64xbf16>
    %cst_16 = arith.constant 0.000000e+00 : bf16
    %50 = vector.broadcast %cst_16 : bf16 to vector<16x1xbf16>
    %51 = vector.extract_strided_slice %49 {offsets = [0, 0], sizes = [16, 63], strides = [1, 1]} : vector<16x64xbf16> to vector<16x63xbf16>
    %52 = tpu.concatenate %50, %51 in 1 : vector<16x1xbf16>, vector<16x63xbf16> -> vector<16x64xbf16>
    %53 = vector.broadcast %21 : vector<1x64xbf16> to vector<16x64xbf16>
    %54 = arith.mulf %52, %53 : vector<16x64xbf16>
    %55 = vector.extract_strided_slice %28 {offsets = [0, 0], sizes = [16, 64], strides = [1, 1]} : vector<64x64xbf16> to vector<16x64xbf16>
    %56 = vector.extract_strided_slice %28 {offsets = [16, 0], sizes = [16, 64], strides = [1, 1]} : vector<64x64xbf16> to vector<16x64xbf16>
    %57 = tpu.concatenate %54, %55, %56 in 0 : vector<16x64xbf16>, vector<16x64xbf16>, vector<16x64xbf16> -> vector<48x64xbf16>
    %c1 = arith.constant 1 : index
    %c0_17 = arith.constant 0 : index
    %c0_18 = arith.constant 0 : index
    %58 = vector.load %arg3[%c1, %c0_17, %c0_18] : memref<3x8x48xbf16, #tpu.memory_space<vmem>>, vector<1x8x48xbf16>
    %59 = vector.shape_cast %58 : vector<1x8x48xbf16> to vector<8x48xbf16>
    %cst_19 = arith.constant dense<0.000000e+00> : vector<8x64xf32>
    %60 = tpu.matmul %59, %57, %cst_19 {dimension_numbers = #tpu.dot_dimension_numbers<[1], [0], [0], [1], [0, 0, 1, 1], [], []>} : vector<8x48xbf16>, vector<48x64xbf16>, vector<8x64xf32> -> vector<8x64xf32>
    %61 = arith.addf %48, %60 : vector<8x64xf32>
    %62 = vector.extract_strided_slice %28 {offsets = [48, 0], sizes = [16, 64], strides = [1, 1]} : vector<64x64xbf16> to vector<16x64xbf16>
    %cst_20 = arith.constant 0.000000e+00 : bf16
    %63 = vector.broadcast %cst_20 : bf16 to vector<16x1xbf16>
    %64 = vector.extract_strided_slice %62 {offsets = [0, 0], sizes = [16, 63], strides = [1, 1]} : vector<16x64xbf16> to vector<16x63xbf16>
    %65 = tpu.concatenate %63, %64 in 1 : vector<16x1xbf16>, vector<16x63xbf16> -> vector<16x64xbf16>
    %66 = vector.broadcast %21 : vector<1x64xbf16> to vector<16x64xbf16>
    %67 = arith.mulf %65, %66 : vector<16x64xbf16>
    %68 = vector.extract_strided_slice %28 {offsets = [32, 0], sizes = [16, 64], strides = [1, 1]} : vector<64x64xbf16> to vector<16x64xbf16>
    %69 = vector.extract_strided_slice %28 {offsets = [48, 0], sizes = [16, 64], strides = [1, 1]} : vector<64x64xbf16> to vector<16x64xbf16>
    %70 = tpu.concatenate %67, %68, %69 in 0 : vector<16x64xbf16>, vector<16x64xbf16>, vector<16x64xbf16> -> vector<48x64xbf16>
    %c2 = arith.constant 2 : index
    %c0_21 = arith.constant 0 : index
    %c0_22 = arith.constant 0 : index
    %71 = vector.load %arg3[%c2, %c0_21, %c0_22] : memref<3x8x48xbf16, #tpu.memory_space<vmem>>, vector<1x8x48xbf16>
    %72 = vector.shape_cast %71 : vector<1x8x48xbf16> to vector<8x48xbf16>
    %cst_23 = arith.constant dense<0.000000e+00> : vector<8x64xf32>
    %73 = tpu.matmul %72, %70, %cst_23 {dimension_numbers = #tpu.dot_dimension_numbers<[1], [0], [0], [1], [0, 0, 1, 1], [], []>} : vector<8x48xbf16>, vector<48x64xbf16>, vector<8x64xf32> -> vector<8x64xf32>
    %74 = arith.addf %61, %73 : vector<8x64xf32>
    %75 = vector.broadcast %29 : vector<8x1xf32> to vector<8x64xf32>
    %76 = arith.mulf %74, %75 : vector<8x64xf32>
    %77 = vector.broadcast %30 : vector<8x1xf32> to vector<8x64xf32>
    %78 = arith.addf %76, %77 : vector<8x64xf32>
    %c0_24 = arith.constant 0 : index
    %c0_25 = arith.constant 0 : index
    %c0_26 = arith.constant 0 : index
    %79 = vector.load %arg2[%c0_24, %c0_25, %c0_26] : memref<1x8x64xf32, #tpu.memory_space<vmem>>, vector<1x8x64xf32>
    %80 = vector.shape_cast %79 : vector<1x8x64xf32> to vector<8x64xf32>
    %cst_27 = arith.constant 0.000000e+00 : f32
    %81 = vector.broadcast %cst_27 : f32 to vector<8x64xf32>
    %82 = arith.maximumf %78, %81 : vector<8x64xf32>
    %83 = arith.addf %80, %82 : vector<8x64xf32>
    %c0_28 = arith.constant 0 : index
    %c0_29 = arith.constant 0 : index
    %84 = vector.load %arg7[%c0_28, %c0_29] : memref<8x1xf32, #tpu.memory_space<vmem>>, vector<8x1xf32>
    %c0_30 = arith.constant 0 : index
    %c0_31 = arith.constant 0 : index
    %85 = vector.load %arg8[%c0_30, %c0_31] : memref<8x1xf32, #tpu.memory_space<vmem>>, vector<8x1xf32>
    %c0_32 = arith.constant 0 : index
    %c0_33 = arith.constant 0 : index
    %86 = vector.load %arg10[%c0_32, %c0_33] : memref<8x1xf32, #tpu.memory_space<vmem>>, vector<8x1xf32>
    %c0_34 = arith.constant 0 : index
    %c0_35 = arith.constant 0 : index
    %87 = vector.load %arg11[%c0_34, %c0_35] : memref<8x1xf32, #tpu.memory_space<vmem>>, vector<8x1xf32>
    %88 = arith.truncf %83 : vector<8x64xf32> to vector<8x64xbf16>
    %cst_36 = arith.constant 0.000000e+00 : bf16
    %89 = vector.broadcast %cst_36 : bf16 to vector<8x64xbf16>
    %90 = tpu.concatenate %88, %89 in 0 : vector<8x64xbf16>, vector<8x64xbf16> -> vector<16x64xbf16>
    %cst_37 = arith.constant 0.000000e+00 : bf16
    %91 = vector.broadcast %cst_37 : bf16 to vector<16x9xbf16>
    %92 = vector.extract_strided_slice %90 {offsets = [0, 0], sizes = [16, 55], strides = [1, 1]} : vector<16x64xbf16> to vector<16x55xbf16>
    %93 = tpu.concatenate %91, %92 in 1 : vector<16x9xbf16>, vector<16x55xbf16> -> vector<16x64xbf16>
    %94 = vector.broadcast %21 : vector<1x64xbf16> to vector<16x64xbf16>
    %95 = arith.mulf %93, %94 : vector<16x64xbf16>
    %cst_38 = arith.constant 0.000000e+00 : bf16
    %96 = vector.broadcast %cst_38 : bf16 to vector<16x8xbf16>
    %97 = vector.extract_strided_slice %90 {offsets = [0, 0], sizes = [16, 56], strides = [1, 1]} : vector<16x64xbf16> to vector<16x56xbf16>
    %98 = tpu.concatenate %96, %97 in 1 : vector<16x8xbf16>, vector<16x56xbf16> -> vector<16x64xbf16>
    %cst_39 = arith.constant 0.000000e+00 : bf16
    %99 = vector.broadcast %cst_39 : bf16 to vector<16x7xbf16>
    %100 = vector.extract_strided_slice %90 {offsets = [0, 0], sizes = [16, 57], strides = [1, 1]} : vector<16x64xbf16> to vector<16x57xbf16>
    %101 = tpu.concatenate %99, %100 in 1 : vector<16x7xbf16>, vector<16x57xbf16> -> vector<16x64xbf16>
    %102 = vector.broadcast %26 : vector<1x64xbf16> to vector<16x64xbf16>
    %103 = arith.mulf %101, %102 : vector<16x64xbf16>
    %104 = tpu.concatenate %95, %98, %103 in 0 : vector<16x64xbf16>, vector<16x64xbf16>, vector<16x64xbf16> -> vector<48x64xbf16>
    %c0_40 = arith.constant 0 : index
    %c0_41 = arith.constant 0 : index
    %c0_42 = arith.constant 0 : index
    %105 = vector.load %arg6[%c0_40, %c0_41, %c0_42] : memref<3x8x48xbf16, #tpu.memory_space<vmem>>, vector<1x8x48xbf16>
    %106 = vector.shape_cast %105 : vector<1x8x48xbf16> to vector<8x48xbf16>
    %cst_43 = arith.constant dense<0.000000e+00> : vector<8x64xf32>
    %107 = tpu.matmul %106, %104, %cst_43 {dimension_numbers = #tpu.dot_dimension_numbers<[1], [0], [0], [1], [0, 0, 1, 1], [], []>} : vector<8x48xbf16>, vector<48x64xbf16>, vector<8x64xf32> -> vector<8x64xf32>
    %cst_44 = arith.constant 0.000000e+00 : bf16
    %108 = vector.broadcast %cst_44 : bf16 to vector<16x1xbf16>
    %109 = vector.extract_strided_slice %90 {offsets = [0, 0], sizes = [16, 63], strides = [1, 1]} : vector<16x64xbf16> to vector<16x63xbf16>
    %110 = tpu.concatenate %108, %109 in 1 : vector<16x1xbf16>, vector<16x63xbf16> -> vector<16x64xbf16>
    %111 = vector.broadcast %21 : vector<1x64xbf16> to vector<16x64xbf16>
    %112 = arith.mulf %110, %111 : vector<16x64xbf16>
    %cst_45 = arith.constant 0.000000e+00 : bf16
    %113 = vector.broadcast %cst_45 : bf16 to vector<16x1xbf16>
    %114 = vector.extract_strided_slice %90 {offsets = [0, 1], sizes = [16, 63], strides = [1, 1]} : vector<16x64xbf16> to vector<16x63xbf16>
    %115 = tpu.concatenate %114, %113 in 1 : vector<16x63xbf16>, vector<16x1xbf16> -> vector<16x64xbf16>
    %116 = vector.broadcast %26 : vector<1x64xbf16> to vector<16x64xbf16>
    %117 = arith.mulf %115, %116 : vector<16x64xbf16>
    %118 = tpu.concatenate %112, %90, %117 in 0 : vector<16x64xbf16>, vector<16x64xbf16>, vector<16x64xbf16> -> vector<48x64xbf16>
    %c1_46 = arith.constant 1 : index
    %c0_47 = arith.constant 0 : index
    %c0_48 = arith.constant 0 : index
    %119 = vector.load %arg6[%c1_46, %c0_47, %c0_48] : memref<3x8x48xbf16, #tpu.memory_space<vmem>>, vector<1x8x48xbf16>
    %120 = vector.shape_cast %119 : vector<1x8x48xbf16> to vector<8x48xbf16>
    %cst_49 = arith.constant dense<0.000000e+00> : vector<8x64xf32>
    %121 = tpu.matmul %120, %118, %cst_49 {dimension_numbers = #tpu.dot_dimension_numbers<[1], [0], [0], [1], [0, 0, 1, 1], [], []>} : vector<8x48xbf16>, vector<48x64xbf16>, vector<8x64xf32> -> vector<8x64xf32>
    %122 = arith.addf %107, %121 : vector<8x64xf32>
    %cst_50 = arith.constant 0.000000e+00 : bf16
    %123 = vector.broadcast %cst_50 : bf16 to vector<16x7xbf16>
    %124 = vector.extract_strided_slice %90 {offsets = [0, 7], sizes = [16, 57], strides = [1, 1]} : vector<16x64xbf16> to vector<16x57xbf16>
    %125 = tpu.concatenate %124, %123 in 1 : vector<16x57xbf16>, vector<16x7xbf16> -> vector<16x64xbf16>
    %126 = vector.broadcast %21 : vector<1x64xbf16> to vector<16x64xbf16>
    %127 = arith.mulf %125, %126 : vector<16x64xbf16>
    %cst_51 = arith.constant 0.000000e+00 : bf16
    %128 = vector.broadcast %cst_51 : bf16 to vector<16x8xbf16>
    %129 = vector.extract_strided_slice %90 {offsets = [0, 8], sizes = [16, 56], strides = [1, 1]} : vector<16x64xbf16> to vector<16x56xbf16>
    %130 = tpu.concatenate %129, %128 in 1 : vector<16x56xbf16>, vector<16x8xbf16> -> vector<16x64xbf16>
    %cst_52 = arith.constant 0.000000e+00 : bf16
    %131 = vector.broadcast %cst_52 : bf16 to vector<16x9xbf16>
    %132 = vector.extract_strided_slice %90 {offsets = [0, 9], sizes = [16, 55], strides = [1, 1]} : vector<16x64xbf16> to vector<16x55xbf16>
    %133 = tpu.concatenate %132, %131 in 1 : vector<16x55xbf16>, vector<16x9xbf16> -> vector<16x64xbf16>
    %134 = vector.broadcast %26 : vector<1x64xbf16> to vector<16x64xbf16>
    %135 = arith.mulf %133, %134 : vector<16x64xbf16>
    %136 = tpu.concatenate %127, %130, %135 in 0 : vector<16x64xbf16>, vector<16x64xbf16>, vector<16x64xbf16> -> vector<48x64xbf16>
    %c2_53 = arith.constant 2 : index
    %c0_54 = arith.constant 0 : index
    %c0_55 = arith.constant 0 : index
    %137 = vector.load %arg6[%c2_53, %c0_54, %c0_55] : memref<3x8x48xbf16, #tpu.memory_space<vmem>>, vector<1x8x48xbf16>
    %138 = vector.shape_cast %137 : vector<1x8x48xbf16> to vector<8x48xbf16>
    %cst_56 = arith.constant dense<0.000000e+00> : vector<8x64xf32>
    %139 = tpu.matmul %138, %136, %cst_56 {dimension_numbers = #tpu.dot_dimension_numbers<[1], [0], [0], [1], [0, 0, 1, 1], [], []>} : vector<8x48xbf16>, vector<48x64xbf16>, vector<8x64xf32> -> vector<8x64xf32>
    %140 = arith.addf %122, %139 : vector<8x64xf32>
    %141 = vector.broadcast %84 : vector<8x1xf32> to vector<8x64xf32>
    %142 = arith.mulf %140, %141 : vector<8x64xf32>
    %143 = vector.broadcast %85 : vector<8x1xf32> to vector<8x64xf32>
    %144 = arith.addf %142, %143 : vector<8x64xf32>
    %cst_57 = arith.constant 0.000000e+00 : f32
    %145 = vector.broadcast %cst_57 : f32 to vector<8x64xf32>
    %146 = arith.maximumf %144, %145 : vector<8x64xf32>
    %147 = arith.truncf %146 : vector<8x64xf32> to vector<8x64xbf16>
    %cst_58 = arith.constant 0.000000e+00 : bf16
    %148 = vector.broadcast %cst_58 : bf16 to vector<8x64xbf16>
    %149 = tpu.concatenate %147, %148 in 0 : vector<8x64xbf16>, vector<8x64xbf16> -> vector<16x64xbf16>
    %cst_59 = arith.constant 0.000000e+00 : bf16
    %150 = vector.broadcast %cst_59 : bf16 to vector<16x9xbf16>
    %151 = vector.extract_strided_slice %149 {offsets = [0, 0], sizes = [16, 55], strides = [1, 1]} : vector<16x64xbf16> to vector<16x55xbf16>
    %152 = tpu.concatenate %150, %151 in 1 : vector<16x9xbf16>, vector<16x55xbf16> -> vector<16x64xbf16>
    %153 = vector.broadcast %21 : vector<1x64xbf16> to vector<16x64xbf16>
    %154 = arith.mulf %152, %153 : vector<16x64xbf16>
    %cst_60 = arith.constant 0.000000e+00 : bf16
    %155 = vector.broadcast %cst_60 : bf16 to vector<16x8xbf16>
    %156 = vector.extract_strided_slice %149 {offsets = [0, 0], sizes = [16, 56], strides = [1, 1]} : vector<16x64xbf16> to vector<16x56xbf16>
    %157 = tpu.concatenate %155, %156 in 1 : vector<16x8xbf16>, vector<16x56xbf16> -> vector<16x64xbf16>
    %cst_61 = arith.constant 0.000000e+00 : bf16
    %158 = vector.broadcast %cst_61 : bf16 to vector<16x7xbf16>
    %159 = vector.extract_strided_slice %149 {offsets = [0, 0], sizes = [16, 57], strides = [1, 1]} : vector<16x64xbf16> to vector<16x57xbf16>
    %160 = tpu.concatenate %158, %159 in 1 : vector<16x7xbf16>, vector<16x57xbf16> -> vector<16x64xbf16>
    %161 = vector.broadcast %26 : vector<1x64xbf16> to vector<16x64xbf16>
    %162 = arith.mulf %160, %161 : vector<16x64xbf16>
    %163 = tpu.concatenate %154, %157, %162 in 0 : vector<16x64xbf16>, vector<16x64xbf16>, vector<16x64xbf16> -> vector<48x64xbf16>
    %c0_62 = arith.constant 0 : index
    %c0_63 = arith.constant 0 : index
    %c0_64 = arith.constant 0 : index
    %164 = vector.load %arg9[%c0_62, %c0_63, %c0_64] : memref<3x8x48xbf16, #tpu.memory_space<vmem>>, vector<1x8x48xbf16>
    %165 = vector.shape_cast %164 : vector<1x8x48xbf16> to vector<8x48xbf16>
    %cst_65 = arith.constant dense<0.000000e+00> : vector<8x64xf32>
    %166 = tpu.matmul %165, %163, %cst_65 {dimension_numbers = #tpu.dot_dimension_numbers<[1], [0], [0], [1], [0, 0, 1, 1], [], []>} : vector<8x48xbf16>, vector<48x64xbf16>, vector<8x64xf32> -> vector<8x64xf32>
    %cst_66 = arith.constant 0.000000e+00 : bf16
    %167 = vector.broadcast %cst_66 : bf16 to vector<16x1xbf16>
    %168 = vector.extract_strided_slice %149 {offsets = [0, 0], sizes = [16, 63], strides = [1, 1]} : vector<16x64xbf16> to vector<16x63xbf16>
    %169 = tpu.concatenate %167, %168 in 1 : vector<16x1xbf16>, vector<16x63xbf16> -> vector<16x64xbf16>
    %170 = vector.broadcast %21 : vector<1x64xbf16> to vector<16x64xbf16>
    %171 = arith.mulf %169, %170 : vector<16x64xbf16>
    %cst_67 = arith.constant 0.000000e+00 : bf16
    %172 = vector.broadcast %cst_67 : bf16 to vector<16x1xbf16>
    %173 = vector.extract_strided_slice %149 {offsets = [0, 1], sizes = [16, 63], strides = [1, 1]} : vector<16x64xbf16> to vector<16x63xbf16>
    %174 = tpu.concatenate %173, %172 in 1 : vector<16x63xbf16>, vector<16x1xbf16> -> vector<16x64xbf16>
    %175 = vector.broadcast %26 : vector<1x64xbf16> to vector<16x64xbf16>
    %176 = arith.mulf %174, %175 : vector<16x64xbf16>
    %177 = tpu.concatenate %171, %149, %176 in 0 : vector<16x64xbf16>, vector<16x64xbf16>, vector<16x64xbf16> -> vector<48x64xbf16>
    %c1_68 = arith.constant 1 : index
    %c0_69 = arith.constant 0 : index
    %c0_70 = arith.constant 0 : index
    %178 = vector.load %arg9[%c1_68, %c0_69, %c0_70] : memref<3x8x48xbf16, #tpu.memory_space<vmem>>, vector<1x8x48xbf16>
    %179 = vector.shape_cast %178 : vector<1x8x48xbf16> to vector<8x48xbf16>
    %cst_71 = arith.constant dense<0.000000e+00> : vector<8x64xf32>
    %180 = tpu.matmul %179, %177, %cst_71 {dimension_numbers = #tpu.dot_dimension_numbers<[1], [0], [0], [1], [0, 0, 1, 1], [], []>} : vector<8x48xbf16>, vector<48x64xbf16>, vector<8x64xf32> -> vector<8x64xf32>
    %181 = arith.addf %166, %180 : vector<8x64xf32>
    %cst_72 = arith.constant 0.000000e+00 : bf16
    %182 = vector.broadcast %cst_72 : bf16 to vector<16x7xbf16>
    %183 = vector.extract_strided_slice %149 {offsets = [0, 7], sizes = [16, 57], strides = [1, 1]} : vector<16x64xbf16> to vector<16x57xbf16>
    %184 = tpu.concatenate %183, %182 in 1 : vector<16x57xbf16>, vector<16x7xbf16> -> vector<16x64xbf16>
    %185 = vector.broadcast %21 : vector<1x64xbf16> to vector<16x64xbf16>
    %186 = arith.mulf %184, %185 : vector<16x64xbf16>
    %cst_73 = arith.constant 0.000000e+00 : bf16
    %187 = vector.broadcast %cst_73 : bf16 to vector<16x8xbf16>
    %188 = vector.extract_strided_slice %149 {offsets = [0, 8], sizes = [16, 56], strides = [1, 1]} : vector<16x64xbf16> to vector<16x56xbf16>
    %189 = tpu.concatenate %188, %187 in 1 : vector<16x56xbf16>, vector<16x8xbf16> -> vector<16x64xbf16>
    %cst_74 = arith.constant 0.000000e+00 : bf16
    %190 = vector.broadcast %cst_74 : bf16 to vector<16x9xbf16>
    %191 = vector.extract_strided_slice %149 {offsets = [0, 9], sizes = [16, 55], strides = [1, 1]} : vector<16x64xbf16> to vector<16x55xbf16>
    %192 = tpu.concatenate %191, %190 in 1 : vector<16x55xbf16>, vector<16x9xbf16> -> vector<16x64xbf16>
    %193 = vector.broadcast %26 : vector<1x64xbf16> to vector<16x64xbf16>
    %194 = arith.mulf %192, %193 : vector<16x64xbf16>
    %195 = tpu.concatenate %186, %189, %194 in 0 : vector<16x64xbf16>, vector<16x64xbf16>, vector<16x64xbf16> -> vector<48x64xbf16>
    %c2_75 = arith.constant 2 : index
    %c0_76 = arith.constant 0 : index
    %c0_77 = arith.constant 0 : index
    %196 = vector.load %arg9[%c2_75, %c0_76, %c0_77] : memref<3x8x48xbf16, #tpu.memory_space<vmem>>, vector<1x8x48xbf16>
    %197 = vector.shape_cast %196 : vector<1x8x48xbf16> to vector<8x48xbf16>
    %cst_78 = arith.constant dense<0.000000e+00> : vector<8x64xf32>
    %198 = tpu.matmul %197, %195, %cst_78 {dimension_numbers = #tpu.dot_dimension_numbers<[1], [0], [0], [1], [0, 0, 1, 1], [], []>} : vector<8x48xbf16>, vector<48x64xbf16>, vector<8x64xf32> -> vector<8x64xf32>
    %199 = arith.addf %181, %198 : vector<8x64xf32>
    %200 = vector.broadcast %86 : vector<8x1xf32> to vector<8x64xf32>
    %201 = arith.mulf %199, %200 : vector<8x64xf32>
    %202 = vector.broadcast %87 : vector<8x1xf32> to vector<8x64xf32>
    %203 = arith.addf %201, %202 : vector<8x64xf32>
    %204 = arith.addf %203, %83 : vector<8x64xf32>
    %cst_79 = arith.constant 0.000000e+00 : f32
    %205 = vector.broadcast %cst_79 : f32 to vector<8x64xf32>
    %206 = arith.maximumf %204, %205 : vector<8x64xf32>
    %c0_80 = arith.constant 0 : index
    %c0_81 = arith.constant 0 : index
    %c0_82 = arith.constant 0 : index
    %207 = vector.load %arg12[%c0_80, %c0_81, %c0_82] : memref<1x8x64xf32, #tpu.memory_space<vmem>>, vector<1x8x64xf32>
    %208 = vector.shape_cast %207 : vector<1x8x64xf32> to vector<8x64xf32>
    %209 = vector.shape_cast %206 : vector<8x64xf32> to vector<1x8x64xf32>
    tpu.vector_store %arg12[%c0_80, %c0_81, %c0_82], %209 {strides = array<i32>} : memref<1x8x64xf32, #tpu.memory_space<vmem>>, vector<1x8x64xf32>,
    return
  }
  func.func @transform_0(%arg0: i32) -> (i32, i32, i32) {
    %c0_i32 = arith.constant 0 : i32
    %c0_i32_0 = arith.constant 0 : i32
    %c0_i32_1 = arith.constant 0 : i32
    return %arg0, %c0_i32, %c0_i32_0 : i32, i32, i32
  }
  func.func @transform_1(%arg0: i32) -> (i32, i32, i32) {
    %c0_i32 = arith.constant 0 : i32
    %c0_i32_0 = arith.constant 0 : i32
    %c0_i32_1 = arith.constant 0 : i32
    return %arg0, %c0_i32, %c0_i32_0 : i32, i32, i32
  }
  func.func @transform_2(%arg0: i32) -> (i32, i32, i32) {
    %c0_i32 = arith.constant 0 : i32
    %c0_i32_0 = arith.constant 0 : i32
    %c0_i32_1 = arith.constant 0 : i32
    %c0_i32_2 = arith.constant 0 : i32
    return %c0_i32, %c0_i32_0, %c0_i32_1 : i32, i32, i32
  }
  func.func @transform_3(%arg0: i32) -> (i32, i32) {
    %c0_i32 = arith.constant 0 : i32
    %c0_i32_0 = arith.constant 0 : i32
    %c0_i32_1 = arith.constant 0 : i32
    return %c0_i32, %c0_i32_0 : i32, i32
  }
  func.func @transform_4(%arg0: i32) -> (i32, i32) {
    %c0_i32 = arith.constant 0 : i32
    %c0_i32_0 = arith.constant 0 : i32
    %c0_i32_1 = arith.constant 0 : i32
    return %c0_i32, %c0_i32_0 : i32, i32
  }
  func.func @transform_5(%arg0: i32) -> (i32, i32, i32) {
    %c0_i32 = arith.constant 0 : i32
    %c0_i32_0 = arith.constant 0 : i32
    %c0_i32_1 = arith.constant 0 : i32
    %c0_i32_2 = arith.constant 0 : i32
    return %c0_i32, %c0_i32_0, %c0_i32_1 : i32, i32, i32
  }
  func.func @transform_6(%arg0: i32) -> (i32, i32) {
    %c0_i32 = arith.constant 0 : i32
    %c0_i32_0 = arith.constant 0 : i32
    %c0_i32_1 = arith.constant 0 : i32
    return %c0_i32, %c0_i32_0 : i32, i32
  }
  func.func @transform_7(%arg0: i32) -> (i32, i32) {
    %c0_i32 = arith.constant 0 : i32
    %c0_i32_0 = arith.constant 0 : i32
    %c0_i32_1 = arith.constant 0 : i32
    return %c0_i32, %c0_i32_0 : i32, i32
  }
  func.func @transform_8(%arg0: i32) -> (i32, i32, i32) {
    %c0_i32 = arith.constant 0 : i32
    %c0_i32_0 = arith.constant 0 : i32
    %c0_i32_1 = arith.constant 0 : i32
    %c0_i32_2 = arith.constant 0 : i32
    return %c0_i32, %c0_i32_0, %c0_i32_1 : i32, i32, i32
  }
  func.func @transform_9(%arg0: i32) -> (i32, i32) {
    %c0_i32 = arith.constant 0 : i32
    %c0_i32_0 = arith.constant 0 : i32
    %c0_i32_1 = arith.constant 0 : i32
    return %c0_i32, %c0_i32_0 : i32, i32
  }
  func.func @transform_10(%arg0: i32) -> (i32, i32) {
    %c0_i32 = arith.constant 0 : i32
    %c0_i32_0 = arith.constant 0 : i32
    %c0_i32_1 = arith.constant 0 : i32
    return %c0_i32, %c0_i32_0 : i32, i32
  }
  func.func @transform_11(%arg0: i32) -> (i32, i32, i32) {
    %c0_i32 = arith.constant 0 : i32
    %c0_i32_0 = arith.constant 0 : i32
    %c0_i32_1 = arith.constant 0 : i32
    return %arg0, %c0_i32, %c0_i32_0 : i32, i32, i32
  }
}

module attributes {stable_mosaic.version = 11 : i64} {
  func.func @_down_sblock_kernel(%arg0: i32, %arg1: memref<1x64x16xbf16, #tpu.memory_space<vmem>>, %arg2: memref<1x16x16xf32, #tpu.memory_space<vmem>>, %arg3: memref<3x16x48xbf16, #tpu.memory_space<vmem>>, %arg4: memref<16x1xf32, #tpu.memory_space<vmem>>, %arg5: memref<16x1xf32, #tpu.memory_space<vmem>>, %arg6: memref<3x16x48xbf16, #tpu.memory_space<vmem>>, %arg7: memref<16x1xf32, #tpu.memory_space<vmem>>, %arg8: memref<16x1xf32, #tpu.memory_space<vmem>>, %arg9: memref<3x16x48xbf16, #tpu.memory_space<vmem>>, %arg10: memref<16x1xf32, #tpu.memory_space<vmem>>, %arg11: memref<16x1xf32, #tpu.memory_space<vmem>>, %arg12: memref<1x16x16xf32, #tpu.memory_space<vmem>>) attributes {dimension_semantics = [#tpu.dimension_semantics<parallel>], iteration_bounds = array<i64: 2>, scalar_prefetch = 0 : i64, scratch_operands = 0 : i64, tpu.core_type = #tpu.core_type<tc>, window_params = [{transform_indices = @transform_0, window_bounds = array<i64: 1, 64, 16>}, {transform_indices = @transform_1, window_bounds = array<i64: 1, 16, 16>}, {pipeline_mode = #tpu.pipeline_mode<synchronous>, transform_indices = @transform_2, window_bounds = array<i64: 3, 16, 48>}, {pipeline_mode = #tpu.pipeline_mode<synchronous>, transform_indices = @transform_3, window_bounds = array<i64: 16, 1>}, {pipeline_mode = #tpu.pipeline_mode<synchronous>, transform_indices = @transform_4, window_bounds = array<i64: 16, 1>}, {pipeline_mode = #tpu.pipeline_mode<synchronous>, transform_indices = @transform_5, window_bounds = array<i64: 3, 16, 48>}, {pipeline_mode = #tpu.pipeline_mode<synchronous>, transform_indices = @transform_6, window_bounds = array<i64: 16, 1>}, {pipeline_mode = #tpu.pipeline_mode<synchronous>, transform_indices = @transform_7, window_bounds = array<i64: 16, 1>}, {pipeline_mode = #tpu.pipeline_mode<synchronous>, transform_indices = @transform_8, window_bounds = array<i64: 3, 16, 48>}, {pipeline_mode = #tpu.pipeline_mode<synchronous>, transform_indices = @transform_9, window_bounds = array<i64: 16, 1>}, {pipeline_mode = #tpu.pipeline_mode<synchronous>, transform_indices = @transform_10, window_bounds = array<i64: 16, 1>}, {transform_indices = @transform_11, window_bounds = array<i64: 1, 16, 16>}]} {
    %0 = tpu.iota {dimensions = array<i32: 1>} : vector<1x16xi32>
    %c4_i32 = arith.constant 4 : i32
    %c0_i32 = arith.constant 0 : i32
    %1 = arith.cmpi eq, %c4_i32, %c0_i32 : i32
    %c1_i32 = arith.constant 1 : i32
    %2 = arith.select %1, %c1_i32, %c4_i32 : i32
    %3 = vector.broadcast %2 : i32 to vector<1x16xi32>
    %4 = arith.remsi %0, %3 : vector<1x16xi32>
    %c0_i32_0 = arith.constant 0 : i32
    %5 = vector.broadcast %c0_i32_0 : i32 to vector<1x16xi32>
    %6 = arith.cmpi ne, %4, %5 : vector<1x16xi32>
    %c0_i32_1 = arith.constant 0 : i32
    %7 = vector.broadcast %c0_i32_1 : i32 to vector<1x16xi32>
    %8 = arith.cmpi slt, %4, %7 : vector<1x16xi32>
    %c0_i32_2 = arith.constant 0 : i32
    %9 = arith.cmpi slt, %2, %c0_i32_2 : i32
    %10 = vector.broadcast %9 : i1 to vector<1x16xi1>
    %11 = vector.broadcast %10 : vector<1x16xi1> to vector<1x16xi1>
    %12 = arith.xori %8, %11 : vector<1x16xi1>
    %13 = arith.andi %12, %6 : vector<1x16xi1>
    %14 = vector.broadcast %2 : i32 to vector<1x16xi32>
    %15 = arith.addi %4, %14 : vector<1x16xi32>
    %16 = arith.select %13, %15, %4 : vector<1x16xi1>, vector<1x16xi32>
    %c1_i32_3 = arith.constant 1 : i32
    %17 = vector.broadcast %c1_i32_3 : i32 to vector<1x16xi32>
    %18 = arith.cmpi sge, %16, %17 : vector<1x16xi32>
    %19 = arith.extui %18 : vector<1x16xi1> to vector<1x16xi32>
    %20 = arith.sitofp %19 : vector<1x16xi32> to vector<1x16xf32>
    %21 = arith.truncf %20 : vector<1x16xf32> to vector<1x16xbf16>
    %c3_i32 = arith.constant 3 : i32
    %22 = vector.broadcast %c3_i32 : i32 to vector<1x16xi32>
    %23 = arith.cmpi slt, %16, %22 : vector<1x16xi32>
    %24 = arith.extui %23 : vector<1x16xi1> to vector<1x16xi32>
    %25 = arith.sitofp %24 : vector<1x16xi32> to vector<1x16xf32>
    %26 = arith.truncf %25 : vector<1x16xf32> to vector<1x16xbf16>
    %c0 = arith.constant 0 : index
    %c0_4 = arith.constant 0 : index
    %c0_5 = arith.constant 0 : index
    %27 = vector.load %arg1[%c0, %c0_4, %c0_5] : memref<1x64x16xbf16, #tpu.memory_space<vmem>>, vector<1x64x16xbf16>
    %28 = vector.shape_cast %27 : vector<1x64x16xbf16> to vector<64x16xbf16>
    %c0_6 = arith.constant 0 : index
    %c0_7 = arith.constant 0 : index
    %29 = vector.load %arg4[%c0_6, %c0_7] : memref<16x1xf32, #tpu.memory_space<vmem>>, vector<16x1xf32>
    %c0_8 = arith.constant 0 : index
    %c0_9 = arith.constant 0 : index
    %30 = vector.load %arg5[%c0_8, %c0_9] : memref<16x1xf32, #tpu.memory_space<vmem>>, vector<16x1xf32>
    %31 = vector.extract_strided_slice %28 {offsets = [48, 0], sizes = [16, 16], strides = [1, 1]} : vector<64x16xbf16> to vector<16x16xbf16>
    %cst = arith.constant 0.000000e+00 : bf16
    %32 = vector.broadcast %cst : bf16 to vector<16x5xbf16>
    %33 = vector.extract_strided_slice %31 {offsets = [0, 0], sizes = [16, 11], strides = [1, 1]} : vector<16x16xbf16> to vector<16x11xbf16>
    %34 = tpu.concatenate %32, %33 in 1 : vector<16x5xbf16>, vector<16x11xbf16> -> vector<16x16xbf16>
    %35 = vector.broadcast %21 : vector<1x16xbf16> to vector<16x16xbf16>
    %36 = arith.mulf %34, %35 : vector<16x16xbf16>
    %37 = vector.extract_strided_slice %28 {offsets = [32, 0], sizes = [16, 16], strides = [1, 1]} : vector<64x16xbf16> to vector<16x16xbf16>
    %cst_10 = arith.constant 0.000000e+00 : bf16
    %38 = vector.broadcast %cst_10 : bf16 to vector<16x4xbf16>
    %39 = vector.extract_strided_slice %37 {offsets = [0, 0], sizes = [16, 12], strides = [1, 1]} : vector<16x16xbf16> to vector<16x12xbf16>
    %40 = tpu.concatenate %38, %39 in 1 : vector<16x4xbf16>, vector<16x12xbf16> -> vector<16x16xbf16>
    %41 = vector.extract_strided_slice %28 {offsets = [48, 0], sizes = [16, 16], strides = [1, 1]} : vector<64x16xbf16> to vector<16x16xbf16>
    %cst_11 = arith.constant 0.000000e+00 : bf16
    %42 = vector.broadcast %cst_11 : bf16 to vector<16x4xbf16>
    %43 = vector.extract_strided_slice %41 {offsets = [0, 0], sizes = [16, 12], strides = [1, 1]} : vector<16x16xbf16> to vector<16x12xbf16>
    %44 = tpu.concatenate %42, %43 in 1 : vector<16x4xbf16>, vector<16x12xbf16> -> vector<16x16xbf16>
    %45 = tpu.concatenate %36, %40, %44 in 0 : vector<16x16xbf16>, vector<16x16xbf16>, vector<16x16xbf16> -> vector<48x16xbf16>
    %c0_12 = arith.constant 0 : index
    %c0_13 = arith.constant 0 : index
    %c0_14 = arith.constant 0 : index
    %46 = vector.load %arg3[%c0_12, %c0_13, %c0_14] : memref<3x16x48xbf16, #tpu.memory_space<vmem>>, vector<1x16x48xbf16>
    %47 = vector.shape_cast %46 : vector<1x16x48xbf16> to vector<16x48xbf16>
    %cst_15 = arith.constant dense<0.000000e+00> : vector<16x16xf32>
    %48 = tpu.matmul %47, %45, %cst_15 {dimension_numbers = #tpu.dot_dimension_numbers<[1], [0], [0], [1], [0, 0, 1, 1], [], []>} : vector<16x48xbf16>, vector<48x16xbf16>, vector<16x16xf32> -> vector<16x16xf32>
    %49 = vector.extract_strided_slice %28 {offsets = [16, 0], sizes = [16, 16], strides = [1, 1]} : vector<64x16xbf16> to vector<16x16xbf16>
    %cst_16 = arith.constant 0.000000e+00 : bf16
    %50 = vector.broadcast %cst_16 : bf16 to vector<16x1xbf16>
    %51 = vector.extract_strided_slice %49 {offsets = [0, 0], sizes = [16, 15], strides = [1, 1]} : vector<16x16xbf16> to vector<16x15xbf16>
    %52 = tpu.concatenate %50, %51 in 1 : vector<16x1xbf16>, vector<16x15xbf16> -> vector<16x16xbf16>
    %53 = vector.broadcast %21 : vector<1x16xbf16> to vector<16x16xbf16>
    %54 = arith.mulf %52, %53 : vector<16x16xbf16>
    %55 = vector.extract_strided_slice %28 {offsets = [0, 0], sizes = [16, 16], strides = [1, 1]} : vector<64x16xbf16> to vector<16x16xbf16>
    %56 = vector.extract_strided_slice %28 {offsets = [16, 0], sizes = [16, 16], strides = [1, 1]} : vector<64x16xbf16> to vector<16x16xbf16>
    %57 = tpu.concatenate %54, %55, %56 in 0 : vector<16x16xbf16>, vector<16x16xbf16>, vector<16x16xbf16> -> vector<48x16xbf16>
    %c1 = arith.constant 1 : index
    %c0_17 = arith.constant 0 : index
    %c0_18 = arith.constant 0 : index
    %58 = vector.load %arg3[%c1, %c0_17, %c0_18] : memref<3x16x48xbf16, #tpu.memory_space<vmem>>, vector<1x16x48xbf16>
    %59 = vector.shape_cast %58 : vector<1x16x48xbf16> to vector<16x48xbf16>
    %cst_19 = arith.constant dense<0.000000e+00> : vector<16x16xf32>
    %60 = tpu.matmul %59, %57, %cst_19 {dimension_numbers = #tpu.dot_dimension_numbers<[1], [0], [0], [1], [0, 0, 1, 1], [], []>} : vector<16x48xbf16>, vector<48x16xbf16>, vector<16x16xf32> -> vector<16x16xf32>
    %61 = arith.addf %48, %60 : vector<16x16xf32>
    %62 = vector.extract_strided_slice %28 {offsets = [48, 0], sizes = [16, 16], strides = [1, 1]} : vector<64x16xbf16> to vector<16x16xbf16>
    %cst_20 = arith.constant 0.000000e+00 : bf16
    %63 = vector.broadcast %cst_20 : bf16 to vector<16x1xbf16>
    %64 = vector.extract_strided_slice %62 {offsets = [0, 0], sizes = [16, 15], strides = [1, 1]} : vector<16x16xbf16> to vector<16x15xbf16>
    %65 = tpu.concatenate %63, %64 in 1 : vector<16x1xbf16>, vector<16x15xbf16> -> vector<16x16xbf16>
    %66 = vector.broadcast %21 : vector<1x16xbf16> to vector<16x16xbf16>
    %67 = arith.mulf %65, %66 : vector<16x16xbf16>
    %68 = vector.extract_strided_slice %28 {offsets = [32, 0], sizes = [16, 16], strides = [1, 1]} : vector<64x16xbf16> to vector<16x16xbf16>
    %69 = vector.extract_strided_slice %28 {offsets = [48, 0], sizes = [16, 16], strides = [1, 1]} : vector<64x16xbf16> to vector<16x16xbf16>
    %70 = tpu.concatenate %67, %68, %69 in 0 : vector<16x16xbf16>, vector<16x16xbf16>, vector<16x16xbf16> -> vector<48x16xbf16>
    %c2 = arith.constant 2 : index
    %c0_21 = arith.constant 0 : index
    %c0_22 = arith.constant 0 : index
    %71 = vector.load %arg3[%c2, %c0_21, %c0_22] : memref<3x16x48xbf16, #tpu.memory_space<vmem>>, vector<1x16x48xbf16>
    %72 = vector.shape_cast %71 : vector<1x16x48xbf16> to vector<16x48xbf16>
    %cst_23 = arith.constant dense<0.000000e+00> : vector<16x16xf32>
    %73 = tpu.matmul %72, %70, %cst_23 {dimension_numbers = #tpu.dot_dimension_numbers<[1], [0], [0], [1], [0, 0, 1, 1], [], []>} : vector<16x48xbf16>, vector<48x16xbf16>, vector<16x16xf32> -> vector<16x16xf32>
    %74 = arith.addf %61, %73 : vector<16x16xf32>
    %75 = vector.broadcast %29 : vector<16x1xf32> to vector<16x16xf32>
    %76 = arith.mulf %74, %75 : vector<16x16xf32>
    %77 = vector.broadcast %30 : vector<16x1xf32> to vector<16x16xf32>
    %78 = arith.addf %76, %77 : vector<16x16xf32>
    %c0_24 = arith.constant 0 : index
    %c0_25 = arith.constant 0 : index
    %c0_26 = arith.constant 0 : index
    %79 = vector.load %arg2[%c0_24, %c0_25, %c0_26] : memref<1x16x16xf32, #tpu.memory_space<vmem>>, vector<1x16x16xf32>
    %80 = vector.shape_cast %79 : vector<1x16x16xf32> to vector<16x16xf32>
    %cst_27 = arith.constant 0.000000e+00 : f32
    %81 = vector.broadcast %cst_27 : f32 to vector<16x16xf32>
    %82 = arith.maximumf %78, %81 : vector<16x16xf32>
    %83 = arith.addf %80, %82 : vector<16x16xf32>
    %c0_28 = arith.constant 0 : index
    %c0_29 = arith.constant 0 : index
    %84 = vector.load %arg7[%c0_28, %c0_29] : memref<16x1xf32, #tpu.memory_space<vmem>>, vector<16x1xf32>
    %c0_30 = arith.constant 0 : index
    %c0_31 = arith.constant 0 : index
    %85 = vector.load %arg8[%c0_30, %c0_31] : memref<16x1xf32, #tpu.memory_space<vmem>>, vector<16x1xf32>
    %c0_32 = arith.constant 0 : index
    %c0_33 = arith.constant 0 : index
    %86 = vector.load %arg10[%c0_32, %c0_33] : memref<16x1xf32, #tpu.memory_space<vmem>>, vector<16x1xf32>
    %c0_34 = arith.constant 0 : index
    %c0_35 = arith.constant 0 : index
    %87 = vector.load %arg11[%c0_34, %c0_35] : memref<16x1xf32, #tpu.memory_space<vmem>>, vector<16x1xf32>
    %88 = arith.truncf %83 : vector<16x16xf32> to vector<16x16xbf16>
    %cst_36 = arith.constant 0.000000e+00 : bf16
    %89 = vector.broadcast %cst_36 : bf16 to vector<16x5xbf16>
    %90 = vector.extract_strided_slice %88 {offsets = [0, 0], sizes = [16, 11], strides = [1, 1]} : vector<16x16xbf16> to vector<16x11xbf16>
    %91 = tpu.concatenate %89, %90 in 1 : vector<16x5xbf16>, vector<16x11xbf16> -> vector<16x16xbf16>
    %92 = vector.broadcast %21 : vector<1x16xbf16> to vector<16x16xbf16>
    %93 = arith.mulf %91, %92 : vector<16x16xbf16>
    %cst_37 = arith.constant 0.000000e+00 : bf16
    %94 = vector.broadcast %cst_37 : bf16 to vector<16x4xbf16>
    %95 = vector.extract_strided_slice %88 {offsets = [0, 0], sizes = [16, 12], strides = [1, 1]} : vector<16x16xbf16> to vector<16x12xbf16>
    %96 = tpu.concatenate %94, %95 in 1 : vector<16x4xbf16>, vector<16x12xbf16> -> vector<16x16xbf16>
    %cst_38 = arith.constant 0.000000e+00 : bf16
    %97 = vector.broadcast %cst_38 : bf16 to vector<16x3xbf16>
    %98 = vector.extract_strided_slice %88 {offsets = [0, 0], sizes = [16, 13], strides = [1, 1]} : vector<16x16xbf16> to vector<16x13xbf16>
    %99 = tpu.concatenate %97, %98 in 1 : vector<16x3xbf16>, vector<16x13xbf16> -> vector<16x16xbf16>
    %100 = vector.broadcast %26 : vector<1x16xbf16> to vector<16x16xbf16>
    %101 = arith.mulf %99, %100 : vector<16x16xbf16>
    %102 = tpu.concatenate %93, %96, %101 in 0 : vector<16x16xbf16>, vector<16x16xbf16>, vector<16x16xbf16> -> vector<48x16xbf16>
    %c0_39 = arith.constant 0 : index
    %c0_40 = arith.constant 0 : index
    %c0_41 = arith.constant 0 : index
    %103 = vector.load %arg6[%c0_39, %c0_40, %c0_41] : memref<3x16x48xbf16, #tpu.memory_space<vmem>>, vector<1x16x48xbf16>
    %104 = vector.shape_cast %103 : vector<1x16x48xbf16> to vector<16x48xbf16>
    %cst_42 = arith.constant dense<0.000000e+00> : vector<16x16xf32>
    %105 = tpu.matmul %104, %102, %cst_42 {dimension_numbers = #tpu.dot_dimension_numbers<[1], [0], [0], [1], [0, 0, 1, 1], [], []>} : vector<16x48xbf16>, vector<48x16xbf16>, vector<16x16xf32> -> vector<16x16xf32>
    %cst_43 = arith.constant 0.000000e+00 : bf16
    %106 = vector.broadcast %cst_43 : bf16 to vector<16x1xbf16>
    %107 = vector.extract_strided_slice %88 {offsets = [0, 0], sizes = [16, 15], strides = [1, 1]} : vector<16x16xbf16> to vector<16x15xbf16>
    %108 = tpu.concatenate %106, %107 in 1 : vector<16x1xbf16>, vector<16x15xbf16> -> vector<16x16xbf16>
    %109 = vector.broadcast %21 : vector<1x16xbf16> to vector<16x16xbf16>
    %110 = arith.mulf %108, %109 : vector<16x16xbf16>
    %cst_44 = arith.constant 0.000000e+00 : bf16
    %111 = vector.broadcast %cst_44 : bf16 to vector<16x1xbf16>
    %112 = vector.extract_strided_slice %88 {offsets = [0, 1], sizes = [16, 15], strides = [1, 1]} : vector<16x16xbf16> to vector<16x15xbf16>
    %113 = tpu.concatenate %112, %111 in 1 : vector<16x15xbf16>, vector<16x1xbf16> -> vector<16x16xbf16>
    %114 = vector.broadcast %26 : vector<1x16xbf16> to vector<16x16xbf16>
    %115 = arith.mulf %113, %114 : vector<16x16xbf16>
    %116 = tpu.concatenate %110, %88, %115 in 0 : vector<16x16xbf16>, vector<16x16xbf16>, vector<16x16xbf16> -> vector<48x16xbf16>
    %c1_45 = arith.constant 1 : index
    %c0_46 = arith.constant 0 : index
    %c0_47 = arith.constant 0 : index
    %117 = vector.load %arg6[%c1_45, %c0_46, %c0_47] : memref<3x16x48xbf16, #tpu.memory_space<vmem>>, vector<1x16x48xbf16>
    %118 = vector.shape_cast %117 : vector<1x16x48xbf16> to vector<16x48xbf16>
    %cst_48 = arith.constant dense<0.000000e+00> : vector<16x16xf32>
    %119 = tpu.matmul %118, %116, %cst_48 {dimension_numbers = #tpu.dot_dimension_numbers<[1], [0], [0], [1], [0, 0, 1, 1], [], []>} : vector<16x48xbf16>, vector<48x16xbf16>, vector<16x16xf32> -> vector<16x16xf32>
    %120 = arith.addf %105, %119 : vector<16x16xf32>
    %cst_49 = arith.constant 0.000000e+00 : bf16
    %121 = vector.broadcast %cst_49 : bf16 to vector<16x3xbf16>
    %122 = vector.extract_strided_slice %88 {offsets = [0, 3], sizes = [16, 13], strides = [1, 1]} : vector<16x16xbf16> to vector<16x13xbf16>
    %123 = tpu.concatenate %122, %121 in 1 : vector<16x13xbf16>, vector<16x3xbf16> -> vector<16x16xbf16>
    %124 = vector.broadcast %21 : vector<1x16xbf16> to vector<16x16xbf16>
    %125 = arith.mulf %123, %124 : vector<16x16xbf16>
    %cst_50 = arith.constant 0.000000e+00 : bf16
    %126 = vector.broadcast %cst_50 : bf16 to vector<16x4xbf16>
    %127 = vector.extract_strided_slice %88 {offsets = [0, 4], sizes = [16, 12], strides = [1, 1]} : vector<16x16xbf16> to vector<16x12xbf16>
    %128 = tpu.concatenate %127, %126 in 1 : vector<16x12xbf16>, vector<16x4xbf16> -> vector<16x16xbf16>
    %cst_51 = arith.constant 0.000000e+00 : bf16
    %129 = vector.broadcast %cst_51 : bf16 to vector<16x5xbf16>
    %130 = vector.extract_strided_slice %88 {offsets = [0, 5], sizes = [16, 11], strides = [1, 1]} : vector<16x16xbf16> to vector<16x11xbf16>
    %131 = tpu.concatenate %130, %129 in 1 : vector<16x11xbf16>, vector<16x5xbf16> -> vector<16x16xbf16>
    %132 = vector.broadcast %26 : vector<1x16xbf16> to vector<16x16xbf16>
    %133 = arith.mulf %131, %132 : vector<16x16xbf16>
    %134 = tpu.concatenate %125, %128, %133 in 0 : vector<16x16xbf16>, vector<16x16xbf16>, vector<16x16xbf16> -> vector<48x16xbf16>
    %c2_52 = arith.constant 2 : index
    %c0_53 = arith.constant 0 : index
    %c0_54 = arith.constant 0 : index
    %135 = vector.load %arg6[%c2_52, %c0_53, %c0_54] : memref<3x16x48xbf16, #tpu.memory_space<vmem>>, vector<1x16x48xbf16>
    %136 = vector.shape_cast %135 : vector<1x16x48xbf16> to vector<16x48xbf16>
    %cst_55 = arith.constant dense<0.000000e+00> : vector<16x16xf32>
    %137 = tpu.matmul %136, %134, %cst_55 {dimension_numbers = #tpu.dot_dimension_numbers<[1], [0], [0], [1], [0, 0, 1, 1], [], []>} : vector<16x48xbf16>, vector<48x16xbf16>, vector<16x16xf32> -> vector<16x16xf32>
    %138 = arith.addf %120, %137 : vector<16x16xf32>
    %139 = vector.broadcast %84 : vector<16x1xf32> to vector<16x16xf32>
    %140 = arith.mulf %138, %139 : vector<16x16xf32>
    %141 = vector.broadcast %85 : vector<16x1xf32> to vector<16x16xf32>
    %142 = arith.addf %140, %141 : vector<16x16xf32>
    %cst_56 = arith.constant 0.000000e+00 : f32
    %143 = vector.broadcast %cst_56 : f32 to vector<16x16xf32>
    %144 = arith.maximumf %142, %143 : vector<16x16xf32>
    %145 = arith.truncf %144 : vector<16x16xf32> to vector<16x16xbf16>
    %cst_57 = arith.constant 0.000000e+00 : bf16
    %146 = vector.broadcast %cst_57 : bf16 to vector<16x5xbf16>
    %147 = vector.extract_strided_slice %145 {offsets = [0, 0], sizes = [16, 11], strides = [1, 1]} : vector<16x16xbf16> to vector<16x11xbf16>
    %148 = tpu.concatenate %146, %147 in 1 : vector<16x5xbf16>, vector<16x11xbf16> -> vector<16x16xbf16>
    %149 = vector.broadcast %21 : vector<1x16xbf16> to vector<16x16xbf16>
    %150 = arith.mulf %148, %149 : vector<16x16xbf16>
    %cst_58 = arith.constant 0.000000e+00 : bf16
    %151 = vector.broadcast %cst_58 : bf16 to vector<16x4xbf16>
    %152 = vector.extract_strided_slice %145 {offsets = [0, 0], sizes = [16, 12], strides = [1, 1]} : vector<16x16xbf16> to vector<16x12xbf16>
    %153 = tpu.concatenate %151, %152 in 1 : vector<16x4xbf16>, vector<16x12xbf16> -> vector<16x16xbf16>
    %cst_59 = arith.constant 0.000000e+00 : bf16
    %154 = vector.broadcast %cst_59 : bf16 to vector<16x3xbf16>
    %155 = vector.extract_strided_slice %145 {offsets = [0, 0], sizes = [16, 13], strides = [1, 1]} : vector<16x16xbf16> to vector<16x13xbf16>
    %156 = tpu.concatenate %154, %155 in 1 : vector<16x3xbf16>, vector<16x13xbf16> -> vector<16x16xbf16>
    %157 = vector.broadcast %26 : vector<1x16xbf16> to vector<16x16xbf16>
    %158 = arith.mulf %156, %157 : vector<16x16xbf16>
    %159 = tpu.concatenate %150, %153, %158 in 0 : vector<16x16xbf16>, vector<16x16xbf16>, vector<16x16xbf16> -> vector<48x16xbf16>
    %c0_60 = arith.constant 0 : index
    %c0_61 = arith.constant 0 : index
    %c0_62 = arith.constant 0 : index
    %160 = vector.load %arg9[%c0_60, %c0_61, %c0_62] : memref<3x16x48xbf16, #tpu.memory_space<vmem>>, vector<1x16x48xbf16>
    %161 = vector.shape_cast %160 : vector<1x16x48xbf16> to vector<16x48xbf16>
    %cst_63 = arith.constant dense<0.000000e+00> : vector<16x16xf32>
    %162 = tpu.matmul %161, %159, %cst_63 {dimension_numbers = #tpu.dot_dimension_numbers<[1], [0], [0], [1], [0, 0, 1, 1], [], []>} : vector<16x48xbf16>, vector<48x16xbf16>, vector<16x16xf32> -> vector<16x16xf32>
    %cst_64 = arith.constant 0.000000e+00 : bf16
    %163 = vector.broadcast %cst_64 : bf16 to vector<16x1xbf16>
    %164 = vector.extract_strided_slice %145 {offsets = [0, 0], sizes = [16, 15], strides = [1, 1]} : vector<16x16xbf16> to vector<16x15xbf16>
    %165 = tpu.concatenate %163, %164 in 1 : vector<16x1xbf16>, vector<16x15xbf16> -> vector<16x16xbf16>
    %166 = vector.broadcast %21 : vector<1x16xbf16> to vector<16x16xbf16>
    %167 = arith.mulf %165, %166 : vector<16x16xbf16>
    %cst_65 = arith.constant 0.000000e+00 : bf16
    %168 = vector.broadcast %cst_65 : bf16 to vector<16x1xbf16>
    %169 = vector.extract_strided_slice %145 {offsets = [0, 1], sizes = [16, 15], strides = [1, 1]} : vector<16x16xbf16> to vector<16x15xbf16>
    %170 = tpu.concatenate %169, %168 in 1 : vector<16x15xbf16>, vector<16x1xbf16> -> vector<16x16xbf16>
    %171 = vector.broadcast %26 : vector<1x16xbf16> to vector<16x16xbf16>
    %172 = arith.mulf %170, %171 : vector<16x16xbf16>
    %173 = tpu.concatenate %167, %145, %172 in 0 : vector<16x16xbf16>, vector<16x16xbf16>, vector<16x16xbf16> -> vector<48x16xbf16>
    %c1_66 = arith.constant 1 : index
    %c0_67 = arith.constant 0 : index
    %c0_68 = arith.constant 0 : index
    %174 = vector.load %arg9[%c1_66, %c0_67, %c0_68] : memref<3x16x48xbf16, #tpu.memory_space<vmem>>, vector<1x16x48xbf16>
    %175 = vector.shape_cast %174 : vector<1x16x48xbf16> to vector<16x48xbf16>
    %cst_69 = arith.constant dense<0.000000e+00> : vector<16x16xf32>
    %176 = tpu.matmul %175, %173, %cst_69 {dimension_numbers = #tpu.dot_dimension_numbers<[1], [0], [0], [1], [0, 0, 1, 1], [], []>} : vector<16x48xbf16>, vector<48x16xbf16>, vector<16x16xf32> -> vector<16x16xf32>
    %177 = arith.addf %162, %176 : vector<16x16xf32>
    %cst_70 = arith.constant 0.000000e+00 : bf16
    %178 = vector.broadcast %cst_70 : bf16 to vector<16x3xbf16>
    %179 = vector.extract_strided_slice %145 {offsets = [0, 3], sizes = [16, 13], strides = [1, 1]} : vector<16x16xbf16> to vector<16x13xbf16>
    %180 = tpu.concatenate %179, %178 in 1 : vector<16x13xbf16>, vector<16x3xbf16> -> vector<16x16xbf16>
    %181 = vector.broadcast %21 : vector<1x16xbf16> to vector<16x16xbf16>
    %182 = arith.mulf %180, %181 : vector<16x16xbf16>
    %cst_71 = arith.constant 0.000000e+00 : bf16
    %183 = vector.broadcast %cst_71 : bf16 to vector<16x4xbf16>
    %184 = vector.extract_strided_slice %145 {offsets = [0, 4], sizes = [16, 12], strides = [1, 1]} : vector<16x16xbf16> to vector<16x12xbf16>
    %185 = tpu.concatenate %184, %183 in 1 : vector<16x12xbf16>, vector<16x4xbf16> -> vector<16x16xbf16>
    %cst_72 = arith.constant 0.000000e+00 : bf16
    %186 = vector.broadcast %cst_72 : bf16 to vector<16x5xbf16>
    %187 = vector.extract_strided_slice %145 {offsets = [0, 5], sizes = [16, 11], strides = [1, 1]} : vector<16x16xbf16> to vector<16x11xbf16>
    %188 = tpu.concatenate %187, %186 in 1 : vector<16x11xbf16>, vector<16x5xbf16> -> vector<16x16xbf16>
    %189 = vector.broadcast %26 : vector<1x16xbf16> to vector<16x16xbf16>
    %190 = arith.mulf %188, %189 : vector<16x16xbf16>
    %191 = tpu.concatenate %182, %185, %190 in 0 : vector<16x16xbf16>, vector<16x16xbf16>, vector<16x16xbf16> -> vector<48x16xbf16>
    %c2_73 = arith.constant 2 : index
    %c0_74 = arith.constant 0 : index
    %c0_75 = arith.constant 0 : index
    %192 = vector.load %arg9[%c2_73, %c0_74, %c0_75] : memref<3x16x48xbf16, #tpu.memory_space<vmem>>, vector<1x16x48xbf16>
    %193 = vector.shape_cast %192 : vector<1x16x48xbf16> to vector<16x48xbf16>
    %cst_76 = arith.constant dense<0.000000e+00> : vector<16x16xf32>
    %194 = tpu.matmul %193, %191, %cst_76 {dimension_numbers = #tpu.dot_dimension_numbers<[1], [0], [0], [1], [0, 0, 1, 1], [], []>} : vector<16x48xbf16>, vector<48x16xbf16>, vector<16x16xf32> -> vector<16x16xf32>
    %195 = arith.addf %177, %194 : vector<16x16xf32>
    %196 = vector.broadcast %86 : vector<16x1xf32> to vector<16x16xf32>
    %197 = arith.mulf %195, %196 : vector<16x16xf32>
    %198 = vector.broadcast %87 : vector<16x1xf32> to vector<16x16xf32>
    %199 = arith.addf %197, %198 : vector<16x16xf32>
    %200 = arith.addf %199, %83 : vector<16x16xf32>
    %cst_77 = arith.constant 0.000000e+00 : f32
    %201 = vector.broadcast %cst_77 : f32 to vector<16x16xf32>
    %202 = arith.maximumf %200, %201 : vector<16x16xf32>
    %c0_78 = arith.constant 0 : index
    %c0_79 = arith.constant 0 : index
    %c0_80 = arith.constant 0 : index
    %203 = vector.load %arg12[%c0_78, %c0_79, %c0_80] : memref<1x16x16xf32, #tpu.memory_space<vmem>>, vector<1x16x16xf32>
    %204 = vector.shape_cast %203 : vector<1x16x16xf32> to vector<16x16xf32>
    %205 = vector.shape_cast %202 : vector<16x16xf32> to vector<1x16x16xf32>
    tpu.vector_store %arg12[%c0_78, %c0_79, %c0_80], %205 {strides = array<i32>} : memref<1x16x16xf32, #tpu.memory_space<vmem>>, vector<1x16x16xf32>,
    return
  }
  func.func @transform_0(%arg0: i32) -> (i32, i32, i32) {
    %c0_i32 = arith.constant 0 : i32
    %c0_i32_0 = arith.constant 0 : i32
    %c0_i32_1 = arith.constant 0 : i32
    return %arg0, %c0_i32, %c0_i32_0 : i32, i32, i32
  }
  func.func @transform_1(%arg0: i32) -> (i32, i32, i32) {
    %c0_i32 = arith.constant 0 : i32
    %c0_i32_0 = arith.constant 0 : i32
    %c0_i32_1 = arith.constant 0 : i32
    return %arg0, %c0_i32, %c0_i32_0 : i32, i32, i32
  }
  func.func @transform_2(%arg0: i32) -> (i32, i32, i32) {
    %c0_i32 = arith.constant 0 : i32
    %c0_i32_0 = arith.constant 0 : i32
    %c0_i32_1 = arith.constant 0 : i32
    %c0_i32_2 = arith.constant 0 : i32
    return %c0_i32, %c0_i32_0, %c0_i32_1 : i32, i32, i32
  }
  func.func @transform_3(%arg0: i32) -> (i32, i32) {
    %c0_i32 = arith.constant 0 : i32
    %c0_i32_0 = arith.constant 0 : i32
    %c0_i32_1 = arith.constant 0 : i32
    return %c0_i32, %c0_i32_0 : i32, i32
  }
  func.func @transform_4(%arg0: i32) -> (i32, i32) {
    %c0_i32 = arith.constant 0 : i32
    %c0_i32_0 = arith.constant 0 : i32
    %c0_i32_1 = arith.constant 0 : i32
    return %c0_i32, %c0_i32_0 : i32, i32
  }
  func.func @transform_5(%arg0: i32) -> (i32, i32, i32) {
    %c0_i32 = arith.constant 0 : i32
    %c0_i32_0 = arith.constant 0 : i32
    %c0_i32_1 = arith.constant 0 : i32
    %c0_i32_2 = arith.constant 0 : i32
    return %c0_i32, %c0_i32_0, %c0_i32_1 : i32, i32, i32
  }
  func.func @transform_6(%arg0: i32) -> (i32, i32) {
    %c0_i32 = arith.constant 0 : i32
    %c0_i32_0 = arith.constant 0 : i32
    %c0_i32_1 = arith.constant 0 : i32
    return %c0_i32, %c0_i32_0 : i32, i32
  }
  func.func @transform_7(%arg0: i32) -> (i32, i32) {
    %c0_i32 = arith.constant 0 : i32
    %c0_i32_0 = arith.constant 0 : i32
    %c0_i32_1 = arith.constant 0 : i32
    return %c0_i32, %c0_i32_0 : i32, i32
  }
  func.func @transform_8(%arg0: i32) -> (i32, i32, i32) {
    %c0_i32 = arith.constant 0 : i32
    %c0_i32_0 = arith.constant 0 : i32
    %c0_i32_1 = arith.constant 0 : i32
    %c0_i32_2 = arith.constant 0 : i32
    return %c0_i32, %c0_i32_0, %c0_i32_1 : i32, i32, i32
  }
  func.func @transform_9(%arg0: i32) -> (i32, i32) {
    %c0_i32 = arith.constant 0 : i32
    %c0_i32_0 = arith.constant 0 : i32
    %c0_i32_1 = arith.constant 0 : i32
    return %c0_i32, %c0_i32_0 : i32, i32
  }
  func.func @transform_10(%arg0: i32) -> (i32, i32) {
    %c0_i32 = arith.constant 0 : i32
    %c0_i32_0 = arith.constant 0 : i32
    %c0_i32_1 = arith.constant 0 : i32
    return %c0_i32, %c0_i32_0 : i32, i32
  }
  func.func @transform_11(%arg0: i32) -> (i32, i32, i32) {
    %c0_i32 = arith.constant 0 : i32
    %c0_i32_0 = arith.constant 0 : i32
    %c0_i32_1 = arith.constant 0 : i32
    return %arg0, %c0_i32, %c0_i32_0 : i32, i32, i32
  }
}

module attributes {stable_mosaic.version = 11 : i64} {
  func.func @_down_conv_kernel(%arg0: i32, %arg1: memref<1x64x4xbf16, #tpu.memory_space<vmem>>, %arg2: memref<3x32x48xbf16, #tpu.memory_space<vmem>>, %arg3: memref<32x1xf32, #tpu.memory_space<vmem>>, %arg4: memref<32x1xf32, #tpu.memory_space<vmem>>, %arg5: memref<1x32x4xf32, #tpu.memory_space<vmem>>) attributes {dimension_semantics = [#tpu.dimension_semantics<parallel>], iteration_bounds = array<i64: 2>, scalar_prefetch = 0 : i64, scratch_operands = 0 : i64, tpu.core_type = #tpu.core_type<tc>, window_params = [{transform_indices = @transform_0, window_bounds = array<i64: 1, 64, 4>}, {pipeline_mode = #tpu.pipeline_mode<synchronous>, transform_indices = @transform_1, window_bounds = array<i64: 3, 32, 48>}, {pipeline_mode = #tpu.pipeline_mode<synchronous>, transform_indices = @transform_2, window_bounds = array<i64: 32, 1>}, {pipeline_mode = #tpu.pipeline_mode<synchronous>, transform_indices = @transform_3, window_bounds = array<i64: 32, 1>}, {transform_indices = @transform_4, window_bounds = array<i64: 1, 32, 4>}]} {
    %0 = tpu.iota {dimensions = array<i32: 1>} : vector<1x4xi32>
    %c2_i32 = arith.constant 2 : i32
    %c0_i32 = arith.constant 0 : i32
    %1 = arith.cmpi eq, %c2_i32, %c0_i32 : i32
    %c1_i32 = arith.constant 1 : i32
    %2 = arith.select %1, %c1_i32, %c2_i32 : i32
    %3 = vector.broadcast %2 : i32 to vector<1x4xi32>
    %4 = arith.remsi %0, %3 : vector<1x4xi32>
    %c0_i32_0 = arith.constant 0 : i32
    %5 = vector.broadcast %c0_i32_0 : i32 to vector<1x4xi32>
    %6 = arith.cmpi ne, %4, %5 : vector<1x4xi32>
    %c0_i32_1 = arith.constant 0 : i32
    %7 = vector.broadcast %c0_i32_1 : i32 to vector<1x4xi32>
    %8 = arith.cmpi slt, %4, %7 : vector<1x4xi32>
    %c0_i32_2 = arith.constant 0 : i32
    %9 = arith.cmpi slt, %2, %c0_i32_2 : i32
    %10 = vector.broadcast %9 : i1 to vector<1x4xi1>
    %11 = vector.broadcast %10 : vector<1x4xi1> to vector<1x4xi1>
    %12 = arith.xori %8, %11 : vector<1x4xi1>
    %13 = arith.andi %12, %6 : vector<1x4xi1>
    %14 = vector.broadcast %2 : i32 to vector<1x4xi32>
    %15 = arith.addi %4, %14 : vector<1x4xi32>
    %16 = arith.select %13, %15, %4 : vector<1x4xi1>, vector<1x4xi32>
    %c1_i32_3 = arith.constant 1 : i32
    %17 = vector.broadcast %c1_i32_3 : i32 to vector<1x4xi32>
    %18 = arith.cmpi sge, %16, %17 : vector<1x4xi32>
    %19 = arith.extui %18 : vector<1x4xi1> to vector<1x4xi32>
    %20 = arith.sitofp %19 : vector<1x4xi32> to vector<1x4xf32>
    %21 = arith.truncf %20 : vector<1x4xf32> to vector<1x4xbf16>
    %c0 = arith.constant 0 : index
    %c0_4 = arith.constant 0 : index
    %c0_5 = arith.constant 0 : index
    %22 = vector.load %arg1[%c0, %c0_4, %c0_5] : memref<1x64x4xbf16, #tpu.memory_space<vmem>>, vector<1x64x4xbf16>
    %23 = vector.shape_cast %22 : vector<1x64x4xbf16> to vector<64x4xbf16>
    %c0_6 = arith.constant 0 : index
    %c0_7 = arith.constant 0 : index
    %24 = vector.load %arg3[%c0_6, %c0_7] : memref<32x1xf32, #tpu.memory_space<vmem>>, vector<32x1xf32>
    %c0_8 = arith.constant 0 : index
    %c0_9 = arith.constant 0 : index
    %25 = vector.load %arg4[%c0_8, %c0_9] : memref<32x1xf32, #tpu.memory_space<vmem>>, vector<32x1xf32>
    %26 = vector.extract_strided_slice %23 {offsets = [48, 0], sizes = [16, 4], strides = [1, 1]} : vector<64x4xbf16> to vector<16x4xbf16>
    %cst = arith.constant 0.000000e+00 : bf16
    %27 = vector.broadcast %cst : bf16 to vector<16x3xbf16>
    %28 = vector.extract_strided_slice %26 {offsets = [0, 0], sizes = [16, 1], strides = [1, 1]} : vector<16x4xbf16> to vector<16x1xbf16>
    %29 = tpu.concatenate %27, %28 in 1 : vector<16x3xbf16>, vector<16x1xbf16> -> vector<16x4xbf16>
    %30 = vector.broadcast %21 : vector<1x4xbf16> to vector<16x4xbf16>
    %31 = arith.mulf %29, %30 : vector<16x4xbf16>
    %32 = vector.extract_strided_slice %23 {offsets = [32, 0], sizes = [16, 4], strides = [1, 1]} : vector<64x4xbf16> to vector<16x4xbf16>
    %cst_10 = arith.constant 0.000000e+00 : bf16
    %33 = vector.broadcast %cst_10 : bf16 to vector<16x2xbf16>
    %34 = vector.extract_strided_slice %32 {offsets = [0, 0], sizes = [16, 2], strides = [1, 1]} : vector<16x4xbf16> to vector<16x2xbf16>
    %35 = tpu.concatenate %33, %34 in 1 : vector<16x2xbf16>, vector<16x2xbf16> -> vector<16x4xbf16>
    %36 = vector.extract_strided_slice %23 {offsets = [48, 0], sizes = [16, 4], strides = [1, 1]} : vector<64x4xbf16> to vector<16x4xbf16>
    %cst_11 = arith.constant 0.000000e+00 : bf16
    %37 = vector.broadcast %cst_11 : bf16 to vector<16x2xbf16>
    %38 = vector.extract_strided_slice %36 {offsets = [0, 0], sizes = [16, 2], strides = [1, 1]} : vector<16x4xbf16> to vector<16x2xbf16>
    %39 = tpu.concatenate %37, %38 in 1 : vector<16x2xbf16>, vector<16x2xbf16> -> vector<16x4xbf16>
    %40 = tpu.concatenate %31, %35, %39 in 0 : vector<16x4xbf16>, vector<16x4xbf16>, vector<16x4xbf16> -> vector<48x4xbf16>
    %c0_12 = arith.constant 0 : index
    %c0_13 = arith.constant 0 : index
    %c0_14 = arith.constant 0 : index
    %41 = vector.load %arg2[%c0_12, %c0_13, %c0_14] : memref<3x32x48xbf16, #tpu.memory_space<vmem>>, vector<1x32x48xbf16>
    %42 = vector.shape_cast %41 : vector<1x32x48xbf16> to vector<32x48xbf16>
    %cst_15 = arith.constant dense<0.000000e+00> : vector<32x4xf32>
    %43 = tpu.matmul %42, %40, %cst_15 {dimension_numbers = #tpu.dot_dimension_numbers<[1], [0], [0], [1], [0, 0, 1, 1], [], []>} : vector<32x48xbf16>, vector<48x4xbf16>, vector<32x4xf32> -> vector<32x4xf32>
    %44 = vector.extract_strided_slice %23 {offsets = [16, 0], sizes = [16, 4], strides = [1, 1]} : vector<64x4xbf16> to vector<16x4xbf16>
    %cst_16 = arith.constant 0.000000e+00 : bf16
    %45 = vector.broadcast %cst_16 : bf16 to vector<16x1xbf16>
    %46 = vector.extract_strided_slice %44 {offsets = [0, 0], sizes = [16, 3], strides = [1, 1]} : vector<16x4xbf16> to vector<16x3xbf16>
    %47 = tpu.concatenate %45, %46 in 1 : vector<16x1xbf16>, vector<16x3xbf16> -> vector<16x4xbf16>
    %48 = vector.broadcast %21 : vector<1x4xbf16> to vector<16x4xbf16>
    %49 = arith.mulf %47, %48 : vector<16x4xbf16>
    %50 = vector.extract_strided_slice %23 {offsets = [0, 0], sizes = [16, 4], strides = [1, 1]} : vector<64x4xbf16> to vector<16x4xbf16>
    %51 = vector.extract_strided_slice %23 {offsets = [16, 0], sizes = [16, 4], strides = [1, 1]} : vector<64x4xbf16> to vector<16x4xbf16>
    %52 = tpu.concatenate %49, %50, %51 in 0 : vector<16x4xbf16>, vector<16x4xbf16>, vector<16x4xbf16> -> vector<48x4xbf16>
    %c1 = arith.constant 1 : index
    %c0_17 = arith.constant 0 : index
    %c0_18 = arith.constant 0 : index
    %53 = vector.load %arg2[%c1, %c0_17, %c0_18] : memref<3x32x48xbf16, #tpu.memory_space<vmem>>, vector<1x32x48xbf16>
    %54 = vector.shape_cast %53 : vector<1x32x48xbf16> to vector<32x48xbf16>
    %cst_19 = arith.constant dense<0.000000e+00> : vector<32x4xf32>
    %55 = tpu.matmul %54, %52, %cst_19 {dimension_numbers = #tpu.dot_dimension_numbers<[1], [0], [0], [1], [0, 0, 1, 1], [], []>} : vector<32x48xbf16>, vector<48x4xbf16>, vector<32x4xf32> -> vector<32x4xf32>
    %56 = arith.addf %43, %55 : vector<32x4xf32>
    %57 = vector.extract_strided_slice %23 {offsets = [48, 0], sizes = [16, 4], strides = [1, 1]} : vector<64x4xbf16> to vector<16x4xbf16>
    %cst_20 = arith.constant 0.000000e+00 : bf16
    %58 = vector.broadcast %cst_20 : bf16 to vector<16x1xbf16>
    %59 = vector.extract_strided_slice %57 {offsets = [0, 0], sizes = [16, 3], strides = [1, 1]} : vector<16x4xbf16> to vector<16x3xbf16>
    %60 = tpu.concatenate %58, %59 in 1 : vector<16x1xbf16>, vector<16x3xbf16> -> vector<16x4xbf16>
    %61 = vector.broadcast %21 : vector<1x4xbf16> to vector<16x4xbf16>
    %62 = arith.mulf %60, %61 : vector<16x4xbf16>
    %63 = vector.extract_strided_slice %23 {offsets = [32, 0], sizes = [16, 4], strides = [1, 1]} : vector<64x4xbf16> to vector<16x4xbf16>
    %64 = vector.extract_strided_slice %23 {offsets = [48, 0], sizes = [16, 4], strides = [1, 1]} : vector<64x4xbf16> to vector<16x4xbf16>
    %65 = tpu.concatenate %62, %63, %64 in 0 : vector<16x4xbf16>, vector<16x4xbf16>, vector<16x4xbf16> -> vector<48x4xbf16>
    %c2 = arith.constant 2 : index
    %c0_21 = arith.constant 0 : index
    %c0_22 = arith.constant 0 : index
    %66 = vector.load %arg2[%c2, %c0_21, %c0_22] : memref<3x32x48xbf16, #tpu.memory_space<vmem>>, vector<1x32x48xbf16>
    %67 = vector.shape_cast %66 : vector<1x32x48xbf16> to vector<32x48xbf16>
    %cst_23 = arith.constant dense<0.000000e+00> : vector<32x4xf32>
    %68 = tpu.matmul %67, %65, %cst_23 {dimension_numbers = #tpu.dot_dimension_numbers<[1], [0], [0], [1], [0, 0, 1, 1], [], []>} : vector<32x48xbf16>, vector<48x4xbf16>, vector<32x4xf32> -> vector<32x4xf32>
    %69 = arith.addf %56, %68 : vector<32x4xf32>
    %70 = vector.broadcast %24 : vector<32x1xf32> to vector<32x4xf32>
    %71 = arith.mulf %69, %70 : vector<32x4xf32>
    %72 = vector.broadcast %25 : vector<32x1xf32> to vector<32x4xf32>
    %73 = arith.addf %71, %72 : vector<32x4xf32>
    %cst_24 = arith.constant 0.000000e+00 : f32
    %74 = vector.broadcast %cst_24 : f32 to vector<32x4xf32>
    %75 = arith.maximumf %73, %74 : vector<32x4xf32>
    %c0_25 = arith.constant 0 : index
    %c0_26 = arith.constant 0 : index
    %c0_27 = arith.constant 0 : index
    %76 = vector.load %arg5[%c0_25, %c0_26, %c0_27] : memref<1x32x4xf32, #tpu.memory_space<vmem>>, vector<1x32x4xf32>
    %77 = vector.shape_cast %76 : vector<1x32x4xf32> to vector<32x4xf32>
    %78 = vector.shape_cast %75 : vector<32x4xf32> to vector<1x32x4xf32>
    tpu.vector_store %arg5[%c0_25, %c0_26, %c0_27], %78 {strides = array<i32>} : memref<1x32x4xf32, #tpu.memory_space<vmem>>, vector<1x32x4xf32>,
    return
  }
  func.func @transform_0(%arg0: i32) -> (i32, i32, i32) {
    %c0_i32 = arith.constant 0 : i32
    %c0_i32_0 = arith.constant 0 : i32
    %c0_i32_1 = arith.constant 0 : i32
    return %arg0, %c0_i32, %c0_i32_0 : i32, i32, i32
  }
  func.func @transform_1(%arg0: i32) -> (i32, i32, i32) {
    %c0_i32 = arith.constant 0 : i32
    %c0_i32_0 = arith.constant 0 : i32
    %c0_i32_1 = arith.constant 0 : i32
    %c0_i32_2 = arith.constant 0 : i32
    return %c0_i32, %c0_i32_0, %c0_i32_1 : i32, i32, i32
  }
  func.func @transform_2(%arg0: i32) -> (i32, i32) {
    %c0_i32 = arith.constant 0 : i32
    %c0_i32_0 = arith.constant 0 : i32
    %c0_i32_1 = arith.constant 0 : i32
    return %c0_i32, %c0_i32_0 : i32, i32
  }
  func.func @transform_3(%arg0: i32) -> (i32, i32) {
    %c0_i32 = arith.constant 0 : i32
    %c0_i32_0 = arith.constant 0 : i32
    %c0_i32_1 = arith.constant 0 : i32
    return %c0_i32, %c0_i32_0 : i32, i32
  }
  func.func @transform_4(%arg0: i32) -> (i32, i32, i32) {
    %c0_i32 = arith.constant 0 : i32
    %c0_i32_0 = arith.constant 0 : i32
    %c0_i32_1 = arith.constant 0 : i32
    return %arg0, %c0_i32, %c0_i32_0 : i32, i32, i32
  }
}

</mosaic_0001>

<bundles_post_ra>
// kernel: encoder_block_nchw.4
= control target key start
LH: loop header
LB: loop body
LE: loop exit
PB: predicated region body
PF: predicated region fallthrough
CT: control target
= control target key end

     0   :  { %s1040_s24 = smov 0   ;;  %s1244_s0 = inlined_call_operand.vmem [shape: f32[2,4,256], index: 0, kind: input, shape index: {}]   ;;  %s1245_s1 = inlined_call_operand.vmem [shape: bf16[3,4,48], index: 1, kind: input, shape index: {}]   ;;  %s1246_s2 = inlined_call_operand.vmem [shape: f32[4,1], index: 2, kind: input, shape index: {}]   ;;  %s1247_s3 = inlined_call_operand.vmem [shape: f32[4,1], index: 3, kind: input, shape index: {}]   ;;  %s1248_s4 = inlined_call_operand.vmem [shape: bf16[3,4,48], index: 4, kind: input, shape index: {}]   ;;  %s1249_s5 = inlined_call_operand.vmem [shape: f32[4,1], index: 5, kind: input, shape index: {}]   ;;  %s1250_s6 = inlined_call_operand.vmem [shape: f32[4,1], index: 6, kind: input, shape index: {}]   ;;  %s1251_s7 = inlined_call_operand.vmem [shape: f32[2,4,256], index: 7, kind: output, shape index: {}]  }
   0x1 LB: > { %s910_s25 = sadd.s32 4294967295, %s988_s24   ;;  %p914_p0 = scmp.ge.s32.totalorder %s988_s24, 1  ;;  %s988_s24 = sphi %s1040_s24, %s17_s24  }
   0x2   : > { %p237_p1 = scmp.lt.s32.totalorder %s988_s24, 3 }
   0x4   : > { %p238_p2 = pnand %p914_p0, %p237_p1 }
   0x5   : > { %p269_p3 = scmp.lt.s32.totalorder (!%p238_p2), %s910_s25, 1  ;;  %vm333_vm0 = vcmask (!%p238_p2), 1041408   ;;  %s990_s30 = smov (!%p238_p2), 1   ;;  %v992_v6 = vmov (!%p238_p2), 0   ;;  %v324_v7 = vld [vmem:[%s1246_s2] sm:$0xf] (!%p238_p2)  ;;  %v280_v9 = vlaneseq (!%p238_p2) }
   0x6   : > { %241 = sbr.rel (%p238_p2) target bundleno = 778 (0x30a), region = 48  ;;  %s991_s8 = smov (!%p238_p2), 127   ;;  %445 = vmatprep.mubr.bf16.mxu0 (!%p238_p2), %v992_v6  ;;  %979 = vset.pattern.permute.xlu0 (!%p238_p2), %v992_v6  ;;  %v325_v8 = vld [vmem:[%s1247_s3] sm:$0xf] (!%p238_p2)  ;;  %v999_v14 = vmov (!%p238_p2), 0.0   ;;  %vm385_vm4 = vcmask (!%p238_p2), 7168  }
   0x7   : > { %980 = vset.pattern.permute.xlu1 (!%p238_p2), %v992_v6  ;;  %700 = vmatprep.mubr.bf16.mxu1 (!%p238_p2), %v992_v6  ;;  %s993_s9 = smov (!%p238_p2), 17   ;;  %s994_s10 = smov (!%p238_p2), 16   ;;  %v281_v10 = vand.u32 (!%p238_p2), 127, %v280_v9  ;;  %vm398_vm6 = vcmask (!%p238_p2), 1039360   ;;  %vm347_vm7 = vcmask (!%p238_p2), 138240   ;;  %vm360_vm8 = vcmask (!%p238_p2), 130048  }
   0x8   : > { %s995_s11 = smov (!%p238_p2), 15   ;;  %s996_s12 = smov (!%p238_p2), 113   ;;  %vm371_vm9 = vcmask (!%p238_p2), 121856   ;;  %v923_v45 = vld [vmem:[%s1245_s1 + $0x2] sm:$0x3] (!%p238_p2)  ;;  %vm409_vm10 = vcmask (!%p238_p2), 392192   ;;  %vm1140_vm12 = vmneg (!%p238_p2), %vm360_vm8 }
   0x9   : > { %s997_s13 = smov (!%p238_p2), 112   ;;  %s998_s14 = smov (!%p238_p2), 111   ;;  %v282_v11 = vadd.s32 (!%p238_p2), 128, %v281_v10  ;;  %v287_v13 = vand.u32 (!%p238_p2), 15, %v281_v10  ;;  %vm502_vm11 = vcmask (!%p238_p2), 924672   ;;  %vm526_vm13 = vcmask (!%p238_p2), 908288  }
   0xa   : > { %v380_v61 = vld [vmem:[%s1245_s1] sm:$0x3] (!%p238_p2)  ;;  %vm515_vm14 = vcmask (!%p238_p2), 916480  }
   0xb   : > { %v294_v12 = vand.u32 (!%p238_p2), 15, %v282_v11  ;;  %vm307_vm2 = vcmp.ge.s32.totalorder (!%p238_p2), %v287_v13, 1  ;;  %vm315_vm5 = vcmp.lt.s32.totalorder (!%p238_p2), %v287_v13, 15 }
   0xc   : > { %v919_v18 = vsel (!%p238_p2), %vm307_vm2, 1.0, %v999_v14  ;;  %v921_v30 = vsel (!%p238_p2), %vm315_vm5, 1.0, %v999_v14 }
   0xd   : > { %s1255_s25 = smov (!%p269_p3, %s910_s25), 1  ;;  %vm308_vm1 = vcmp.ge.s32.totalorder %v294_v12, 1  ;;  %vm316_vm3 = vcmp.lt.s32.totalorder %v294_v12, 15  ;;  %v1109_v21 = vpack.c.bf16 %v919_v18, %v919_v18  ;;  %v1121_v34 = vpack.c.bf16 %v921_v30, %v921_v30 }
   0xe   : > { %s943_s26 = sshll.u32 %s1255_s25, 3  ;;  %v920_v15 = vsel %vm308_vm1, 1.0, %v999_v14  ;;  %v922_v20 = vsel %vm316_vm3, 1.0, %v999_v14 }
   0xf   : > { %s273_s29 = scalar_lea.vmem %s1244_s0, %s943_s26  ;;  %v1107_v19 = vpack.c.bf16 %v920_v15, %v920_v15  ;;  %v1113_v26 = vpack.c.bf16 %v922_v20, %v922_v20  ;;  %s278_s17 = scalar_lea.vmem %s1251_s7, %s943_s26 }
  0x10   : > { %v1056_v0 = vld [vmem:[%s273_s29] sm:$0xff] }
  0x11   : > { %v331_v1 = vpack.c.bf16 %v1056_v0, %v1056_v0  ;;  %v1062_v2 = vcombine.high %v1056_v0, %v1056_v0 }
  0x13   : > { %v1065_v3 = vsel %vm333_vm0, %v331_v1, 0  ;;  %v1069_v4 = vpack.c.bf16 %v1062_v2, %v1062_v2 }
  0x14   : > { %381 = vrot.lane.b32.xlu0 %v1065_v3, %s990_s30  ;;  %394 = vrot.lane.b32.xlu1 %v1065_v3, %s991_s8 }
  0x15   : > { %v339_v5 = vsel %vm333_vm0, %v1069_v4, 0 }
  0x18   : > { %383 = vrot.lane.b32.xlu0 %v339_v5, %s990_s30  ;;  %396 = vrot.lane.b32.xlu1 %v339_v5, %s991_s8 }
  0x1c   : > { %345 = vrot.lane.b32.xlu1 %v339_v5, %s993_s9  ;;  %343 = vrot.lane.b32.xlu0 %v1065_v3, %s993_s9 }
  0x20   : > { %358 = vrot.lane.b32.xlu1 %v339_v5, %s994_s10  ;;  %356 = vrot.lane.b32.xlu0 %v1065_v3, %s994_s10 }
  0x24   : > { %369 = vrot.lane.b32.xlu1 %v339_v5, %s995_s11  ;;  %367 = vrot.lane.b32.xlu0 %v1065_v3, %s995_s11 }
  0x28   : > { %498 = vrot.lane.b32.xlu1 %v1065_v3, %s996_s12  ;;  %500 = vrot.lane.b32.xlu0 %v339_v5, %s996_s12 }
  0x2c   : > { %513 = vrot.lane.b32.xlu1 %v339_v5, %s997_s13  ;;  %511 = vrot.lane.b32.xlu0 %v1065_v3, %s997_s13 }
  0x30   : > { %522 = vrot.lane.b32.xlu1 %v1065_v3, %s998_s14  ;;  %524 = vrot.lane.b32.xlu0 %v339_v5, %s998_s14 }
  0x34   : > { %585 = vperm.xlu0 %979, %v324_v7   ;;  %592 = vperm.xlu1 %980, %v325_v8   ;;  %v929_v7 = vld [vmem:[%s1245_s1 + $0x4] sm:$0x3] }
  0x86   : > { %v382_v16 = vpop.permute.xlu0 %381  ;;  %v395_v17 = vpop.permute.xlu1 %394 }
  0x87   : > { %v390_v22 = vsel %vm385_vm4, 0, %v382_v16 }
  0x88   : > { %v392_v29 = vmul.bf16 %v390_v22, %v1109_v21 }
  0x8a   : > { %v384_v23 = vpop.permute.xlu0 %383  ;;  %v397_v24 = vpop.permute.xlu1 %396 }
  0x8b   : > { %v386_v25 = vsel %vm385_vm4, %v382_v16, %v384_v23  ;;  %v403_v28 = vsel %vm398_vm6, %v397_v24, 0  ;;  %v399_v36 = vsel %vm398_vm6, %v395_v17, %v397_v24 }
  0x8c   : > { %v393_v27 = vmul.bf16 %v386_v25, %v1107_v19  ;;  %v406_v33 = vmul.bf16 %v403_v28, %v1113_v26  ;;  %v405_v41 = vmul.bf16 %v399_v36, %v1121_v34  ;;  %v327_v28 = vld [vmem:[%s1250_s6] sm:$0xf] }
  0x8e   : > { %413 = vmatprep.subr.bf16.mxu0 %v393_v27  ;;  %v346_v31 = vpop.permute.xlu1 %345  ;;  %v344_v32 = vpop.permute.xlu0 %343  ;;  %v326_v27 = vld [vmem:[%s1249_s5] sm:$0xf] }
  0x8f   : > { %414 = vmatpush1.bf16.msra.mxu0 %v392_v29  ;;  %v348_v35 = vsel %vm347_vm7, %v344_v32, %v346_v31  ;;  %v352_v39 = vsel %vm347_vm7, 0, %v344_v32 }
  0x90   : > { %924 = vmatprep.subr.msk.bf16.mxu0 %vm333_vm0, %v1069_v4  ;;  %v355_v40 = vmul.bf16 %v348_v35, %v1107_v19  ;;  %v354_v44 = vmul.bf16 %v352_v39, %v1109_v21 }
  0x92   : > { %v359_v37 = vpop.permute.xlu1 %358  ;;  %v357_v38 = vpop.permute.xlu0 %356 }
  0x93   : > { %416 = vmatpush1.bf16.msra.mxu0 %v1065_v3  ;;  %v361_v46 = vsel %vm360_vm8, %v357_v38, %v359_v37 }
  0x94   : > { %417 = vmatprep.subr.bf16.mxu0 %v406_v33 }
  0x96   : > { %v370_v42 = vpop.permute.xlu1 %369  ;;  %v368_v43 = vpop.permute.xlu0 %367 }
  0x97   : > { %418 = vmatpush1.bf16.msra.mxu0 %v405_v41  ;;  %v372_v47 = vsel %vm371_vm9, %v368_v43, %v370_v42  ;;  %v376_v50 = vsel %vm371_vm9, 0, %v368_v43 }
  0x98   : > { %457 = vmatprep.subr.bf16.mxu0 %v355_v40  ;;  %v379_v51 = vmul.bf16 %v372_v47, %v1113_v26  ;;  %v378_v55 = vmul.bf16 %v376_v50, %v1121_v34 }
  0x9a   : > { %925 = vmatmul.mubr.msk.bf16.vlgmr.msra.gmra.mrb[0].mxu0 %vm409_vm10, %v923_v45  ;;  %v499_v48 = vpop.permute.xlu1 %498  ;;  %v501_v49 = vpop.permute.xlu0 %500 }
  0x9b   : > { %458 = vmatpush1.bf16.msra.mxu0 %v354_v44  ;;  %489 = vmatprep.mubr.bf16.mxu0 %v992_v6  ;;  %v507_v53 = vsel %vm502_vm11, %v501_v49, 0  ;;  %v503_v57 = vsel %vm502_vm11, %v499_v48, %v501_v49  ;;  %v932_v49 = vld [vmem:[%s1248_s4 + $0x2] sm:$0x3] }
  0x9c   : > { %459 = vmatprep.subr.bf16.mxu0 %v361_v46  ;;  %v510_v58 = vmul.bf16 %v507_v53, %v1107_v19  ;;  %v509_v60 = vmul.bf16 %v503_v57, %v1109_v21 }
  0x9e   : > { %v512_v54 = vpop.permute.xlu0 %511  ;;  %v514_v56 = vpop.permute.xlu1 %513 }
  0x9f   : > { %927 = vmatpush1.bf16.msk.msra.mxu0 %vm1140_vm12, %v357_v38  ;;  %v516_v4 = vsel %vm515_vm14, %v512_v54, %v514_v56 }
  0xa0   : > { %461 = vmatprep.subr.bf16.mxu0 %v379_v51 }
  0xa2   : > { %v525_v59 = vpop.permute.xlu0 %524  ;;  %v523_v62 = vpop.permute.xlu1 %522 }
  0xa3   : > { %462 = vmatpush1.bf16.msra.mxu0 %v378_v55  ;;  %v531_v63 = vsel %vm526_vm13, %v525_v59, 0  ;;  %v527_v1 = vsel %vm526_vm13, %v523_v62, %v525_v59 }
  0xa4   : > { %540 = vmatprep.subr.bf16.mxu0 %v510_v58  ;;  %v534_v3 = vmul.bf16 %v531_v63, %v1113_v26  ;;  %v533_v5 = vmul.bf16 %v527_v1, %v1121_v34 }
  0xa6   : > { %928 = vmatmul.mubr.msk.bf16.vlgmr.msra.gmra.mrb[0].mxu0 %vm409_vm10, %v380_v61 }
  0xa7   : > { %541 = vmatpush1.bf16.msra.mxu0 %v509_v60  ;;  %572 = vmatprep.mubr.bf16.mxu0 %v992_v6 }
  0xa8   : > { %930 = vmatprep.subr.msk.bf16.mxu0 %vm515_vm14, %v514_v56 }
  0xab   : > { %543 = vmatpush1.bf16.msra.mxu0 %v516_v4  ;;  %v640_v4 = vld [vmem:[%s1248_s4] sm:$0x3] }
  0xac   : > { %544 = vmatprep.subr.bf16.mxu0 %v534_v3 }
  0xaf   : > { %545 = vmatpush1.bf16.msra.mxu0 %v533_v5 }
  0xb2   : > { %931 = vmatmul.mubr.msk.bf16.vlgmr.msra.gmra.mrb[0].mxu0 %vm409_vm10, %v929_v7 }
  0xb3   : > { %v586_v8 = vpop.permute.xlu0 %585  ;;  %v593_v10 = vpop.permute.xlu1 %592 }
 0x185   : > { %v574_v9 = vpop.f32.mrb[0].mxu0 }
 0x186   : > { %v588_v11 = vmul.f32 %v586_v8, %v574_v9  ;;  %v576_v12 = vpop.f32.mrb[1].mxu0 }
 0x187   : > { %v589_v13 = vmul.f32 %v586_v8, %v576_v12  ;;  %v578_v14 = vpop.f32.mrb[2].mxu0 }
 0x188   : > { %v595_v15 = vadd.f32 %v593_v10, %v588_v11  ;;  %v579_v16 = vpop.f32.mrb[3].mxu0  ;;  %v938_v11 = vld [vmem:[%s1248_s4 + $0x4] sm:$0x3] }
 0x189   : > { %v596_v17 = vadd.f32 %v593_v10, %v589_v13 }
 0x18a   : > { %v597_v18 = vmax.f32 %v595_v15, 0.0 }
 0x18b   : > { %v598_v20 = vmax.f32 %v596_v17, 0.0 }
 0x18c   : > { %v599_v22 = vpack.c.bf16 %v597_v18, %v597_v18 }
 0x18d   : > { %v600_v23 = vpack.c.bf16 %v598_v20, %v598_v20 }
 0x18e   : > { %v602_v24 = vsel %vm333_vm0, %v599_v22, 0 }
 0x18f   : > { %v605_v25 = vsel %vm333_vm0, %v600_v23, 0  ;;  %641 = vrot.lane.b32.xlu1 %v602_v24, %s990_s30 }
 0x190   : > { %643 = vrot.lane.b32.xlu0 %v605_v25, %s990_s30 }
 0x193   : > { %654 = vrot.lane.b32.xlu1 %v605_v25, %s991_s8 }
 0x194   : > { %652 = vrot.lane.b32.xlu0 %v602_v24, %s991_s8 }
 0x197   : > { %609 = vrot.lane.b32.xlu1 %v602_v24, %s993_s9 }
 0x198   : > { %611 = vrot.lane.b32.xlu0 %v605_v25, %s993_s9 }
 0x19b   : > { %620 = vrot.lane.b32.xlu1 %v602_v24, %s994_s10 }
 0x19c   : > { %622 = vrot.lane.b32.xlu0 %v605_v25, %s994_s10 }
 0x19f   : > { %629 = vrot.lane.b32.xlu1 %v602_v24, %s995_s11 }
 0x1a0   : > { %631 = vrot.lane.b32.xlu0 %v605_v25, %s995_s11 }
 0x1a3   : > { %755 = vrot.lane.b32.xlu1 %v605_v25, %s996_s12 }
 0x1a4   : > { %753 = vrot.lane.b32.xlu0 %v602_v24, %s996_s12 }
 0x1a7   : > { %764 = vrot.lane.b32.xlu1 %v602_v24, %s997_s13 }
 0x1a8   : > { %766 = vrot.lane.b32.xlu0 %v605_v25, %s997_s13 }
 0x1ab   : > { %775 = vrot.lane.b32.xlu1 %v605_v25, %s998_s14 }
 0x1ac   : > { %773 = vrot.lane.b32.xlu0 %v602_v24, %s998_s14 }
 0x1af   : > { %834 = vperm.xlu1 %980, %v326_v27  }
 0x1b0   : > { %841 = vperm.xlu0 %979, %v327_v28  }
 0x201   : > { %v642_v29 = vpop.permute.xlu1 %641 }
 0x202   : > { %v648_v30 = vsel %vm385_vm4, 0, %v642_v29  ;;  %v644_v31 = vpop.permute.xlu0 %643 }
 0x203   : > { %v645_v32 = vsel %vm385_vm4, %v642_v29, %v644_v31  ;;  %v650_v36 = vmul.bf16 %v648_v30, %v1109_v21 }
 0x204   : > { %v651_v33 = vmul.bf16 %v645_v32, %v1107_v19 }
 0x205   : > { %v655_v35 = vpop.permute.xlu1 %654 }
 0x206   : > { %v653_v37 = vpop.permute.xlu0 %652  ;;  %668 = vmatprep.subr.bf16.mxu1 %v651_v33  ;;  %v659_v38 = vsel %vm398_vm6, %v655_v35, 0 }
 0x207   : > { %669 = vmatpush1.bf16.msra.mxu1 %v650_v36  ;;  %v662_v40 = vmul.bf16 %v659_v38, %v1113_v26  ;;  %v656_v41 = vsel %vm398_vm6, %v653_v37, %v655_v35 }
 0x208   : > { %933 = vmatprep.subr.msk.bf16.mxu1 %vm333_vm0, %v600_v23  ;;  %v661_v44 = vmul.bf16 %v656_v41, %v1121_v34 }
 0x209   : > { %v610_v39 = vpop.permute.xlu1 %609 }
 0x20a   : > { %v612_v42 = vpop.permute.xlu0 %611  ;;  %v616_v46 = vsel %vm347_vm7, 0, %v610_v39 }
 0x20b   : > { %v613_v43 = vsel %vm347_vm7, %v610_v39, %v612_v42  ;;  %671 = vmatpush1.bf16.msra.mxu1 %v602_v24  ;;  %v618_v50 = vmul.bf16 %v616_v46, %v1109_v21 }
 0x20c   : > { %672 = vmatprep.subr.bf16.mxu1 %v662_v40  ;;  %v619_v47 = vmul.bf16 %v613_v43, %v1107_v19 }
 0x20d   : > { %v621_v45 = vpop.permute.xlu1 %620 }
 0x20e   : > { %v623_v48 = vpop.permute.xlu0 %622 }
 0x20f   : > { %673 = vmatpush1.bf16.msra.mxu1 %v661_v44  ;;  %v624_v55 = vsel %vm360_vm8, %v621_v45, %v623_v48 }
 0x210   : > { %712 = vmatprep.subr.bf16.mxu1 %v619_v47 }
 0x211   : > { %v630_v51 = vpop.permute.xlu1 %629 }
 0x212   : > { %v632_v53 = vpop.permute.xlu0 %631  ;;  %934 = vmatmul.mubr.msk.bf16.vlgmr.msra.gmra.mrb[0].mxu1 %vm409_vm10, %v932_v49  ;;  %v636_v57 = vsel %vm371_vm9, 0, %v630_v51 }
 0x213   : > { %v633_v54 = vsel %vm371_vm9, %v630_v51, %v632_v53  ;;  %713 = vmatpush1.bf16.msra.mxu1 %v618_v50  ;;  %744 = vmatprep.mubr.bf16.mxu1 %v992_v6  ;;  %v638_v61 = vmul.bf16 %v636_v57, %v1121_v34 }
 0x214   : > { %714 = vmatprep.subr.bf16.mxu1 %v624_v55  ;;  %v639_v58 = vmul.bf16 %v633_v54, %v1113_v26 }
 0x215   : > { %v756_v56 = vpop.permute.xlu1 %755 }
 0x216   : > { %v754_v59 = vpop.permute.xlu0 %753  ;;  %v760_v60 = vsel %vm502_vm11, %v756_v56, 0 }
 0x217   : > { %936 = vmatpush1.bf16.msk.msra.mxu1 %vm1140_vm12, %v621_v45  ;;  %v763_v63 = vmul.bf16 %v760_v60, %v1107_v19  ;;  %v757_v1 = vsel %vm502_vm11, %v754_v59, %v756_v56 }
 0x218   : > { %716 = vmatprep.subr.bf16.mxu1 %v639_v58  ;;  %v762_v5 = vmul.bf16 %v757_v1, %v1109_v21 }
 0x219   : > { %v765_v62 = vpop.permute.xlu1 %764 }
 0x21a   : > { %v767_v3 = vpop.permute.xlu0 %766 }
 0x21b   : > { %717 = vmatpush1.bf16.msra.mxu1 %v638_v61  ;;  %v768_v19 = vsel %vm515_vm14, %v765_v62, %v767_v3 }
 0x21c   : > { %789 = vmatprep.subr.bf16.mxu1 %v763_v63 }
 0x21d   : > { %v776_v7 = vpop.permute.xlu1 %775 }
 0x21e   : > { %937 = vmatmul.mubr.msk.bf16.vlgmr.msra.gmra.mrb[0].mxu1 %vm409_vm10, %v640_v4  ;;  %v780_v52 = vsel %vm526_vm13, %v776_v7, 0  ;;  %v774_v8 = vpop.permute.xlu0 %773 }
 0x21f   : > { %790 = vmatpush1.bf16.msra.mxu1 %v762_v5  ;;  %821 = vmatprep.mubr.bf16.mxu1 %v992_v6  ;;  %v783_v9 = vmul.bf16 %v780_v52, %v1113_v26  ;;  %v777_v10 = vsel %vm526_vm13, %v774_v8, %v776_v7 }
 0x220   : > { %939 = vmatprep.subr.msk.bf16.mxu1 %vm515_vm14, %v767_v3  ;;  %v782_v21 = vmul.bf16 %v777_v10, %v1121_v34 }
 0x223   : > { %792 = vmatpush1.bf16.msra.mxu1 %v768_v19 }
 0x224   : > { %793 = vmatprep.subr.bf16.mxu1 %v783_v9 }
 0x227   : > { %794 = vmatpush1.bf16.msra.mxu1 %v782_v21 }
 0x22a   : > { %940 = vmatmul.mubr.msk.bf16.vlgmr.msra.gmra.mrb[0].mxu1 %vm409_vm10, %v938_v11 }
 0x22e   : > { %v835_v6 = vpop.permute.xlu1 %834 }
 0x22f   : > { %v842_v15 = vpop.permute.xlu0 %841 }
 0x2fd   : > { %v823_v12 = vpop.f32.mrb[0].mxu1 }
 0x2fe   : > { %v837_v13 = vmul.f32 %v835_v6, %v823_v12  ;;  %v825_v14 = vpop.f32.mrb[1].mxu1 }
 0x2ff   : > { %v838_v26 = vmul.f32 %v835_v6, %v825_v14  ;;  %v827_v16 = vpop.f32.mrb[2].mxu1 }
 0x300   : > { %v844_v17 = vadd.f32 %v842_v15, %v837_v13  ;;  %v828_v18 = vpop.f32.mrb[3].mxu1 }
 0x301   : > { %v845_v20 = vadd.f32 %v842_v15, %v838_v26 }
 0x302   : > { %v846_v34 = vadd.f32 %v844_v17, %v1056_v0 }
 0x303   : > { %v847_v22 = vadd.f32 %v845_v20, %v1062_v2 }
 0x304   : > { %v848_v23 = vmax.f32 %v846_v34, 0.0 }
 0x305   : > { %v849_v24 = vmax.f32 %v847_v22, 0.0 }
 0x307   : > { %v852_v25 = vcombine.low %v848_v23, %v849_v24 }
 0x309   : > { %854 = vst [vmem:[%s278_s17] sm:$0xff] %v852_v25 }
 0x30a PF: > { %s17_s24 = sadd.s32 1, %s988_s24  }
 0x30b   : > { %p14_p4 = scmp.ge.s32.totalorder %s17_s24, 4  }
 0x30d   :  { %16 = sbr.rel (!%p14_p4) target bundleno = 1 (0x1), region = 82 }

// kernel: encoder_block_nchw.5
= control target key start
LH: loop header
LB: loop body
LE: loop exit
PB: predicated region body
PF: predicated region fallthrough
CT: control target
= control target key end

     0   :  { %s1410_s17 = smov 0   ;;  %s1634_s0 = inlined_call_operand.vmem [shape: bf16[2,64,64], index: 0, kind: input, shape index: {}]   ;;  %s1635_s1 = inlined_call_operand.vmem [shape: f32[2,8,64], index: 1, kind: input, shape index: {}]   ;;  %s1636_s2 = inlined_call_operand.vmem [shape: bf16[3,8,48], index: 2, kind: input, shape index: {}]   ;;  %s1637_s3 = inlined_call_operand.vmem [shape: f32[8,1], index: 3, kind: input, shape index: {}]   ;;  %s1638_s4 = inlined_call_operand.vmem [shape: f32[8,1], index: 4, kind: input, shape index: {}]   ;;  %s1639_s5 = inlined_call_operand.vmem [shape: bf16[3,8,48], index: 5, kind: input, shape index: {}]   ;;  %s1640_s6 = inlined_call_operand.vmem [shape: f32[8,1], index: 6, kind: input, shape index: {}]   ;;  %s1641_s7 = inlined_call_operand.vmem [shape: f32[8,1], index: 7, kind: input, shape index: {}]   ;;  %s1642_s8 = inlined_call_operand.vmem [shape: bf16[3,8,48], index: 8, kind: input, shape index: {}]   ;;  %s1643_s9 = inlined_call_operand.vmem [shape: f32[8,1], index: 9, kind: input, shape index: {}]   ;;  %s1644_s10 = inlined_call_operand.vmem [shape: f32[8,1], index: 10, kind: input, shape index: {}]   ;;  %s1645_s11 = inlined_call_operand.vmem [shape: f32[2,8,64], index: 11, kind: output, shape index: {}]  }
   0x1 LB: > { %s1118_s18 = sadd.s32 4294967295, %s1337_s17   ;;  %p1122_p0 = scmp.ge.s32.totalorder %s1337_s17, 1  ;;  %s1337_s17 = sphi %s1410_s17, %s21_s17  }
   0x2   : > { %p346_p1 = scmp.lt.s32.totalorder %s1337_s17, 3 }
   0x4   : > { %p347_p2 = pnand %p1122_p0, %p346_p1 }
   0x5   : > { %p389_p3 = scmp.lt.s32.totalorder (!%p347_p2), %s1118_s18, 1  ;;  %v1339_v0 = vmov (!%p347_p2), 0.0   ;;  %s1340_s23 = smov (!%p347_p2), 9   ;;  %vm1342_vm0 = vmmov (!%p347_p2), 0   ;;  %v433_v4 = vld [vmem:[%s1637_s3] sm:$0xff] (!%p347_p2)  ;;  %v1344_v6 = vmov (!%p347_p2), 0   ;;  %v403_v7 = vlaneseq (!%p347_p2) }
   0x6   : > { %350 = sbr.rel (%p347_p2) target bundleno = 1131 (0x46b), region = 64  ;;  %1205 = vmatprep.subr.bf16.mxu0 (!%p347_p2), %v1339_v0  ;;  %1195 = vmatprep.subr.bf16.mxu1 (!%p347_p2), %v1339_v0  ;;  %s1341_s24 = smov (!%p347_p2), 8   ;;  %v434_v5 = vld [vmem:[%s1638_s4] sm:$0xff] (!%p347_p2)  ;;  %vm442_vm2 = vcmask (!%p347_p2), 72704   ;;  %vm455_vm3 = vcmask (!%p347_p2), 64512   ;;  %vm472_vm4 = vcmask (!%p347_p2), 7168  }
   0x7   : > { %1211 = vmatprep.mubr.msk.bf16.mxu0 (!%p347_p2), %vm1342_vm0, %v1339_v0  ;;  %1201 = vmatprep.mubr.msk.bf16.mxu1 (!%p347_p2), %vm1342_vm0, %v1339_v0  ;;  %s1343_s25 = smov (!%p347_p2), 1   ;;  %v1451_v8 = vand.u32 (!%p347_p2), 127, %v403_v7  ;;  %vm1462_vm5 = vmneg (!%p347_p2), %vm455_vm3  ;;  %v464_v25 = vld [vmem:[%s1636_s2] sm:$0xf] (!%p347_p2)  ;;  %vm486_vm6 = vcmask (!%p347_p2), 392192   ;;  %vm647_vm7 = vcmask (!%p347_p2), 1043456  }
   0x8   : > { %1325 = vset.pattern.permute.xlu1 (!%p347_p2), %v1344_v6  ;;  %1326 = vset.pattern.permute.xlu0 (!%p347_p2), %v1344_v6  ;;  %v1133_v26 = vld [vmem:[%s1636_s2 + $0x4] sm:$0xf] (!%p347_p2)  ;;  %v1140_v27 = vld [vmem:[%s1636_s2 + $0x8] sm:$0xf] (!%p347_p2)  ;;  %s1345_s26 = smov (!%p347_p2), 7   ;;  %s1346_s27 = smov (!%p347_p2), 127  }
   0x9   : > { %v409_v9 = vand.u32 (!%p347_p2), 7, %v1451_v8  ;;  %s1347_s28 = smov (!%p347_p2), 120   ;;  %v642_v46 = vld [vmem:[%s1640_s6] sm:$0xff] (!%p347_p2)  ;;  %s1348_s12 = smov (!%p347_p2), 121   ;;  %vm679_vm9 = vcmask (!%p347_p2), 515072   ;;  %vm665_vm10 = vcmask (!%p347_p2), 56320  }
   0xa   : > { %s1349_s13 = smov (!%p347_p2), 119   ;;  %v643_v47 = vld [vmem:[%s1641_s7] sm:$0xff] (!%p347_p2)  ;;  %vm774_vm11 = vcmask (!%p347_p2), 465920   ;;  %vm781_vm12 = vcmask (!%p347_p2), 457728   ;;  %vm787_vm13 = vcmask (!%p347_p2), 449536   ;;  %vm1051_vm14 = vcmask (!%p347_p2), 523264  }
   0xb   : > { %vm417_vm1 = vcmp.ge.s32.totalorder (!%p347_p2), %v409_v9, 1  ;;  %vm421_vm8 = vcmp.lt.s32.totalorder (!%p347_p2), %v409_v9, 7  ;;  %v1142_v58 = vld [vmem:[%s1639_s5 + $0x4] sm:$0xf] (!%p347_p2) }
   0xc   : > { %v1127_v10 = vsel (!%p347_p2), %vm417_vm1, 1.0, %v1339_v0  ;;  %v1128_v51 = vsel (!%p347_p2), %vm421_vm8, 1.0, %v1339_v0 }
   0xd   : > { %s1649_s18 = smov (!%p389_p3, %s1118_s18), 1  ;;  %v1457_v11 = vpack.c.bf16 %v1127_v10, %v1127_v10  ;;  %v1533_v53 = vpack.c.bf16 %v1128_v51, %v1128_v51  ;;  %v1147_v10 = vld [vmem:[%s1639_s5 + $0x8] sm:$0xf] }
   0xe   : > { %s1158_s19 = sshll.u32 %s1649_s18, 5 }
   0xf   : > { %s1426_s22 = scalar_lea.vmem %s1634_s0, %s1158_s19  ;;  %s1125_s19 = sshll.u32 %s1649_s18, 3 }
  0x10   : > { %v1429_v1 = vld [vmem:[%s1426_s22 + $0x18] sm:$0xff]   ;;  %v1328_v2 = vld [vmem:[%s1426_s22 + $0x10] sm:$0xff]   ;;  %v1329_v3 = vld [vmem:[%s1426_s22 + $0x8] sm:$0xff]   ;;  %s401_s21 = scalar_lea.vmem %s1645_s11, %s1125_s19 }
  0x11   : > { %440 = vrot.lane.b32.xlu0 %v1429_v1, %s1340_s23  ;;  %459 = vrot.lane.b32.xlu1 %v1429_v1, %s1341_s24  ;;  %v1330_v22 = vld [vmem:[%s1426_s22] sm:$0xff]   ;;  %s397_s22 = scalar_lea.vmem %s1635_s1, %s1125_s19 }
  0x12   : > { %v639_v41 = vld [vmem:[%s397_s22] sm:$0xff] }
  0x15   : > { %453 = vrot.lane.b32.xlu0 %v1328_v2, %s1341_s24  ;;  %470 = vrot.lane.b32.xlu1 %v1329_v3, %s1343_s25 }
  0x19   : > { %573 = vrot.lane.b32.xlu0 %v1429_v1, %s1343_s25  ;;  %629 = vperm.xlu1 %1325, %v433_v4  }
  0x1d   : > { %635 = vperm.xlu0 %1326, %v434_v5  }
  0x83   : > { %v441_v12 = vpop.permute.xlu0 %440  ;;  %v460_v13 = vpop.permute.xlu1 %459 }
  0x84   : > { %v445_v14 = vsel %vm442_vm2, 0, %v441_v12 }
  0x85   : > { %v447_v15 = vmul.bf16 %v445_v14, %v1457_v11 }
  0x87   : > { %1206 = vmatpush3.bf16.msra.mxu0 %v447_v15  ;;  %v454_v16 = vpop.permute.xlu0 %453  ;;  %v471_v17 = vpop.permute.xlu1 %470 }
  0x88   : > { %1207 = vmatprep.subr.bf16.mxu0 %v1339_v0  ;;  %v474_v19 = vsel %vm472_vm4, 0, %v471_v17 }
  0x89   : > { %v476_v20 = vmul.bf16 %v474_v19, %v1457_v11 }
  0x8b   : > { %1208 = vmatpush3.bf16.msk.msra.mxu0 %vm1462_vm5, %v454_v16  ;;  %v574_v21 = vpop.permute.xlu0 %573  ;;  %1196 = vmatpush3.bf16.msra.mxu1 %v476_v20 }
  0x8c   : > { %1209 = vmatprep.subr.bf16.mxu0 %v1339_v0  ;;  %v576_v23 = vsel %vm472_vm4, 0, %v574_v21  ;;  %1197 = vmatprep.subr.bf16.mxu1 %v1339_v0 }
  0x8d   : > { %v578_v24 = vmul.bf16 %v576_v23, %v1457_v11 }
  0x8f   : > { %1210 = vmatpush3.bf16.msk.msra.mxu0 %vm1462_vm5, %v460_v13  ;;  %1198 = vmatpush3.bf16.msra.mxu1 %v1330_v22 }
  0x90   : > { %1215 = vmatprep.subr.bf16.mxu0 %v1339_v0  ;;  %1199 = vmatprep.subr.bf16.mxu1 %v1339_v0 }
  0x92   : > { %1212 = vmatmul.mubr.msk.bf16.vlgmr.msra.gmra.mrb[0].mxu0 %vm486_vm6, %v464_v25  ;;  %v644_v25 = vld [vmem:[%s1643_s9] sm:$0xff] }
  0x93   : > { %1216 = vmatpush3.bf16.msra.mxu0 %v578_v24  ;;  %1200 = vmatpush3.bf16.msra.mxu1 %v1329_v3  ;;  %v670_v3 = vld [vmem:[%s1639_s5] sm:$0xf] }
  0x94   : > { %1217 = vmatprep.subr.bf16.mxu0 %v1339_v0  ;;  %1221 = vmatprep.mubr.msk.bf16.mxu0 %vm1342_vm0, %v1339_v0  ;;  %v645_v24 = vld [vmem:[%s1644_s10] sm:$0xff] }
  0x95   : > { %1225 = vmatprep.subr.bf16.mxu1 %v1339_v0 }
  0x96   : > { %1202 = vmatmul.mubr.msk.bf16.vlgmr.msra.gmra.mrb[0].mxu1 %vm486_vm6, %v1133_v26 }
  0x97   : > { %1218 = vmatpush3.bf16.msra.mxu0 %v1328_v2  ;;  %1231 = vmatprep.mubr.msk.bf16.mxu1 %vm1342_vm0, %v1339_v0 }
  0x98   : > { %1219 = vmatprep.subr.bf16.mxu0 %v1339_v0  ;;  %v630_v33 = vpop.permute.xlu1 %629 }
  0x9b   : > { %1220 = vmatpush3.bf16.msra.mxu0 %v1429_v1 }
  0x9c   : > { %1255 = vmatprep.subr.bf16.mxu0 %v1339_v0  ;;  %v636_v37 = vpop.permute.xlu0 %635 }
  0x9e   : > { %1222 = vmatmul.mubr.msk.bf16.vlgmr.msra.gmra.mrb[0].mxu0 %vm486_vm6, %v1140_v27 }
  0x9f   : > { %1261 = vmatprep.mubr.msk.bf16.mxu0 %vm1342_vm0, %v1339_v0 }
 0x169   : > { %v524_v28 = vpop.f32.mrb[0].mxu1 }
 0x16a   : > { %v1203_v29 = vpop.f32.mrb[1].mxu1 }
 0x16b   : > { %v527_v30 = vpop.f32.mrb[2].mxu1 }
 0x16c   : > { %v1204_v31 = vpop.f32.mrb[3].mxu1 }
 0x171   : > { %v620_v32 = vpop.f32.mrb[0].mxu0 }
 0x172   : > { %v1285_v34 = vadd.f32 %v620_v32, %v524_v28  ;;  %v1223_v35 = vpop.f32.mrb[1].mxu0 }
 0x173   : > { %v623_v36 = vpop.f32.mrb[2].mxu0 }
 0x174   : > { %v632_v38 = vmul.f32 %v1285_v34, %v630_v33  ;;  %v1224_v39 = vpop.f32.mrb[3].mxu0  ;;  %v1149_v34 = vld [vmem:[%s1642_s8 + $0x4] sm:$0xf] }
 0x176   : > { %v638_v40 = vadd.f32 %v636_v37, %v632_v38 }
 0x178   : > { %v640_v42 = vmax.f32 %v638_v40, 0.0 }
 0x17a   : > { %v1508_v43 = vadd.f32 %v640_v42, %v639_v41  ;;  %v873_v42 = vld [vmem:[%s1642_s8] sm:$0xf] }
 0x17c   : > { %v646_v44 = vpack.c.bf16 %v1508_v43, %v1508_v43 }
 0x17e   : > { %v649_v45 = vsel %vm647_vm7, %v646_v44, 0 }
 0x17f   : > { %652 = vrot.lane.b32.xlu0 %v649_v45, %s1340_s23  ;;  %671 = vrot.lane.b32.xlu1 %v649_v45, %s1343_s25 }
 0x183   : > { %663 = vrot.lane.b32.xlu0 %v649_v45, %s1345_s26  ;;  %677 = vrot.lane.b32.xlu1 %v649_v45, %s1346_s27 }
 0x187   : > { %779 = vrot.lane.b32.xlu0 %v649_v45, %s1347_s28  ;;  %658 = vrot.lane.b32.xlu1 %v649_v45, %s1341_s24 }
 0x18b   : > { %840 = vperm.xlu0 %1326, %v642_v46   ;;  %772 = vrot.lane.b32.xlu1 %v649_v45, %s1348_s12 }
 0x18f   : > { %785 = vrot.lane.b32.xlu1 %v649_v45, %s1349_s13 }
 0x193   : > { %846 = vperm.xlu1 %1325, %v643_v47  }
 0x1f1   : > { %v672_v48 = vpop.permute.xlu1 %671  ;;  %v653_v55 = vpop.permute.xlu0 %652 }
 0x1f2   : > { %v674_v49 = vsel %vm472_vm4, 0, %v672_v48  ;;  %v655_v57 = vsel %vm442_vm2, 0, %v653_v55  ;;  %v1154_v48 = vld [vmem:[%s1642_s8 + $0x8] sm:$0xf] }
 0x1f3   : > { %v676_v50 = vmul.bf16 %v674_v49, %v1457_v11  ;;  %v657_v59 = vmul.bf16 %v655_v57, %v1457_v11 }
 0x1f5   : > { %1226 = vmatpush3.bf16.msra.mxu1 %v676_v50  ;;  %v678_v52 = vpop.permute.xlu1 %677  ;;  %v664_v61 = vpop.permute.xlu0 %663 }
 0x1f6   : > { %1227 = vmatprep.subr.bf16.mxu1 %v1339_v0  ;;  %v681_v54 = vsel %vm679_vm9, %v678_v52, 0  ;;  %v667_v62 = vsel %vm665_vm10, 0, %v664_v61 }
 0x1f7   : > { %v683_v56 = vmul.bf16 %v681_v54, %v1533_v53  ;;  %v669_v1 = vmul.bf16 %v667_v62, %v1533_v53 }
 0x1f9   : > { %1228 = vmatpush3.bf16.msra.mxu1 %v649_v45  ;;  %v659_v60 = vpop.permute.xlu1 %658  ;;  %v780_v5 = vpop.permute.xlu0 %779 }
 0x1fa   : > { %1229 = vmatprep.subr.bf16.mxu1 %v1339_v0  ;;  %v783_v7 = vsel %vm781_vm12, %v780_v5, 0 }
 0x1fd   : > { %1230 = vmatpush3.bf16.msra.mxu1 %v683_v56  ;;  %v773_v63 = vpop.permute.xlu1 %772 }
 0x1fe   : > { %1235 = vmatprep.subr.bf16.mxu1 %v1339_v0  ;;  %v776_v2 = vsel %vm774_vm11, %v773_v63, 0 }
 0x1ff   : > { %v778_v4 = vmul.bf16 %v776_v2, %v1457_v11 }
 0x200   : > { %1232 = vmatmul.mubr.msk.bf16.vlgmr.msra.gmra.mrb[4].mxu1 %vm486_vm6, %v1142_v58 }
 0x201   : > { %1236 = vmatpush3.bf16.msra.mxu1 %v657_v59  ;;  %1241 = vmatprep.mubr.msk.bf16.mxu1 %vm1342_vm0, %v1339_v0  ;;  %v786_v6 = vpop.permute.xlu1 %785 }
 0x202   : > { %1237 = vmatprep.subr.bf16.mxu1 %v1339_v0  ;;  %v789_v8 = vsel %vm787_vm13, %v786_v6, 0 }
 0x203   : > { %v791_v9 = vmul.bf16 %v789_v8, %v1533_v53 }
 0x205   : > { %1238 = vmatpush3.bf16.msk.msra.mxu1 %vm1462_vm5, %v659_v60 }
 0x206   : > { %1239 = vmatprep.subr.bf16.mxu1 %v1339_v0 }
 0x209   : > { %1240 = vmatpush3.bf16.msra.mxu1 %v669_v1 }
 0x20a   : > { %1245 = vmatprep.subr.bf16.mxu1 %v1339_v0  ;;  %v841_v12 = vpop.permute.xlu0 %840 }
 0x20c   : > { %1242 = vmatmul.mubr.msk.bf16.vlgmr.msra.gmra.mrb[4].mxu1 %vm486_vm6, %v670_v3 }
 0x20d   : > { %1246 = vmatpush3.bf16.msra.mxu1 %v778_v4  ;;  %1251 = vmatprep.mubr.msk.bf16.mxu1 %vm1342_vm0, %v1339_v0 }
 0x20e   : > { %1247 = vmatprep.subr.bf16.mxu1 %v1339_v0 }
 0x211   : > { %1248 = vmatpush3.bf16.msra.mxu1 %v783_v7 }
 0x212   : > { %1249 = vmatprep.subr.bf16.mxu1 %v1339_v0  ;;  %v847_v16 = vpop.permute.xlu1 %846 }
 0x215   : > { %1250 = vmatpush3.bf16.msra.mxu1 %v791_v9 }
 0x218   : > { %1252 = vmatmul.mubr.msk.bf16.vlgmr.msra.gmra.mrb[4].mxu1 %vm486_vm6, %v1147_v10 }
 0x2eb   : > { %v831_v13 = vpop.f32.mrb[4].mxu1 }
 0x2ec   : > { %v843_v14 = vmul.f32 %v841_v12, %v831_v13  ;;  %v1253_v15 = vpop.f32.mrb[5].mxu1 }
 0x2ed   : > { %v834_v17 = vpop.f32.mrb[6].mxu1 }
 0x2ee   : > { %v849_v19 = vadd.f32 %v847_v16, %v843_v14  ;;  %v1254_v20 = vpop.f32.mrb[7].mxu1 }
 0x2f0   : > { %v850_v21 = vmax.f32 %v849_v19, 0.0 }
 0x2f2   : > { %v851_v22 = vpack.c.bf16 %v850_v21, %v850_v21 }
 0x2f4   : > { %v853_v23 = vsel %vm647_vm7, %v851_v22, 0 }
 0x2f5   : > { %880 = vrot.lane.b32.xlu1 %v853_v23, %s1346_s27  ;;  %874 = vrot.lane.b32.xlu0 %v853_v23, %s1343_s25 }
 0x2f9   : > { %862 = vrot.lane.b32.xlu1 %v853_v23, %s1341_s24  ;;  %856 = vrot.lane.b32.xlu0 %v853_v23, %s1340_s23 }
 0x2fd   : > { %974 = vrot.lane.b32.xlu1 %v853_v23, %s1348_s12  ;;  %867 = vrot.lane.b32.xlu0 %v853_v23, %s1345_s26 }
 0x301   : > { %985 = vrot.lane.b32.xlu1 %v853_v23, %s1349_s13  ;;  %980 = vrot.lane.b32.xlu0 %v853_v23, %s1347_s28 }
 0x305   : > { %1045 = vperm.xlu1 %1325, %v645_v24   ;;  %1039 = vperm.xlu0 %1326, %v644_v25  }
 0x367   : > { %v875_v26 = vpop.permute.xlu0 %874  ;;  %v881_v29 = vpop.permute.xlu1 %880 }
 0x368   : > { %v877_v27 = vsel %vm472_vm4, 0, %v875_v26  ;;  %v883_v30 = vsel %vm679_vm9, %v881_v29, 0 }
 0x369   : > { %v879_v28 = vmul.bf16 %v877_v27, %v1457_v11  ;;  %v885_v32 = vmul.bf16 %v883_v30, %v1533_v53 }
 0x36b   : > { %1256 = vmatpush3.bf16.msra.mxu0 %v879_v28  ;;  %v857_v31 = vpop.permute.xlu0 %856  ;;  %v863_v35 = vpop.permute.xlu1 %862 }
 0x36c   : > { %1257 = vmatprep.subr.bf16.mxu0 %v1339_v0  ;;  %v859_v33 = vsel %vm442_vm2, 0, %v857_v31 }
 0x36d   : > { %v861_v36 = vmul.bf16 %v859_v33, %v1457_v11 }
 0x36f   : > { %1258 = vmatpush3.bf16.msra.mxu0 %v853_v23  ;;  %v868_v37 = vpop.permute.xlu0 %867  ;;  %v975_v39 = vpop.permute.xlu1 %974 }
 0x370   : > { %1259 = vmatprep.subr.bf16.mxu0 %v1339_v0  ;;  %v870_v38 = vsel %vm665_vm10, 0, %v868_v37  ;;  %v977_v41 = vsel %vm774_vm11, %v975_v39, 0 }
 0x371   : > { %v872_v40 = vmul.bf16 %v870_v38, %v1533_v53  ;;  %v979_v44 = vmul.bf16 %v977_v41, %v1457_v11 }
 0x373   : > { %1260 = vmatpush3.bf16.msra.mxu0 %v885_v32  ;;  %v986_v45 = vpop.permute.xlu1 %985  ;;  %v981_v18 = vpop.permute.xlu0 %980 }
 0x374   : > { %1265 = vmatprep.subr.bf16.mxu0 %v1339_v0  ;;  %v988_v46 = vsel %vm787_vm13, %v986_v45, 0  ;;  %v983_v47 = vsel %vm781_vm12, %v981_v18, 0 }
 0x375   : > { %v990_v11 = vmul.bf16 %v988_v46, %v1533_v53 }
 0x376   : > { %1262 = vmatmul.mubr.msk.bf16.vlgmr.msra.gmra.mrb[4].mxu0 %vm486_vm6, %v1149_v34 }
 0x377   : > { %1266 = vmatpush3.bf16.msra.mxu0 %v861_v36  ;;  %1271 = vmatprep.mubr.msk.bf16.mxu0 %vm1342_vm0, %v1339_v0 }
 0x378   : > { %1267 = vmatprep.subr.bf16.mxu0 %v1339_v0 }
 0x37b   : > { %1268 = vmatpush3.bf16.msk.msra.mxu0 %vm1462_vm5, %v863_v35 }
 0x37c   : > { %1269 = vmatprep.subr.bf16.mxu0 %v1339_v0 }
 0x37f   : > { %1270 = vmatpush3.bf16.msra.mxu0 %v872_v40 }
 0x380   : > { %1275 = vmatprep.subr.bf16.mxu0 %v1339_v0 }
 0x382   : > { %1272 = vmatmul.mubr.msk.bf16.vlgmr.msra.gmra.mrb[4].mxu0 %vm486_vm6, %v873_v42 }
 0x383   : > { %1276 = vmatpush3.bf16.msra.mxu0 %v979_v44  ;;  %1281 = vmatprep.mubr.msk.bf16.mxu0 %vm1342_vm0, %v1339_v0 }
 0x384   : > { %1277 = vmatprep.subr.bf16.mxu0 %v1339_v0  ;;  %v1040_v49 = vpop.permute.xlu0 %1039  ;;  %v1046_v54 = vpop.permute.xlu1 %1045 }
 0x387   : > { %1278 = vmatpush3.bf16.msra.mxu0 %v983_v47 }
 0x388   : > { %1279 = vmatprep.subr.bf16.mxu0 %v1339_v0 }
 0x38b   : > { %1280 = vmatpush3.bf16.msra.mxu0 %v990_v11 }
 0x38e   : > { %1282 = vmatmul.mubr.msk.bf16.vlgmr.msra.gmra.mrb[4].mxu0 %vm486_vm6, %v1154_v48 }
 0x461   : > { %v1030_v50 = vpop.f32.mrb[4].mxu0 }
 0x462   : > { %v1042_v51 = vmul.f32 %v1040_v49, %v1030_v50  ;;  %v1283_v52 = vpop.f32.mrb[5].mxu0 }
 0x463   : > { %v1033_v55 = vpop.f32.mrb[6].mxu0 }
 0x464   : > { %v1048_v56 = vadd.f32 %v1046_v54, %v1042_v51  ;;  %v1284_v57 = vpop.f32.mrb[7].mxu0 }
 0x466   : > { %v1049_v58 = vadd.f32 %v1048_v56, %v1508_v43 }
 0x468   : > { %v1050_v0 = vmax.f32 %v1049_v58, 0.0 }
 0x46a   : > { %1052 = vst.msk [vmem:[%s401_s21] sm:$0xff] %vm1051_vm14, %v1050_v0 }
 0x46b PF: > { %s21_s17 = sadd.s32 1, %s1337_s17  }
 0x46c   : > { %p18_p4 = scmp.ge.s32.totalorder %s21_s17, 4  }
 0x46e   :  { %20 = sbr.rel (!%p18_p4) target bundleno = 1 (0x1), region = 103 }

// kernel: encoder_block_nchw.7
= control target key start
LH: loop header
LB: loop body
LE: loop exit
PB: predicated region body
PF: predicated region fallthrough
CT: control target
= control target key end

     0   :  { %s773_s15 = smov 0   ;;  %s880_s0 = inlined_call_operand.vmem [shape: bf16[2,64,4], index: 0, kind: input, shape index: {}]   ;;  %s881_s1 = inlined_call_operand.vmem [shape: bf16[3,32,48], index: 1, kind: input, shape index: {}]   ;;  %s882_s2 = inlined_call_operand.vmem [shape: f32[32,1], index: 2, kind: input, shape index: {}]   ;;  %s883_s3 = inlined_call_operand.vmem [shape: f32[32,1], index: 3, kind: input, shape index: {}]   ;;  %s884_s4 = inlined_call_operand.vmem [shape: f32[2,32,4], index: 4, kind: output, shape index: {}]  }
   0x1 LB: > { %s615_s16 = sadd.s32 4294967295, %s741_s15   ;;  %p619_p0 = scmp.ge.s32.totalorder %s741_s15, 1  ;;  %s741_s15 = sphi %s773_s15, %s14_s15  }
   0x2   : > { %p162_p1 = scmp.lt.s32.totalorder %s741_s15, 3 }
   0x4   : > { %p163_p2 = pnand %p619_p0, %p162_p1 }
   0x5   : > { %p188_p3 = scmp.lt.s32.totalorder (!%p163_p2), %s615_s16, 1  ;;  %s743_s21 = smov (!%p163_p2), 3   ;;  %vm300_vm0 = vcmask (!%p163_p2), 392192   ;;  %v728_v3 = vld [vmem:[%s881_s1] sm:$0xff] (!%p163_p2)   ;;  %v731_v4 = vld [vmem:[%s881_s1 + $0x10] sm:$0xff] (!%p163_p2)   ;;  %v746_v6 = vmov (!%p163_p2), 0   ;;  %v199_v14 = vlaneseq (!%p163_p2) }
   0x6   : > { %166 = sbr.rel (%p163_p2) target bundleno = 383 (0x17f), region = 36  ;;  %s744_s22 = smov (!%p163_p2), 2   ;;  %688 = vmatprep.mubr.msk.bf16.mxu0 (!%p163_p2), %vm300_vm0, %v728_v3  ;;  %678 = vmatprep.mubr.msk.bf16.mxu1 (!%p163_p2), %vm300_vm0, %v731_v4  ;;  %v225_v5 = vld [vmem:[%s882_s2] sm:$0xff] (!%p163_p2)  ;;  %v226_v7 = vld [vmem:[%s882_s2 + $0x8] sm:$0xff] (!%p163_p2)  ;;  %v227_v8 = vld [vmem:[%s882_s2 + $0x10] sm:$0xff] (!%p163_p2)  ;;  %v747_v17 = vmov (!%p163_p2), 0.0  }
   0x7   : > { %s745_s25 = smov (!%p163_p2), 1   ;;  %723 = vset.pattern.permute.xlu1 (!%p163_p2), %v746_v6  ;;  %724 = vset.pattern.permute.xlu0 (!%p163_p2), %v746_v6  ;;  %v229_v9 = vld [vmem:[%s883_s3] sm:$0xff] (!%p163_p2)  ;;  %v228_v10 = vld [vmem:[%s882_s2 + $0x18] sm:$0xff] (!%p163_p2)  ;;  %v231_v11 = vld [vmem:[%s883_s3 + $0x10] sm:$0xff] (!%p163_p2)  ;;  %v200_v15 = vand.u32 (!%p163_p2), 127, %v199_v14  ;;  %vm240_vm2 = vcmask (!%p163_p2), 23552  }
   0x8   : > { %v230_v12 = vld [vmem:[%s883_s3 + $0x8] sm:$0xff] (!%p163_p2)  ;;  %v232_v13 = vld [vmem:[%s883_s3 + $0x18] sm:$0xff] (!%p163_p2)  ;;  %vm253_vm3 = vcmask (!%p163_p2), 15360   ;;  %vm273_vm4 = vcmask (!%p163_p2), 7168   ;;  %v733_v34 = vld [vmem:[%s881_s1 + $0x20] sm:$0xff] (!%p163_p2)   ;;  %vm555_vm6 = vcmask (!%p163_p2), 31744  }
   0x9   : > { %v205_v16 = vand.u32 (!%p163_p2), 1, %v200_v15  ;;  %vm837_vm5 = vmneg (!%p163_p2), %vm253_vm3  ;;  %v729_v33 = vld [vmem:[%s881_s1 + $0x8] sm:$0xff] (!%p163_p2)   ;;  %v732_v35 = vld [vmem:[%s881_s1 + $0x18] sm:$0xff] (!%p163_p2)  }
   0xa   : > { %v734_v36 = vld [vmem:[%s881_s1 + $0x28] sm:$0xff] (!%p163_p2)  }
   0xb   : > { %vm213_vm1 = vcmp.ge.s32.totalorder (!%p163_p2), %v205_v16, 1 }
   0xc   : > { %v624_v18 = vsel (!%p163_p2), %vm213_vm1, 1.0, %v747_v17 }
   0xd   : > { %s888_s16 = smov (!%p188_p3, %s615_s16), 1  ;;  %v216_v19 = vpack.c.bf16 %v624_v18, %v624_v18 }
   0xe   : > { %s655_s17 = sshll.u32 %s888_s16, 5 }
   0xf   : > { %s789_s20 = scalar_lea.vmem %s880_s0, %s655_s17  ;;  %s197_s5 = scalar_lea.vmem %s884_s4, %s655_s17 }
  0x10   : > { %v792_v0 = vld [vmem:[%s789_s20 + $0x18] sm:$0xff]   ;;  %v795_v1 = vld [vmem:[%s789_s20 + $0x10] sm:$0xff]   ;;  %v800_v2 = vld [vmem:[%s789_s20 + $0x8] sm:$0xff]  }
  0x11   : > { %238 = vrot.lane.b32.xlu0 %v792_v0, %s743_s21  ;;  %257 = vrot.lane.b32.xlu1 %v792_v0, %s744_s22  ;;  %v730_v29 = vld [vmem:[%s789_s20] sm:$0xff]  }
  0x15   : > { %251 = vrot.lane.b32.xlu0 %v795_v1, %s744_s22  ;;  %271 = vrot.lane.b32.xlu1 %v800_v2, %s745_s25 }
  0x19   : > { %421 = vrot.lane.b32.xlu0 %v792_v0, %s745_s25  ;;  %505 = vperm.xlu1 %723, %v225_v5  }
  0x1d   : > { %510 = vperm.xlu0 %724, %v226_v7   ;;  %515 = vperm.xlu1 %723, %v227_v8  }
  0x21   : > { %529 = vperm.xlu0 %724, %v229_v9   ;;  %520 = vperm.xlu1 %723, %v228_v10  }
  0x25   : > { %539 = vperm.xlu0 %724, %v231_v11   ;;  %534 = vperm.xlu1 %723, %v230_v12  }
  0x29   : > { %544 = vperm.xlu1 %723, %v232_v13  }
  0x83   : > { %v239_v20 = vpop.permute.xlu0 %238  ;;  %v258_v21 = vpop.permute.xlu1 %257 }
  0x84   : > { %v243_v22 = vsel %vm240_vm2, 0, %v239_v20 }
  0x85   : > { %v245_v23 = vmul.bf16 %v243_v22, %v216_v19 }
  0x87   : > { %682 = vmatprep.subr.bf16.mxu0 %v245_v23  ;;  %v252_v25 = vpop.permute.xlu0 %251  ;;  %v272_v26 = vpop.permute.xlu1 %271 }
  0x88   : > { %683 = vmatpush3.bf16.msra.mxu0 %v245_v23  ;;  %v275_v27 = vsel %vm273_vm4, 0, %v272_v26 }
  0x89   : > { %684 = vmatprep.subr.msk.bf16.mxu0 %vm837_vm5, %v252_v25  ;;  %v277_v28 = vmul.bf16 %v275_v27, %v216_v19 }
  0x8b   : > { %v422_v30 = vpop.permute.xlu0 %421  ;;  %672 = vmatprep.subr.bf16.mxu1 %v277_v28 }
  0x8c   : > { %685 = vmatpush3.bf16.msk.msra.mxu0 %vm837_vm5, %v252_v25  ;;  %v424_v31 = vsel %vm273_vm4, 0, %v422_v30  ;;  %673 = vmatpush3.bf16.msra.mxu1 %v277_v28 }
  0x8d   : > { %686 = vmatprep.subr.msk.bf16.mxu0 %vm837_vm5, %v258_v21  ;;  %v426_v32 = vmul.bf16 %v424_v31, %v216_v19  ;;  %674 = vmatprep.subr.bf16.mxu1 %v730_v29 }
  0x90   : > { %687 = vmatpush3.bf16.msk.msra.mxu0 %vm837_vm5, %v258_v21  ;;  %675 = vmatpush3.bf16.msra.mxu1 %v730_v29 }
  0x91   : > { %692 = vmatprep.subr.bf16.mxu0 %v426_v32  ;;  %676 = vmatprep.subr.bf16.mxu1 %v800_v2 }
  0x93   : > { %689 = vmatmul.mubr.msk.bf16.vlgmr.msra.gmra.mrb[0].mxu0 %vm300_vm0, %v729_v33 }
  0x94   : > { %693 = vmatpush3.bf16.msra.mxu0 %v426_v32  ;;  %677 = vmatpush3.bf16.msra.mxu1 %v800_v2 }
  0x95   : > { %694 = vmatprep.subr.bf16.mxu0 %v795_v1  ;;  %698 = vmatprep.mubr.msk.bf16.mxu0 %vm300_vm0, %v733_v34 }
  0x97   : > { %679 = vmatmul.mubr.msk.bf16.vlgmr.msra.gmra.mrb[0].mxu1 %vm300_vm0, %v732_v35 }
  0x98   : > { %695 = vmatpush3.bf16.msra.mxu0 %v795_v1  ;;  %v506_v37 = vpop.permute.xlu1 %505 }
  0x99   : > { %696 = vmatprep.subr.bf16.mxu0 %v792_v0 }
  0x9c   : > { %697 = vmatpush3.bf16.msra.mxu0 %v792_v0  ;;  %v516_v38 = vpop.permute.xlu1 %515  ;;  %v511_v39 = vpop.permute.xlu0 %510 }
  0x9f   : > { %699 = vmatmul.mubr.msk.bf16.vlgmr.msra.gmra.mrb[0].mxu0 %vm300_vm0, %v734_v36 }
  0xa0   : > { %v521_v42 = vpop.permute.xlu1 %520  ;;  %v530_v45 = vpop.permute.xlu0 %529 }
  0xa4   : > { %v535_v46 = vpop.permute.xlu1 %534  ;;  %v540_v55 = vpop.permute.xlu0 %539 }
  0xa8   : > { %v545_v60 = vpop.permute.xlu1 %544 }
 0x16a   : > { %v680_v40 = vpop.f32.mrb[0].mxu1 }
 0x16b   : > { %v341_v41 = vpop.f32.mrb[1].mxu1 }
 0x16c   : > { %v681_v43 = vpop.f32.mrb[2].mxu1 }
 0x16d   : > { %v344_v44 = vpop.f32.mrb[3].mxu1 }
 0x172   : > { %v700_v47 = vpop.f32.mrb[0].mxu0 }
 0x173   : > { %v702_v48 = vadd.f32 %v700_v47, %v680_v40  ;;  %v484_v49 = vpop.f32.mrb[1].mxu0 }
 0x174   : > { %v703_v50 = vadd.f32 %v484_v49, %v341_v41  ;;  %v701_v51 = vpop.f32.mrb[2].mxu0 }
 0x175   : > { %v525_v52 = vmul.f32 %v702_v48, %v516_v38  ;;  %v704_v53 = vadd.f32 %v701_v51, %v681_v43  ;;  %v487_v54 = vpop.f32.mrb[3].mxu0 }
 0x176   : > { %v523_v56 = vmul.f32 %v703_v50, %v506_v37  ;;  %v705_v57 = vadd.f32 %v487_v54, %v344_v44 }
 0x177   : > { %v549_v58 = vadd.f32 %v540_v55, %v525_v52  ;;  %v526_v59 = vmul.f32 %v704_v53, %v521_v42 }
 0x178   : > { %v547_v61 = vadd.f32 %v530_v45, %v523_v56  ;;  %v524_v62 = vmul.f32 %v705_v57, %v511_v39 }
 0x179   : > { %v553_v63 = vmax.f32 %v549_v58, 0.0  ;;  %v550_v0 = vadd.f32 %v545_v60, %v526_v59 }
 0x17a   : > { %v551_v1 = vmax.f32 %v547_v61, 0.0  ;;  %v548_v2 = vadd.f32 %v535_v46, %v524_v62 }
 0x17b   : > { %558 = vst.msk [vmem:[%s197_s5 + $0x10] sm:$0xff] %vm555_vm6, %v553_v63  ;;  %v554_v3 = vmax.f32 %v550_v0, 0.0 }
 0x17c   : > { %556 = vst.msk [vmem:[%s197_s5] sm:$0xff] %vm555_vm6, %v551_v1  ;;  %v552_v4 = vmax.f32 %v548_v2, 0.0 }
 0x17d   : > { %559 = vst.msk [vmem:[%s197_s5 + $0x18] sm:$0xff] %vm555_vm6, %v554_v3 }
 0x17e   : > { %557 = vst.msk [vmem:[%s197_s5 + $0x8] sm:$0xff] %vm555_vm6, %v552_v4 }
 0x17f PF: > { %s14_s15 = sadd.s32 1, %s741_s15  }
 0x180   : > { %p11_p4 = scmp.ge.s32.totalorder %s14_s15, 4  }
 0x182   :  { %13 = sbr.rel (!%p11_p4) target bundleno = 1 (0x1), region = 68 }

// kernel: encoder_block_nchw.6
= control target key start
LH: loop header
LB: loop body
LE: loop exit
PB: predicated region body
PF: predicated region fallthrough
CT: control target
= control target key end

     0   :  { %s1554_s17 = smov 0   ;;  %s1801_s0 = inlined_call_operand.vmem [shape: bf16[2,64,16], index: 0, kind: input, shape index: {}]   ;;  %s1802_s1 = inlined_call_operand.vmem [shape: f32[2,16,16], index: 1, kind: input, shape index: {}]   ;;  %s1803_s2 = inlined_call_operand.vmem [shape: bf16[3,16,48], index: 2, kind: input, shape index: {}]   ;;  %s1804_s3 = inlined_call_operand.vmem [shape: f32[16,1], index: 3, kind: input, shape index: {}]   ;;  %s1805_s4 = inlined_call_operand.vmem [shape: f32[16,1], index: 4, kind: input, shape index: {}]   ;;  %s1806_s5 = inlined_call_operand.vmem [shape: bf16[3,16,48], index: 5, kind: input, shape index: {}]   ;;  %s1807_s6 = inlined_call_operand.vmem [shape: f32[16,1], index: 6, kind: input, shape index: {}]   ;;  %s1808_s7 = inlined_call_operand.vmem [shape: f32[16,1], index: 7, kind: input, shape index: {}]   ;;  %s1809_s8 = inlined_call_operand.vmem [shape: bf16[3,16,48], index: 8, kind: input, shape index: {}]   ;;  %s1810_s9 = inlined_call_operand.vmem [shape: f32[16,1], index: 9, kind: input, shape index: {}]   ;;  %s1811_s10 = inlined_call_operand.vmem [shape: f32[16,1], index: 10, kind: input, shape index: {}]   ;;  %s1812_s11 = inlined_call_operand.vmem [shape: f32[2,16,16], index: 11, kind: output, shape index: {}]  }
   0x1 LB: > { %s1233_s18 = sadd.s32 4294967295, %s1481_s17   ;;  %p1237_p0 = scmp.ge.s32.totalorder %s1481_s17, 1  ;;  %s1481_s17 = sphi %s1554_s17, %s21_s17  }
   0x2   : > { %p347_p1 = scmp.lt.s32.totalorder %s1481_s17, 3 }
   0x4   : > { %p348_p2 = pnand %p1237_p0, %p347_p1 }
   0x5   : > { %p392_p3 = scmp.lt.s32.totalorder (!%p348_p2), %s1233_s18, 1  ;;  %v1483_v0 = vmov (!%p348_p2), 0.0   ;;  %s1484_s23 = smov (!%p348_p2), 5   ;;  %vm1486_vm0 = vmmov (!%p348_p2), 0   ;;  %v438_v4 = vld [vmem:[%s1804_s3] sm:$0xff] (!%p348_p2)  ;;  %v1488_v5 = vmov (!%p348_p2), 0   ;;  %v408_v9 = vlaneseq (!%p348_p2) }
   0x6   : > { %351 = sbr.rel (%p348_p2) target bundleno = 1135 (0x46f), region = 64  ;;  %1339 = vmatprep.subr.bf16.mxu0 (!%p348_p2), %v1483_v0  ;;  %1329 = vmatprep.subr.bf16.mxu1 (!%p348_p2), %v1483_v0  ;;  %s1485_s24 = smov (!%p348_p2), 4   ;;  %v439_v6 = vld [vmem:[%s1804_s3 + $0x8] sm:$0xff] (!%p348_p2)  ;;  %v440_v7 = vld [vmem:[%s1805_s4] sm:$0xff] (!%p348_p2)  ;;  %vm449_vm2 = vcmask (!%p348_p2), 39936   ;;  %vm462_vm3 = vcmask (!%p348_p2), 31744  }
   0x7   : > { %1345 = vmatprep.mubr.msk.bf16.mxu0 (!%p348_p2), %vm1486_vm0, %v1483_v0  ;;  %1335 = vmatprep.mubr.msk.bf16.mxu1 (!%p348_p2), %vm1486_vm0, %v1483_v0  ;;  %s1487_s25 = smov (!%p348_p2), 1   ;;  %v441_v8 = vld [vmem:[%s1805_s4 + $0x8] sm:$0xff] (!%p348_p2)  ;;  %v1604_v10 = vand.u32 (!%p348_p2), 127, %v408_v9  ;;  %vm480_vm4 = vcmask (!%p348_p2), 7168   ;;  %vm1615_vm5 = vmneg (!%p348_p2), %vm462_vm3  ;;  %v1465_v26 = vld [vmem:[%s1803_s2] sm:$0xff] (!%p348_p2)   ;;  %vm500_vm6 = vcmask (!%p348_p2), 392192  }
   0x8   : > { %1460 = vset.pattern.permute.xlu1 (!%p348_p2), %v1488_v5  ;;  %1461 = vset.pattern.permute.xlu0 (!%p348_p2), %v1488_v5  ;;  %v1467_v28 = vld [vmem:[%s1803_s2 + $0x8] sm:$0xff] (!%p348_p2)   ;;  %v1468_v29 = vld [vmem:[%s1803_s2 + $0x10] sm:$0xff] (!%p348_p2)   ;;  %s1489_s30 = smov (!%p348_p2), 127   ;;  %s1490_s12 = smov (!%p348_p2), 125   ;;  %v686_v56 = vld [vmem:[%s1807_s6] sm:$0xff] (!%p348_p2)  ;;  %vm724_vm8 = vcmask (!%p348_p2), 121856  }
   0x9   : > { %v414_v11 = vand.u32 (!%p348_p2), 3, %v1604_v10  ;;  %s1491_s13 = smov (!%p348_p2), 3   ;;  %s1492_s14 = smov (!%p348_p2), 123   ;;  %v687_v55 = vld [vmem:[%s1807_s6 + $0x8] sm:$0xff] (!%p348_p2)  ;;  %v688_v58 = vld [vmem:[%s1808_s7] sm:$0xff] (!%p348_p2)  ;;  %vm709_vm9 = vcmask (!%p348_p2), 23552  }
   0xa   : > { %s1493_s15 = smov (!%p348_p2), 124   ;;  %v689_v57 = vld [vmem:[%s1808_s7 + $0x8] sm:$0xff] (!%p348_p2)  ;;  %vm832_vm10 = vcmask (!%p348_p2), 105472   ;;  %vm845_vm11 = vcmask (!%p348_p2), 89088   ;;  %vm839_vm12 = vcmask (!%p348_p2), 97280   ;;  %vm1163_vm13 = vcmask (!%p348_p2), 130048  }
   0xb   : > { %vm422_vm1 = vcmp.ge.s32.totalorder (!%p348_p2), %v414_v11, 1  ;;  %vm426_vm7 = vcmp.lt.s32.totalorder (!%p348_p2), %v414_v11, 3 }
   0xc   : > { %v1244_v12 = vsel (!%p348_p2), %vm422_vm1, 1.0, %v1483_v0  ;;  %v1245_v62 = vsel (!%p348_p2), %vm426_vm7, 1.0, %v1483_v0 }
   0xd   : > { %s1816_s18 = smov (!%p392_p3, %s1233_s18), 1  ;;  %v1610_v13 = vpack.c.bf16 %v1244_v12, %v1244_v12 }
   0xe   : > { %s1290_s19 = sshll.u32 %s1816_s18, 5  ;;  %s1291_s26 = sshll.u32 %s1816_s18, 4 }
   0xf   : > { %s1570_s22 = scalar_lea.vmem %s1801_s0, %s1290_s19  ;;  %s401_s29 = scalar_lea.vmem %s1802_s1, %s1291_s26 }
  0x10   : > { %v1573_v1 = vld [vmem:[%s1570_s22 + $0x18] sm:$0xff]   ;;  %v1576_v2 = vld [vmem:[%s1570_s22 + $0x10] sm:$0xff]   ;;  %v1464_v3 = vld [vmem:[%s1570_s22 + $0x8] sm:$0xff]   ;;  %s406_s28 = scalar_lea.vmem %s1812_s11, %s1291_s26 }
  0x11   : > { %447 = vrot.lane.b32.xlu0 %v1573_v1, %s1484_s23  ;;  %466 = vrot.lane.b32.xlu1 %v1573_v1, %s1485_s24  ;;  %v1466_v24 = vld [vmem:[%s1570_s22] sm:$0xff]   ;;  %v681_v50 = vld [vmem:[%s401_s29 + $0x8] sm:$0xff] }
  0x12   : > { %v680_v49 = vld [vmem:[%s401_s29] sm:$0xff] }
  0x15   : > { %460 = vrot.lane.b32.xlu0 %v1576_v2, %s1485_s24  ;;  %478 = vrot.lane.b32.xlu1 %v1464_v3, %s1487_s25 }
  0x19   : > { %594 = vrot.lane.b32.xlu0 %v1573_v1, %s1487_s25  ;;  %658 = vperm.xlu1 %1460, %v438_v4  }
  0x1d   : > { %663 = vperm.xlu0 %1461, %v439_v6   ;;  %670 = vperm.xlu1 %1460, %v440_v7   ;;  %v1469_v6 = vld [vmem:[%s1806_s5 + $0x8] sm:$0xff]  }
  0x21   : > { %675 = vperm.xlu1 %1460, %v441_v8  }
  0x83   : > { %v448_v14 = vpop.permute.xlu0 %447  ;;  %v467_v15 = vpop.permute.xlu1 %466 }
  0x84   : > { %v452_v16 = vsel %vm449_vm2, 0, %v448_v14 }
  0x85   : > { %v454_v17 = vmul.bf16 %v452_v16, %v1610_v13 }
  0x87   : > { %1340 = vmatpush3.bf16.msra.mxu0 %v454_v17  ;;  %v461_v18 = vpop.permute.xlu0 %460  ;;  %v479_v19 = vpop.permute.xlu1 %478 }
  0x88   : > { %1341 = vmatprep.subr.bf16.mxu0 %v1483_v0  ;;  %v482_v21 = vsel %vm480_vm4, 0, %v479_v19 }
  0x89   : > { %v484_v22 = vmul.bf16 %v482_v21, %v1610_v13 }
  0x8b   : > { %1342 = vmatpush3.bf16.msk.msra.mxu0 %vm1615_vm5, %v461_v18  ;;  %v595_v23 = vpop.permute.xlu0 %594  ;;  %1330 = vmatpush3.bf16.msra.mxu1 %v484_v22 }
  0x8c   : > { %1343 = vmatprep.subr.bf16.mxu0 %v1483_v0  ;;  %v597_v25 = vsel %vm480_vm4, 0, %v595_v23  ;;  %1331 = vmatprep.subr.bf16.mxu1 %v1483_v0  ;;  %v1471_v23 = vld [vmem:[%s1806_s5 + $0x10] sm:$0xff]  }
  0x8d   : > { %v599_v27 = vmul.bf16 %v597_v25, %v1610_v13 }
  0x8f   : > { %1344 = vmatpush3.bf16.msk.msra.mxu0 %vm1615_vm5, %v467_v15  ;;  %1332 = vmatpush3.bf16.msra.mxu1 %v1466_v24  ;;  %v1470_v15 = vld [vmem:[%s1806_s5] sm:$0xff]  }
  0x90   : > { %1349 = vmatprep.subr.bf16.mxu0 %v1483_v0  ;;  %1333 = vmatprep.subr.bf16.mxu1 %v1483_v0 }
  0x92   : > { %1346 = vmatmul.mubr.msk.bf16.vlgmr.msra.gmra.mrb[0].mxu0 %vm500_vm6, %v1465_v26 }
  0x93   : > { %1350 = vmatpush3.bf16.msra.mxu0 %v599_v27  ;;  %1334 = vmatpush3.bf16.msra.mxu1 %v1464_v3 }
  0x94   : > { %1351 = vmatprep.subr.bf16.mxu0 %v1483_v0  ;;  %1355 = vmatprep.mubr.msk.bf16.mxu0 %vm1486_vm0, %v1483_v0 }
  0x95   : > { %1359 = vmatprep.subr.bf16.mxu1 %v1483_v0 }
  0x96   : > { %1336 = vmatmul.mubr.msk.bf16.vlgmr.msra.gmra.mrb[0].mxu1 %vm500_vm6, %v1467_v28 }
  0x97   : > { %1352 = vmatpush3.bf16.msra.mxu0 %v1576_v2  ;;  %1365 = vmatprep.mubr.msk.bf16.mxu1 %vm1486_vm0, %v1483_v0 }
  0x98   : > { %1353 = vmatprep.subr.bf16.mxu0 %v1483_v0  ;;  %v659_v32 = vpop.permute.xlu1 %658 }
  0x9b   : > { %1354 = vmatpush3.bf16.msra.mxu0 %v1573_v1  ;;  %v1694_v1 = vpack.c.bf16 %v1245_v62, %v1245_v62 }
  0x9c   : > { %1389 = vmatprep.subr.bf16.mxu0 %v1483_v0  ;;  %v671_v35 = vpop.permute.xlu1 %670  ;;  %v664_v40 = vpop.permute.xlu0 %663 }
  0x9e   : > { %1356 = vmatmul.mubr.msk.bf16.vlgmr.msra.gmra.mrb[0].mxu0 %vm500_vm6, %v1468_v29 }
  0x9f   : > { %1395 = vmatprep.mubr.msk.bf16.mxu0 %vm1486_vm0, %v1483_v0 }
  0xa0   : > { %v676_v46 = vpop.permute.xlu1 %675 }
 0x169   : > { %v538_v30 = vpop.f32.mrb[0].mxu1 }
 0x16a   : > { %v1337_v31 = vpop.f32.mrb[1].mxu1 }
 0x16b   : > { %v541_v33 = vpop.f32.mrb[2].mxu1 }
 0x16c   : > { %v1338_v34 = vpop.f32.mrb[3].mxu1 }
 0x171   : > { %v647_v36 = vpop.f32.mrb[0].mxu0 }
 0x172   : > { %v1419_v37 = vadd.f32 %v647_v36, %v538_v30  ;;  %v1357_v38 = vpop.f32.mrb[1].mxu0 }
 0x173   : > { %v650_v39 = vpop.f32.mrb[2].mxu0 }
 0x174   : > { %v666_v41 = vmul.f32 %v1419_v37, %v659_v32  ;;  %v1420_v42 = vadd.f32 %v650_v39, %v541_v33  ;;  %v1358_v43 = vpop.f32.mrb[3].mxu0  ;;  %v691_v39 = vld [vmem:[%s1810_s9 + $0x8] sm:$0xff] }
 0x176   : > { %v678_v44 = vadd.f32 %v671_v35, %v666_v41  ;;  %v667_v45 = vmul.f32 %v1420_v42, %v664_v40  ;;  %v690_v40 = vld [vmem:[%s1810_s9] sm:$0xff]  ;;  %v693_v41 = vld [vmem:[%s1811_s10 + $0x8] sm:$0xff] }
 0x177   : > { %v692_v42 = vld [vmem:[%s1811_s10] sm:$0xff] }
 0x178   : > { %v682_v47 = vmax.f32 %v678_v44, 0.0  ;;  %v679_v48 = vadd.f32 %v676_v46, %v667_v45 }
 0x17a   : > { %v683_v51 = vmax.f32 %v679_v48, 0.0  ;;  %v1662_v52 = vadd.f32 %v682_v47, %v680_v49 }
 0x17c   : > { %v1664_v53 = vadd.f32 %v683_v51, %v681_v50  ;;  %v1472_v51 = vld [vmem:[%s1809_s8 + $0x8] sm:$0xff]  }
 0x17e   : > { %v694_v54 = vpack.c.bf16 %v1664_v53, %v1662_v52 }
 0x180   : > { %722 = vrot.lane.b32.xlu1 %v694_v54, %s1489_s30  ;;  %716 = vrot.lane.b32.xlu0 %v694_v54, %s1487_s25 }
 0x184   : > { %702 = vrot.lane.b32.xlu1 %v694_v54, %s1485_s24  ;;  %696 = vrot.lane.b32.xlu0 %v694_v54, %s1484_s23 }
 0x188   : > { %830 = vrot.lane.b32.xlu1 %v694_v54, %s1490_s12  ;;  %707 = vrot.lane.b32.xlu0 %v694_v54, %s1491_s13 }
 0x18c   : > { %843 = vrot.lane.b32.xlu1 %v694_v54, %s1492_s14  ;;  %837 = vrot.lane.b32.xlu0 %v694_v54, %s1493_s15 }
 0x190   : > { %911 = vperm.xlu1 %1460, %v687_v55   ;;  %906 = vperm.xlu0 %1461, %v686_v56  }
 0x194   : > { %923 = vperm.xlu1 %1460, %v689_v57   ;;  %918 = vperm.xlu0 %1461, %v688_v58  }
 0x1f2   : > { %v717_v59 = vpop.permute.xlu0 %716  ;;  %v723_v63 = vpop.permute.xlu1 %722 }
 0x1f3   : > { %v719_v60 = vsel %vm480_vm4, 0, %v717_v59  ;;  %v726_v2 = vsel %vm724_vm8, %v723_v63, 0 }
 0x1f4   : > { %v721_v61 = vmul.bf16 %v719_v60, %v1610_v13  ;;  %v728_v4 = vmul.bf16 %v726_v2, %v1694_v1 }
 0x1f6   : > { %1360 = vmatpush3.bf16.msra.mxu1 %v721_v61  ;;  %v697_v3 = vpop.permute.xlu0 %696  ;;  %v703_v7 = vpop.permute.xlu1 %702  ;;  %v1473_v61 = vld [vmem:[%s1809_s8] sm:$0xff]  }
 0x1f7   : > { %1361 = vmatprep.subr.bf16.mxu1 %v1483_v0  ;;  %v699_v5 = vsel %vm449_vm2, 0, %v697_v3 }
 0x1f8   : > { %v701_v8 = vmul.bf16 %v699_v5, %v1610_v13 }
 0x1fa   : > { %1362 = vmatpush3.bf16.msra.mxu1 %v694_v54  ;;  %v708_v9 = vpop.permute.xlu0 %707  ;;  %v831_v11 = vpop.permute.xlu1 %830 }
 0x1fb   : > { %1363 = vmatprep.subr.bf16.mxu1 %v1483_v0  ;;  %v711_v10 = vsel %vm709_vm9, 0, %v708_v9  ;;  %v834_v14 = vsel %vm832_vm10, %v831_v11, 0 }
 0x1fc   : > { %v713_v12 = vmul.bf16 %v711_v10, %v1694_v1  ;;  %v836_v16 = vmul.bf16 %v834_v14, %v1610_v13 }
 0x1fe   : > { %1364 = vmatpush3.bf16.msra.mxu1 %v728_v4  ;;  %v844_v17 = vpop.permute.xlu1 %843  ;;  %v838_v18 = vpop.permute.xlu0 %837 }
 0x1ff   : > { %1369 = vmatprep.subr.bf16.mxu1 %v1483_v0  ;;  %v847_v19 = vsel %vm845_vm11, %v844_v17, 0  ;;  %v841_v21 = vsel %vm839_vm12, %v838_v18, 0 }
 0x200   : > { %v849_v22 = vmul.bf16 %v847_v19, %v1694_v1 }
 0x201   : > { %1366 = vmatmul.mubr.msk.bf16.vlgmr.msra.gmra.mrb[4].mxu1 %vm500_vm6, %v1469_v6 }
 0x202   : > { %1370 = vmatpush3.bf16.msra.mxu1 %v701_v8  ;;  %1375 = vmatprep.mubr.msk.bf16.mxu1 %vm1486_vm0, %v1483_v0 }
 0x203   : > { %1371 = vmatprep.subr.bf16.mxu1 %v1483_v0 }
 0x206   : > { %1372 = vmatpush3.bf16.msk.msra.mxu1 %vm1615_vm5, %v703_v7 }
 0x207   : > { %1373 = vmatprep.subr.bf16.mxu1 %v1483_v0 }
 0x20a   : > { %1374 = vmatpush3.bf16.msra.mxu1 %v713_v12 }
 0x20b   : > { %1379 = vmatprep.subr.bf16.mxu1 %v1483_v0 }
 0x20d   : > { %1376 = vmatmul.mubr.msk.bf16.vlgmr.msra.gmra.mrb[4].mxu1 %vm500_vm6, %v1470_v15 }
 0x20e   : > { %1380 = vmatpush3.bf16.msra.mxu1 %v836_v16  ;;  %1385 = vmatprep.mubr.msk.bf16.mxu1 %vm1486_vm0, %v1483_v0 }
 0x20f   : > { %1381 = vmatprep.subr.bf16.mxu1 %v1483_v0  ;;  %v907_v24 = vpop.permute.xlu0 %906  ;;  %v912_v25 = vpop.permute.xlu1 %911 }
 0x212   : > { %1382 = vmatpush3.bf16.msra.mxu1 %v841_v21 }
 0x213   : > { %1383 = vmatprep.subr.bf16.mxu1 %v1483_v0  ;;  %v919_v29 = vpop.permute.xlu0 %918  ;;  %v924_v34 = vpop.permute.xlu1 %923 }
 0x216   : > { %1384 = vmatpush3.bf16.msra.mxu1 %v849_v22 }
 0x219   : > { %1386 = vmatmul.mubr.msk.bf16.vlgmr.msra.gmra.mrb[4].mxu1 %vm500_vm6, %v1471_v23 }
 0x2ec   : > { %v895_v26 = vpop.f32.mrb[4].mxu1 }
 0x2ed   : > { %v914_v27 = vmul.f32 %v907_v24, %v895_v26  ;;  %v1387_v28 = vpop.f32.mrb[5].mxu1 }
 0x2ee   : > { %v898_v30 = vpop.f32.mrb[6].mxu1 }
 0x2ef   : > { %v926_v31 = vadd.f32 %v919_v29, %v914_v27  ;;  %v915_v32 = vmul.f32 %v912_v25, %v898_v30  ;;  %v1388_v33 = vpop.f32.mrb[7].mxu1 }
 0x2f1   : > { %v927_v35 = vadd.f32 %v924_v34, %v915_v32  ;;  %v928_v36 = vmax.f32 %v926_v31, 0.0 }
 0x2f3   : > { %v929_v37 = vmax.f32 %v927_v35, 0.0 }
 0x2f5   : > { %v930_v38 = vpack.c.bf16 %v929_v37, %v928_v36 }
 0x2f7   : > { %957 = vrot.lane.b32.xlu1 %v930_v38, %s1489_s30  ;;  %951 = vrot.lane.b32.xlu0 %v930_v38, %s1487_s25 }
 0x2fb   : > { %938 = vrot.lane.b32.xlu1 %v930_v38, %s1485_s24  ;;  %932 = vrot.lane.b32.xlu0 %v930_v38, %s1484_s23 }
 0x2ff   : > { %1064 = vrot.lane.b32.xlu1 %v930_v38, %s1490_s12  ;;  %943 = vrot.lane.b32.xlu0 %v930_v38, %s1491_s13 }
 0x303   : > { %1075 = vrot.lane.b32.xlu1 %v930_v38, %s1492_s14  ;;  %1070 = vrot.lane.b32.xlu0 %v930_v38, %s1493_s15 }
 0x307   : > { %1142 = vperm.xlu1 %1460, %v691_v39   ;;  %1137 = vperm.xlu0 %1461, %v690_v40  }
 0x30b   : > { %1154 = vperm.xlu1 %1460, %v693_v41   ;;  %1149 = vperm.xlu0 %1461, %v692_v42  }
 0x369   : > { %v952_v43 = vpop.permute.xlu0 %951  ;;  %v958_v46 = vpop.permute.xlu1 %957 }
 0x36a   : > { %v954_v44 = vsel %vm480_vm4, 0, %v952_v43  ;;  %v960_v47 = vsel %vm724_vm8, %v958_v46, 0 }
 0x36b   : > { %v956_v45 = vmul.bf16 %v954_v44, %v1610_v13  ;;  %v962_v49 = vmul.bf16 %v960_v47, %v1694_v1 }
 0x36d   : > { %1390 = vmatpush3.bf16.msra.mxu0 %v956_v45  ;;  %v933_v48 = vpop.permute.xlu0 %932  ;;  %v939_v54 = vpop.permute.xlu1 %938 }
 0x36e   : > { %1391 = vmatprep.subr.bf16.mxu0 %v1483_v0  ;;  %v935_v50 = vsel %vm449_vm2, 0, %v933_v48 }
 0x36f   : > { %v937_v55 = vmul.bf16 %v935_v50, %v1610_v13 }
 0x371   : > { %1392 = vmatpush3.bf16.msra.mxu0 %v930_v38  ;;  %v944_v56 = vpop.permute.xlu0 %943  ;;  %v1065_v58 = vpop.permute.xlu1 %1064 }
 0x372   : > { %1393 = vmatprep.subr.bf16.mxu0 %v1483_v0  ;;  %v946_v57 = vsel %vm709_vm9, 0, %v944_v56  ;;  %v1067_v60 = vsel %vm832_vm10, %v1065_v58, 0 }
 0x373   : > { %v948_v59 = vmul.bf16 %v946_v57, %v1694_v1  ;;  %v1069_v62 = vmul.bf16 %v1067_v60, %v1610_v13  ;;  %v1474_v13 = vld [vmem:[%s1809_s8 + $0x10] sm:$0xff]  }
 0x375   : > { %1394 = vmatpush3.bf16.msra.mxu0 %v962_v49  ;;  %v1076_v63 = vpop.permute.xlu1 %1075  ;;  %v1071_v20 = vpop.permute.xlu0 %1070 }
 0x376   : > { %1399 = vmatprep.subr.bf16.mxu0 %v1483_v0  ;;  %v1078_v2 = vsel %vm845_vm11, %v1076_v63, 0  ;;  %v1073_v3 = vsel %vm839_vm12, %v1071_v20, 0 }
 0x377   : > { %v1080_v4 = vmul.bf16 %v1078_v2, %v1694_v1 }
 0x378   : > { %1396 = vmatmul.mubr.msk.bf16.vlgmr.msra.gmra.mrb[4].mxu0 %vm500_vm6, %v1472_v51 }
 0x379   : > { %1400 = vmatpush3.bf16.msra.mxu0 %v937_v55  ;;  %1405 = vmatprep.mubr.msk.bf16.mxu0 %vm1486_vm0, %v1483_v0 }
 0x37a   : > { %1401 = vmatprep.subr.bf16.mxu0 %v1483_v0 }
 0x37d   : > { %1402 = vmatpush3.bf16.msk.msra.mxu0 %vm1615_vm5, %v939_v54 }
 0x37e   : > { %1403 = vmatprep.subr.bf16.mxu0 %v1483_v0 }
 0x381   : > { %1404 = vmatpush3.bf16.msra.mxu0 %v948_v59 }
 0x382   : > { %1409 = vmatprep.subr.bf16.mxu0 %v1483_v0 }
 0x384   : > { %1406 = vmatmul.mubr.msk.bf16.vlgmr.msra.gmra.mrb[4].mxu0 %vm500_vm6, %v1473_v61 }
 0x385   : > { %1410 = vmatpush3.bf16.msra.mxu0 %v1069_v62  ;;  %1415 = vmatprep.mubr.msk.bf16.mxu0 %vm1486_vm0, %v1483_v0 }
 0x386   : > { %1411 = vmatprep.subr.bf16.mxu0 %v1483_v0  ;;  %v1138_v5 = vpop.permute.xlu0 %1137  ;;  %v1143_v6 = vpop.permute.xlu1 %1142 }
 0x389   : > { %1412 = vmatpush3.bf16.msra.mxu0 %v1073_v3 }
 0x38a   : > { %1413 = vmatprep.subr.bf16.mxu0 %v1483_v0  ;;  %v1150_v10 = vpop.permute.xlu0 %1149  ;;  %v1155_v15 = vpop.permute.xlu1 %1154 }
 0x38d   : > { %1414 = vmatpush3.bf16.msra.mxu0 %v1080_v4 }
 0x390   : > { %1416 = vmatmul.mubr.msk.bf16.vlgmr.msra.gmra.mrb[4].mxu0 %vm500_vm6, %v1474_v13 }
 0x463   : > { %v1126_v7 = vpop.f32.mrb[4].mxu0 }
 0x464   : > { %v1145_v8 = vmul.f32 %v1138_v5, %v1126_v7  ;;  %v1417_v9 = vpop.f32.mrb[5].mxu0 }
 0x465   : > { %v1129_v11 = vpop.f32.mrb[6].mxu0 }
 0x466   : > { %v1157_v12 = vadd.f32 %v1150_v10, %v1145_v8  ;;  %v1146_v14 = vmul.f32 %v1143_v6, %v1129_v11  ;;  %v1418_v0 = vpop.f32.mrb[7].mxu0 }
 0x468   : > { %v1159_v1 = vadd.f32 %v1157_v12, %v1662_v52  ;;  %v1158_v16 = vadd.f32 %v1155_v15, %v1146_v14 }
 0x46a   : > { %v1161_v17 = vmax.f32 %v1159_v1, 0.0  ;;  %v1160_v18 = vadd.f32 %v1158_v16, %v1664_v53 }
 0x46c   : > { %1164 = vst.msk [vmem:[%s406_s28] sm:$0xff] %vm1163_vm13, %v1161_v17  ;;  %v1162_v19 = vmax.f32 %v1160_v18, 0.0 }
 0x46e   : > { %1165 = vst.msk [vmem:[%s406_s28 + $0x8] sm:$0xff] %vm1163_vm13, %v1162_v19 }
 0x46f PF: > { %s21_s17 = sadd.s32 1, %s1481_s17  }
 0x470   : > { %p18_p4 = scmp.ge.s32.totalorder %s21_s17, 4  }
 0x472   :  { %20 = sbr.rel (!%p18_p4) target bundleno = 1 (0x1), region = 103 }

</bundles_post_ra>
